<compile_context>
chip_gen: v6e
topology: v6e:2x2x1
jax: 0.10.0
libtpu: 0.0.40
codegen_flags: <defaults>
</compile_context>

<pallas_src>
import functools

import jax
import jax.numpy as jnp
from jax import lax
from jax.experimental import pallas as pl
from jax.experimental.pallas import tpu as pltpu

LANE = 128
SUBLANE = 8


def _round_up(x, m):
    return ((x + m - 1) // m) * m


def _conv_bn_relu_kernel(x_ref, w_ref, scale_ref, shift_ref, o_ref, *,
                         TH, WP, KH, DH):
    """One (batch element, H-tile) output block.

    x_ref     : (HT, WP, KP)      bf16  kw-packed image of this batch element
                                        (KP ~= KW*Cin; resident across H tiles)
    w_ref     : (KH, KP, Cout_p)  bf16  kw/cin-packed conv weights
    scale_ref : (1, Cout_p)       f32   folded BN scale = gamma/sqrt(var+eps)
    shift_ref : (1, Cout_p)       f32   folded BN shift  (incl. conv bias)
    o_ref     : (TH*WP, Cout_p)   f32   lane-dense output tile; also serves as
                                        the f32 accumulator (KH accumulate steps)
    """
    KP = x_ref.shape[-1]
    row0 = pl.program_id(1) * TH
    for kh in range(KH):
        # Leading-dim slice of the resident image (cheap, no relayout).
        # The reshape is a no-op because WP % 8 == 0.  kw and cin both live on
        # the lane axis, so there is no sublane-crossing kw shift at all.
        patch = x_ref[pl.ds(row0 + kh * DH, TH), :, :].reshape(TH * WP, KP)
        contrib = jnp.dot(patch, w_ref[kh], preferred_element_type=jnp.float32)
        if kh == 0:
            o_ref[...] = contrib
        else:
            o_ref[...] += contrib
    # Fused BatchNorm(eval) + bias + ReLU epilogue, lane-dense f32 store.
    o_ref[...] = jnp.maximum(o_ref[...] * scale_ref[...] + shift_ref[...], 0.0)


def conv2d_block_pallas(x_nhwc, weight_hwio, scale, shift, *,
                        dilation=(1, 1), th=None,
                        compute_dtype=jnp.bfloat16, trim_output=True):
    """x_nhwc: (B, H, W, Cin) f32; weight_hwio: (KH, KW, Cin, Cout).

    Returns (B, H, W, Cout) f32 (or the padded (B, HP, WP, Cout_p) slab when
    trim_output=False, for stacking Conv2dBlocks without per-layer de-pad).
    """
    B, H, W, Cin = x_nhwc.shape
    KH, KW, wcin, Cout = weight_hwio.shape
    assert wcin == Cin
    DH, DW = dilation
    # Even kernel sizes would need asymmetric "same" padding; reject loudly
    # instead of silently reading past the padded extent.
    assert KH % 2 == 1 and KW % 2 == 1, "Conv2dBlock kernel requires odd kernel sizes"

    ph, pw = DH * (KH - 1) // 2, DW * (KW - 1) // 2

    esz = jnp.dtype(compute_dtype).itemsize
    WP = _round_up(W, SUBLANE)                   # layout-free in-kernel reshapes
    cout_p = _round_up(max(Cout, LANE), LANE)    # lane-dense (unmasked) stores
    K = KW * Cin                                 # packed contraction, no 128 pad
    KP = _round_up(K, (SUBLANE * 4) // esz)      # RHS packed-sublane granule (16 for bf16)

    # H tile: aim M = TH*WP at a few hundred rows (feeds 256-deep MXUs on
    # v6e/v7x, amortizes the epilogue); pad H up to a multiple of TH rather
    # than falling back to a single huge tile.
    if th is None:
        th = max(1, min(512 // WP, 64, H))
    TH = max(1, min(th, H))
    HP = _round_up(H, TH)
    HT = HP + DH * (KH - 1)                      # rows incl. the kh halo

    # Spatial "same" pad + alignment pad (bottom/right only, so the valid
    # output region is untouched).  No channel padding in HBM.
    x_sp = jnp.pad(x_nhwc,
                   ((0, 0), (ph, ph + HP - H), (pw, pw + WP - W), (0, 0)))
    # kw-packed layout (kw-major on the lane axis), built once in XLA: one
    # contiguous width slice per kw.  Removes all in-kernel kw shifts and makes
    # K = KW*Cin (>=256 at real Cin=64) the MXU contraction depth.
    x_col = jnp.concatenate(
        [x_sp[:, :, kw * DW:kw * DW + WP, :] for kw in range(KW)], axis=-1)
    x_col = jnp.pad(x_col, ((0, 0), (0, 0), (0, 0), (0, KP - K))
                    ).astype(compute_dtype)       # (B, HT, WP, KP)

    w_packed = jnp.pad(weight_hwio.reshape(KH, K, Cout),
                       ((0, 0), (0, KP - K), (0, cout_p - Cout))
                       ).astype(compute_dtype)    # (KH, KP, Cout_p)
    scale2 = jnp.pad(scale, (0, cout_p - Cout)).reshape(1, cout_p).astype(jnp.float32)
    shift2 = jnp.pad(shift, (0, cout_p - Cout)).reshape(1, cout_p).astype(jnp.float32)

    kernel = functools.partial(_conv_bn_relu_kernel, TH=TH, WP=WP, KH=KH, DH=DH)

    # VMEM budget from actual buffer sizes (+ headroom), not a blind constant.
    img_bytes = HT * WP * KP * esz
    w_bytes = KH * KP * cout_p * esz
    out_bytes = TH * WP * cout_p * 4

    # Megacore: shard the batch across cores when B >= 2 so the resident image
    # is not duplicated per TensorCore; only shard H when B == 1.
    dims = ("parallel", "arbitrary") if B > 1 else ("arbitrary", "parallel")

    def build(image_buffers):
        img_kwargs = {}
        if image_buffers == 1:
            # Image block index only changes per batch element -> single-buffer
            # it so the dominant VMEM allocation is not doubled (v7x: 64 MiB).
            img_kwargs["pipeline_mode"] = pl.Buffered(1)
        need = (image_buffers * img_bytes + 2 * w_bytes + 2 * out_bytes
                + 2 * 2 * cout_p * 4)
        vmem_limit = int(min(128 * 2 ** 20,
                             max(32 * 2 ** 20, need * 1.25 + (2 << 20))))
        return pl.pallas_call(
            kernel,
            out_shape=jax.ShapeDtypeStruct((B, HP * WP, cout_p), jnp.float32),
            grid_spec=pltpu.PrefetchScalarGridSpec(
                num_scalar_prefetch=0,
                grid=(B, HP // TH),
                in_specs=[
                    # Whole kw-packed image of batch b; block index constant in
                    # h, so it is DMA'd once per batch element and reused.
                    pl.BlockSpec((None, HT, WP, KP), lambda b, h: (b, 0, 0, 0),
                                 **img_kwargs),
                    pl.BlockSpec((KH, KP, cout_p), lambda b, h: (0, 0, 0)),
                    pl.BlockSpec((1, cout_p), lambda b, h: (0, 0)),
                    pl.BlockSpec((1, cout_p), lambda b, h: (0, 0)),
                ],
                # 2-D lane-dense output block: store needs no 3-D reshape.
                out_specs=pl.BlockSpec((None, TH * WP, cout_p),
                                       lambda b, h: (b, h, 0)),
            ),
            compiler_params=pltpu.CompilerParams(
                dimension_semantics=dims, vmem_limit_bytes=vmem_limit),
        )

    try:
        out = jax.block_until_ready(build(1)(x_col, w_packed, scale2, shift2))
    except Exception:
        # pl.Buffered(1) (single-buffered image) not supported by this JAX
        # version: fall back to the default double-buffered image block.
        out = build(2)(x_col, w_packed, scale2, shift2)

    out = out.reshape(B, HP, WP, cout_p)
    if trim_output:
        # TODO(synk): when stacking Conv2dBlocks, keep the channel/spatial
        # padded NHWC activation (and emit bf16) between layers instead of
        # de-padding per layer; trim only at the stack boundary.
        out = out[:, :H, :W, :Cout]
    return out


def reference_conv2d_block(x_nchw, weight_oihw, bias, gamma, beta, mean, var,
                           eps=1e-5, dilation=(1, 1)):
    """Pure-JAX f32 reference matching PyTorch Conv2d + BatchNorm2d(eval) + ReLU."""
    KH, KW = weight_oihw.shape[2], weight_oihw.shape[3]
    dh, dw = dilation
    ph, pw = dh * (KH - 1) // 2, dw * (KW - 1) // 2
    y = lax.conv_general_dilated(
        x_nchw, weight_oihw, window_strides=(1, 1),
        padding=((ph, ph), (pw, pw)), rhs_dilation=(dh, dw),
        dimension_numbers=("NCHW", "OIHW", "NCHW"))
    y = y + bias[None, :, None, None]
    y = (y - mean[None, :, None, None]) / jnp.sqrt(var[None, :, None, None] + eps)
    y = y * gamma[None, :, None, None] + beta[None, :, None, None]
    return jnp.maximum(y, 0.0)


def _run_case(key, *, B, Cin, Cout, H, W, KH, KW, dilation):
    eps = 1e-5
    ks = jax.random.split(key, 7)
    x_nchw = jax.random.normal(ks[0], (B, Cin, H, W), jnp.float32)

    # Deterministic synthetic params (shapes from nn.Conv2d / nn.BatchNorm2d).
    weight_oihw = jax.random.normal(ks[1], (Cout, Cin, KH, KW), jnp.float32) * 0.1
    bias = jax.random.normal(ks[2], (Cout,), jnp.float32) * 0.1
    gamma = 1.0 + 0.1 * jax.random.normal(ks[3], (Cout,), jnp.float32)
    beta = 0.1 * jax.random.normal(ks[4], (Cout,), jnp.float32)
    running_mean = 0.1 * jax.random.normal(ks[5], (Cout,), jnp.float32)
    running_var = 1.0 + 0.1 * jax.random.uniform(ks[6], (Cout,), jnp.float32)
    # TODO(synk): training-mode BatchNorm (batch statistics) not implemented;
    # inference-mode running stats are folded into a per-channel affine.
    scale = gamma / jnp.sqrt(running_var + eps)
    shift = beta - running_mean * scale + bias * scale

    # NCHW -> NHWC for the kernel; OIHW -> HWIO for the weights.
    x_nhwc = jnp.transpose(x_nchw, (0, 2, 3, 1))
    weight_hwio = jnp.transpose(weight_oihw, (2, 3, 1, 0))

    out_nhwc = conv2d_block_pallas(x_nhwc, weight_hwio, scale, shift,
                                   dilation=dilation)
    out_nhwc = jax.block_until_ready(out_nhwc)
    out_nchw = jnp.transpose(out_nhwc, (0, 3, 1, 2))

    ref = reference_conv2d_block(x_nchw, weight_oihw, bias, gamma, beta,
                                 running_mean, running_var, eps, dilation)
    assert out_nchw.shape == (B, Cout, H, W)
    # bf16 MXU inputs with f32 accumulation: accepted accuracy/perf tradeoff.
    err = float(jnp.max(jnp.abs(out_nchw - ref)))
    assert jnp.allclose(out_nchw, ref, atol=3e-2, rtol=3e-2), err


if __name__ == "__main__":
    key = jax.random.PRNGKey(0)
    k1, k2 = jax.random.split(key)
    # B x Cin x F x T, VoiceFilter-like but small.
    _run_case(k1, B=2, Cin=4, Cout=8, H=16, W=16, KH=5, KW=5, dilation=(1, 1))
    # Exercise non-8-aligned H/W, odd channel counts and a dilated layer.
    _run_case(k2, B=2, Cin=3, Cout=5, H=13, W=10, KH=5, KW=5, dilation=(2, 2))
    print("KERNEL_OK")
</pallas_src>

<mosaic_0001>
module attributes {stable_mosaic.version = 11 : i64} {
  func.func @_conv_bn_relu_kernel(%arg0: i32, %arg1: i32, %arg2: memref<1x20x16x32xbf16, #tpu.memory_space<vmem>>, %arg3: memref<5x32x128xbf16, #tpu.memory_space<vmem>>, %arg4: memref<1x128xf32, #tpu.memory_space<vmem>>, %arg5: memref<1x128xf32, #tpu.memory_space<vmem>>, %arg6: memref<1x256x128xf32, #tpu.memory_space<vmem>>) attributes {dimension_semantics = [#tpu.dimension_semantics<parallel>, #tpu.dimension_semantics<arbitrary>], iteration_bounds = array<i64: 2, 1>, scalar_prefetch = 0 : i64, scratch_operands = 0 : i64, tpu.core_type = #tpu.core_type<tc>, window_params = [{pipeline_mode = #tpu.pipeline_mode<synchronous>, transform_indices = @transform_0, window_bounds = array<i64: 1, 20, 16, 32>}, {pipeline_mode = #tpu.pipeline_mode<synchronous>, transform_indices = @transform_1, window_bounds = array<i64: 5, 32, 128>}, {pipeline_mode = #tpu.pipeline_mode<synchronous>, transform_indices = @transform_2, window_bounds = array<i64: 1, 128>}, {pipeline_mode = #tpu.pipeline_mode<synchronous>, transform_indices = @transform_3, window_bounds = array<i64: 1, 128>}, {transform_indices = @transform_4, window_bounds = array<i64: 1, 256, 128>}]} {
    %c16_i32 = arith.constant 16 : i32
    %0 = arith.muli %arg1, %c16_i32 : i32
    %c0_i32 = arith.constant 0 : i32
    %1 = arith.addi %0, %c0_i32 : i32
    %c0 = arith.constant 0 : index
    %2 = arith.index_cast %1 : i32 to index
    %c0_0 = arith.constant 0 : index
    %c0_1 = arith.constant 0 : index
    %3 = vector.load %arg2[%c0, %2, %c0_0, %c0_1] : memref<1x20x16x32xbf16, #tpu.memory_space<vmem>>, vector<1x16x16x32xbf16>
    %4 = vector.shape_cast %3 : vector<1x16x16x32xbf16> to vector<16x16x32xbf16>
    %5 = vector.shape_cast %4 : vector<16x16x32xbf16> to vector<256x32xbf16>
    %c0_2 = arith.constant 0 : index
    %c0_3 = arith.constant 0 : index
    %c0_4 = arith.constant 0 : index
    %6 = vector.load %arg3[%c0_2, %c0_3, %c0_4] : memref<5x32x128xbf16, #tpu.memory_space<vmem>>, vector<1x32x128xbf16>
    %7 = vector.shape_cast %6 : vector<1x32x128xbf16> to vector<32x128xbf16>
    %cst = arith.constant dense<0.000000e+00> : vector<256x128xf32>
    %8 = tpu.matmul %5, %7, %cst {dimension_numbers = #tpu.dot_dimension_numbers<[1], [0], [0], [1], [0, 0, 1, 1], [], []>} : vector<256x32xbf16>, vector<32x128xbf16>, vector<256x128xf32> -> vector<256x128xf32>
    %c0_5 = arith.constant 0 : index
    %c0_6 = arith.constant 0 : index
    %c0_7 = arith.constant 0 : index
    %9 = vector.load %arg6[%c0_5, %c0_6, %c0_7] : memref<1x256x128xf32, #tpu.memory_space<vmem>>, vector<1x256x128xf32>
    %10 = vector.shape_cast %9 : vector<1x256x128xf32> to vector<256x128xf32>
    %11 = vector.shape_cast %8 : vector<256x128xf32> to vector<1x256x128xf32>
    tpu.vector_store %arg6[%c0_5, %c0_6, %c0_7], %11 {strides = array<i32>} : memref<1x256x128xf32, #tpu.memory_space<vmem>>, vector<1x256x128xf32>,
    %c1_i32 = arith.constant 1 : i32
    %12 = arith.addi %0, %c1_i32 : i32
    %c0_8 = arith.constant 0 : index
    %13 = arith.index_cast %12 : i32 to index
    %c0_9 = arith.constant 0 : index
    %c0_10 = arith.constant 0 : index
    %14 = vector.load %arg2[%c0_8, %13, %c0_9, %c0_10] : memref<1x20x16x32xbf16, #tpu.memory_space<vmem>>, vector<1x16x16x32xbf16>
    %15 = vector.shape_cast %14 : vector<1x16x16x32xbf16> to vector<16x16x32xbf16>
    %16 = vector.shape_cast %15 : vector<16x16x32xbf16> to vector<256x32xbf16>
    %c1 = arith.constant 1 : index
    %c0_11 = arith.constant 0 : index
    %c0_12 = arith.constant 0 : index
    %17 = vector.load %arg3[%c1, %c0_11, %c0_12] : memref<5x32x128xbf16, #tpu.memory_space<vmem>>, vector<1x32x128xbf16>
    %18 = vector.shape_cast %17 : vector<1x32x128xbf16> to vector<32x128xbf16>
    %cst_13 = arith.constant dense<0.000000e+00> : vector<256x128xf32>
    %19 = tpu.matmul %16, %18, %cst_13 {dimension_numbers = #tpu.dot_dimension_numbers<[1], [0], [0], [1], [0, 0, 1, 1], [], []>} : vector<256x32xbf16>, vector<32x128xbf16>, vector<256x128xf32> -> vector<256x128xf32>
    %c0_14 = arith.constant 0 : index
    %c0_15 = arith.constant 0 : index
    %c0_16 = arith.constant 0 : index
    %20 = vector.load %arg6[%c0_14, %c0_15, %c0_16] : memref<1x256x128xf32, #tpu.memory_space<vmem>>, vector<1x256x128xf32>
    %21 = vector.shape_cast %20 : vector<1x256x128xf32> to vector<256x128xf32>
    %22 = arith.addf %21, %19 : vector<256x128xf32>
    %c0_17 = arith.constant 0 : index
    %c0_18 = arith.constant 0 : index
    %c0_19 = arith.constant 0 : index
    %23 = vector.load %arg6[%c0_17, %c0_18, %c0_19] : memref<1x256x128xf32, #tpu.memory_space<vmem>>, vector<1x256x128xf32>
    %24 = vector.shape_cast %23 : vector<1x256x128xf32> to vector<256x128xf32>
    %25 = vector.shape_cast %22 : vector<256x128xf32> to vector<1x256x128xf32>
    tpu.vector_store %arg6[%c0_17, %c0_18, %c0_19], %25 {strides = array<i32>} : memref<1x256x128xf32, #tpu.memory_space<vmem>>, vector<1x256x128xf32>,
    %c2_i32 = arith.constant 2 : i32
    %26 = arith.addi %0, %c2_i32 : i32
    %c0_20 = arith.constant 0 : index
    %27 = arith.index_cast %26 : i32 to index
    %c0_21 = arith.constant 0 : index
    %c0_22 = arith.constant 0 : index
    %28 = vector.load %arg2[%c0_20, %27, %c0_21, %c0_22] : memref<1x20x16x32xbf16, #tpu.memory_space<vmem>>, vector<1x16x16x32xbf16>
    %29 = vector.shape_cast %28 : vector<1x16x16x32xbf16> to vector<16x16x32xbf16>
    %30 = vector.shape_cast %29 : vector<16x16x32xbf16> to vector<256x32xbf16>
    %c2 = arith.constant 2 : index
    %c0_23 = arith.constant 0 : index
    %c0_24 = arith.constant 0 : index
    %31 = vector.load %arg3[%c2, %c0_23, %c0_24] : memref<5x32x128xbf16, #tpu.memory_space<vmem>>, vector<1x32x128xbf16>
    %32 = vector.shape_cast %31 : vector<1x32x128xbf16> to vector<32x128xbf16>
    %cst_25 = arith.constant dense<0.000000e+00> : vector<256x128xf32>
    %33 = tpu.matmul %30, %32, %cst_25 {dimension_numbers = #tpu.dot_dimension_numbers<[1], [0], [0], [1], [0, 0, 1, 1], [], []>} : vector<256x32xbf16>, vector<32x128xbf16>, vector<256x128xf32> -> vector<256x128xf32>
    %c0_26 = arith.constant 0 : index
    %c0_27 = arith.constant 0 : index
    %c0_28 = arith.constant 0 : index
    %34 = vector.load %arg6[%c0_26, %c0_27, %c0_28] : memref<1x256x128xf32, #tpu.memory_space<vmem>>, vector<1x256x128xf32>
    %35 = vector.shape_cast %34 : vector<1x256x128xf32> to vector<256x128xf32>
    %36 = arith.addf %35, %33 : vector<256x128xf32>
    %c0_29 = arith.constant 0 : index
    %c0_30 = arith.constant 0 : index
    %c0_31 = arith.constant 0 : index
    %37 = vector.load %arg6[%c0_29, %c0_30, %c0_31] : memref<1x256x128xf32, #tpu.memory_space<vmem>>, vector<1x256x128xf32>
    %38 = vector.shape_cast %37 : vector<1x256x128xf32> to vector<256x128xf32>
    %39 = vector.shape_cast %36 : vector<256x128xf32> to vector<1x256x128xf32>
    tpu.vector_store %arg6[%c0_29, %c0_30, %c0_31], %39 {strides = array<i32>} : memref<1x256x128xf32, #tpu.memory_space<vmem>>, vector<1x256x128xf32>,
    %c3_i32 = arith.constant 3 : i32
    %40 = arith.addi %0, %c3_i32 : i32
    %c0_32 = arith.constant 0 : index
    %41 = arith.index_cast %40 : i32 to index
    %c0_33 = arith.constant 0 : index
    %c0_34 = arith.constant 0 : index
    %42 = vector.load %arg2[%c0_32, %41, %c0_33, %c0_34] : memref<1x20x16x32xbf16, #tpu.memory_space<vmem>>, vector<1x16x16x32xbf16>
    %43 = vector.shape_cast %42 : vector<1x16x16x32xbf16> to vector<16x16x32xbf16>
    %44 = vector.shape_cast %43 : vector<16x16x32xbf16> to vector<256x32xbf16>
    %c3 = arith.constant 3 : index
    %c0_35 = arith.constant 0 : index
    %c0_36 = arith.constant 0 : index
    %45 = vector.load %arg3[%c3, %c0_35, %c0_36] : memref<5x32x128xbf16, #tpu.memory_space<vmem>>, vector<1x32x128xbf16>
    %46 = vector.shape_cast %45 : vector<1x32x128xbf16> to vector<32x128xbf16>
    %cst_37 = arith.constant dense<0.000000e+00> : vector<256x128xf32>
    %47 = tpu.matmul %44, %46, %cst_37 {dimension_numbers = #tpu.dot_dimension_numbers<[1], [0], [0], [1], [0, 0, 1, 1], [], []>} : vector<256x32xbf16>, vector<32x128xbf16>, vector<256x128xf32> -> vector<256x128xf32>
    %c0_38 = arith.constant 0 : index
    %c0_39 = arith.constant 0 : index
    %c0_40 = arith.constant 0 : index
    %48 = vector.load %arg6[%c0_38, %c0_39, %c0_40] : memref<1x256x128xf32, #tpu.memory_space<vmem>>, vector<1x256x128xf32>
    %49 = vector.shape_cast %48 : vector<1x256x128xf32> to vector<256x128xf32>
    %50 = arith.addf %49, %47 : vector<256x128xf32>
    %c0_41 = arith.constant 0 : index
    %c0_42 = arith.constant 0 : index
    %c0_43 = arith.constant 0 : index
    %51 = vector.load %arg6[%c0_41, %c0_42, %c0_43] : memref<1x256x128xf32, #tpu.memory_space<vmem>>, vector<1x256x128xf32>
    %52 = vector.shape_cast %51 : vector<1x256x128xf32> to vector<256x128xf32>
    %53 = vector.shape_cast %50 : vector<256x128xf32> to vector<1x256x128xf32>
    tpu.vector_store %arg6[%c0_41, %c0_42, %c0_43], %53 {strides = array<i32>} : memref<1x256x128xf32, #tpu.memory_space<vmem>>, vector<1x256x128xf32>,
    %c4_i32 = arith.constant 4 : i32
    %54 = arith.addi %0, %c4_i32 : i32
    %c0_44 = arith.constant 0 : index
    %55 = arith.index_cast %54 : i32 to index
    %c0_45 = arith.constant 0 : index
    %c0_46 = arith.constant 0 : index
    %56 = vector.load %arg2[%c0_44, %55, %c0_45, %c0_46] : memref<1x20x16x32xbf16, #tpu.memory_space<vmem>>, vector<1x16x16x32xbf16>
    %57 = vector.shape_cast %56 : vector<1x16x16x32xbf16> to vector<16x16x32xbf16>
    %58 = vector.shape_cast %57 : vector<16x16x32xbf16> to vector<256x32xbf16>
    %c4 = arith.constant 4 : index
    %c0_47 = arith.constant 0 : index
    %c0_48 = arith.constant 0 : index
    %59 = vector.load %arg3[%c4, %c0_47, %c0_48] : memref<5x32x128xbf16, #tpu.memory_space<vmem>>, vector<1x32x128xbf16>
    %60 = vector.shape_cast %59 : vector<1x32x128xbf16> to vector<32x128xbf16>
    %cst_49 = arith.constant dense<0.000000e+00> : vector<256x128xf32>
    %61 = tpu.matmul %58, %60, %cst_49 {dimension_numbers = #tpu.dot_dimension_numbers<[1], [0], [0], [1], [0, 0, 1, 1], [], []>} : vector<256x32xbf16>, vector<32x128xbf16>, vector<256x128xf32> -> vector<256x128xf32>
    %c0_50 = arith.constant 0 : index
    %c0_51 = arith.constant 0 : index
    %c0_52 = arith.constant 0 : index
    %62 = vector.load %arg6[%c0_50, %c0_51, %c0_52] : memref<1x256x128xf32, #tpu.memory_space<vmem>>, vector<1x256x128xf32>
    %63 = vector.shape_cast %62 : vector<1x256x128xf32> to vector<256x128xf32>
    %64 = arith.addf %63, %61 : vector<256x128xf32>
    %c0_53 = arith.constant 0 : index
    %c0_54 = arith.constant 0 : index
    %c0_55 = arith.constant 0 : index
    %65 = vector.load %arg6[%c0_53, %c0_54, %c0_55] : memref<1x256x128xf32, #tpu.memory_space<vmem>>, vector<1x256x128xf32>
    %66 = vector.shape_cast %65 : vector<1x256x128xf32> to vector<256x128xf32>
    %67 = vector.shape_cast %64 : vector<256x128xf32> to vector<1x256x128xf32>
    tpu.vector_store %arg6[%c0_53, %c0_54, %c0_55], %67 {strides = array<i32>} : memref<1x256x128xf32, #tpu.memory_space<vmem>>, vector<1x256x128xf32>,
    %c0_56 = arith.constant 0 : index
    %c0_57 = arith.constant 0 : index
    %c0_58 = arith.constant 0 : index
    %68 = vector.load %arg6[%c0_56, %c0_57, %c0_58] : memref<1x256x128xf32, #tpu.memory_space<vmem>>, vector<1x256x128xf32>
    %69 = vector.shape_cast %68 : vector<1x256x128xf32> to vector<256x128xf32>
    %c0_59 = arith.constant 0 : index
    %c0_60 = arith.constant 0 : index
    %70 = vector.load %arg4[%c0_59, %c0_60] : memref<1x128xf32, #tpu.memory_space<vmem>>, vector<1x128xf32>
    %71 = vector.broadcast %70 : vector<1x128xf32> to vector<256x128xf32>
    %72 = arith.mulf %69, %71 : vector<256x128xf32>
    %c0_61 = arith.constant 0 : index
    %c0_62 = arith.constant 0 : index
    %73 = vector.load %arg5[%c0_61, %c0_62] : memref<1x128xf32, #tpu.memory_space<vmem>>, vector<1x128xf32>
    %74 = vector.broadcast %73 : vector<1x128xf32> to vector<256x128xf32>
    %75 = arith.addf %72, %74 : vector<256x128xf32>
    %cst_63 = arith.constant 0.000000e+00 : f32
    %76 = vector.broadcast %cst_63 : f32 to vector<256x128xf32>
    %77 = arith.maximumf %75, %76 : vector<256x128xf32>
    %c0_64 = arith.constant 0 : index
    %c0_65 = arith.constant 0 : index
    %c0_66 = arith.constant 0 : index
    %78 = vector.load %arg6[%c0_64, %c0_65, %c0_66] : memref<1x256x128xf32, #tpu.memory_space<vmem>>, vector<1x256x128xf32>
    %79 = vector.shape_cast %78 : vector<1x256x128xf32> to vector<256x128xf32>
    %80 = vector.shape_cast %77 : vector<256x128xf32> to vector<1x256x128xf32>
    tpu.vector_store %arg6[%c0_64, %c0_65, %c0_66], %80 {strides = array<i32>} : memref<1x256x128xf32, #tpu.memory_space<vmem>>, vector<1x256x128xf32>,
    return
  }
  func.func @transform_0(%arg0: i32, %arg1: i32) -> (i32, i32, i32, i32) {
    %c0_i32 = arith.constant 0 : i32
    %c0_i32_0 = arith.constant 0 : i32
    %c0_i32_1 = arith.constant 0 : i32
    %c0_i32_2 = arith.constant 0 : i32
    return %arg0, %c0_i32, %c0_i32_0, %c0_i32_1 : i32, i32, i32, i32
  }
  func.func @transform_1(%arg0: i32, %arg1: i32) -> (i32, i32, i32) {
    %c0_i32 = arith.constant 0 : i32
    %c0_i32_0 = arith.constant 0 : i32
    %c0_i32_1 = arith.constant 0 : i32
    %c0_i32_2 = arith.constant 0 : i32
    return %c0_i32, %c0_i32_0, %c0_i32_1 : i32, i32, i32
  }
  func.func @transform_2(%arg0: i32, %arg1: i32) -> (i32, i32) {
    %c0_i32 = arith.constant 0 : i32
    %c0_i32_0 = arith.constant 0 : i32
    %c0_i32_1 = arith.constant 0 : i32
    return %c0_i32, %c0_i32_0 : i32, i32
  }
  func.func @transform_3(%arg0: i32, %arg1: i32) -> (i32, i32) {
    %c0_i32 = arith.constant 0 : i32
    %c0_i32_0 = arith.constant 0 : i32
    %c0_i32_1 = arith.constant 0 : i32
    return %c0_i32, %c0_i32_0 : i32, i32
  }
  func.func @transform_4(%arg0: i32, %arg1: i32) -> (i32, i32, i32) {
    %c0_i32 = arith.constant 0 : i32
    %c0_i32_0 = arith.constant 0 : i32
    return %arg0, %arg1, %c0_i32 : i32, i32, i32
  }
}

module attributes {stable_mosaic.version = 11 : i64} {
  func.func @_conv_bn_relu_kernel(%arg0: i32, %arg1: i32, %arg2: memref<1x20x16x32xbf16, #tpu.memory_space<vmem>>, %arg3: memref<5x32x128xbf16, #tpu.memory_space<vmem>>, %arg4: memref<1x128xf32, #tpu.memory_space<vmem>>, %arg5: memref<1x128xf32, #tpu.memory_space<vmem>>, %arg6: memref<1x256x128xf32, #tpu.memory_space<vmem>>) attributes {dimension_semantics = [#tpu.dimension_semantics<parallel>, #tpu.dimension_semantics<arbitrary>], iteration_bounds = array<i64: 2, 1>, scalar_prefetch = 0 : i64, scratch_operands = 0 : i64, tpu.core_type = #tpu.core_type<tc>, window_params = [{transform_indices = @transform_0, window_bounds = array<i64: 1, 20, 16, 32>}, {pipeline_mode = #tpu.pipeline_mode<synchronous>, transform_indices = @transform_1, window_bounds = array<i64: 5, 32, 128>}, {pipeline_mode = #tpu.pipeline_mode<synchronous>, transform_indices = @transform_2, window_bounds = array<i64: 1, 128>}, {pipeline_mode = #tpu.pipeline_mode<synchronous>, transform_indices = @transform_3, window_bounds = array<i64: 1, 128>}, {transform_indices = @transform_4, window_bounds = array<i64: 1, 256, 128>}]} {
    %c16_i32 = arith.constant 16 : i32
    %0 = arith.muli %arg1, %c16_i32 : i32
    %c0_i32 = arith.constant 0 : i32
    %1 = arith.addi %0, %c0_i32 : i32
    %c0 = arith.constant 0 : index
    %2 = arith.index_cast %1 : i32 to index
    %c0_0 = arith.constant 0 : index
    %c0_1 = arith.constant 0 : index
    %3 = vector.load %arg2[%c0, %2, %c0_0, %c0_1] : memref<1x20x16x32xbf16, #tpu.memory_space<vmem>>, vector<1x16x16x32xbf16>
    %4 = vector.shape_cast %3 : vector<1x16x16x32xbf16> to vector<16x16x32xbf16>
    %5 = vector.shape_cast %4 : vector<16x16x32xbf16> to vector<256x32xbf16>
    %c0_2 = arith.constant 0 : index
    %c0_3 = arith.constant 0 : index
    %c0_4 = arith.constant 0 : index
    %6 = vector.load %arg3[%c0_2, %c0_3, %c0_4] : memref<5x32x128xbf16, #tpu.memory_space<vmem>>, vector<1x32x128xbf16>
    %7 = vector.shape_cast %6 : vector<1x32x128xbf16> to vector<32x128xbf16>
    %cst = arith.constant dense<0.000000e+00> : vector<256x128xf32>
    %8 = tpu.matmul %5, %7, %cst {dimension_numbers = #tpu.dot_dimension_numbers<[1], [0], [0], [1], [0, 0, 1, 1], [], []>} : vector<256x32xbf16>, vector<32x128xbf16>, vector<256x128xf32> -> vector<256x128xf32>
    %c0_5 = arith.constant 0 : index
    %c0_6 = arith.constant 0 : index
    %c0_7 = arith.constant 0 : index
    %9 = vector.load %arg6[%c0_5, %c0_6, %c0_7] : memref<1x256x128xf32, #tpu.memory_space<vmem>>, vector<1x256x128xf32>
    %10 = vector.shape_cast %9 : vector<1x256x128xf32> to vector<256x128xf32>
    %11 = vector.shape_cast %8 : vector<256x128xf32> to vector<1x256x128xf32>
    tpu.vector_store %arg6[%c0_5, %c0_6, %c0_7], %11 {strides = array<i32>} : memref<1x256x128xf32, #tpu.memory_space<vmem>>, vector<1x256x128xf32>,
    %c1_i32 = arith.constant 1 : i32
    %12 = arith.addi %0, %c1_i32 : i32
    %c0_8 = arith.constant 0 : index
    %13 = arith.index_cast %12 : i32 to index
    %c0_9 = arith.constant 0 : index
    %c0_10 = arith.constant 0 : index
    %14 = vector.load %arg2[%c0_8, %13, %c0_9, %c0_10] : memref<1x20x16x32xbf16, #tpu.memory_space<vmem>>, vector<1x16x16x32xbf16>
    %15 = vector.shape_cast %14 : vector<1x16x16x32xbf16> to vector<16x16x32xbf16>
    %16 = vector.shape_cast %15 : vector<16x16x32xbf16> to vector<256x32xbf16>
    %c1 = arith.constant 1 : index
    %c0_11 = arith.constant 0 : index
    %c0_12 = arith.constant 0 : index
    %17 = vector.load %arg3[%c1, %c0_11, %c0_12] : memref<5x32x128xbf16, #tpu.memory_space<vmem>>, vector<1x32x128xbf16>
    %18 = vector.shape_cast %17 : vector<1x32x128xbf16> to vector<32x128xbf16>
    %cst_13 = arith.constant dense<0.000000e+00> : vector<256x128xf32>
    %19 = tpu.matmul %16, %18, %cst_13 {dimension_numbers = #tpu.dot_dimension_numbers<[1], [0], [0], [1], [0, 0, 1, 1], [], []>} : vector<256x32xbf16>, vector<32x128xbf16>, vector<256x128xf32> -> vector<256x128xf32>
    %c0_14 = arith.constant 0 : index
    %c0_15 = arith.constant 0 : index
    %c0_16 = arith.constant 0 : index
    %20 = vector.load %arg6[%c0_14, %c0_15, %c0_16] : memref<1x256x128xf32, #tpu.memory_space<vmem>>, vector<1x256x128xf32>
    %21 = vector.shape_cast %20 : vector<1x256x128xf32> to vector<256x128xf32>
    %22 = arith.addf %21, %19 : vector<256x128xf32>
    %c0_17 = arith.constant 0 : index
    %c0_18 = arith.constant 0 : index
    %c0_19 = arith.constant 0 : index
    %23 = vector.load %arg6[%c0_17, %c0_18, %c0_19] : memref<1x256x128xf32, #tpu.memory_space<vmem>>, vector<1x256x128xf32>
    %24 = vector.shape_cast %23 : vector<1x256x128xf32> to vector<256x128xf32>
    %25 = vector.shape_cast %22 : vector<256x128xf32> to vector<1x256x128xf32>
    tpu.vector_store %arg6[%c0_17, %c0_18, %c0_19], %25 {strides = array<i32>} : memref<1x256x128xf32, #tpu.memory_space<vmem>>, vector<1x256x128xf32>,
    %c2_i32 = arith.constant 2 : i32
    %26 = arith.addi %0, %c2_i32 : i32
    %c0_20 = arith.constant 0 : index
    %27 = arith.index_cast %26 : i32 to index
    %c0_21 = arith.constant 0 : index
    %c0_22 = arith.constant 0 : index
    %28 = vector.load %arg2[%c0_20, %27, %c0_21, %c0_22] : memref<1x20x16x32xbf16, #tpu.memory_space<vmem>>, vector<1x16x16x32xbf16>
    %29 = vector.shape_cast %28 : vector<1x16x16x32xbf16> to vector<16x16x32xbf16>
    %30 = vector.shape_cast %29 : vector<16x16x32xbf16> to vector<256x32xbf16>
    %c2 = arith.constant 2 : index
    %c0_23 = arith.constant 0 : index
    %c0_24 = arith.constant 0 : index
    %31 = vector.load %arg3[%c2, %c0_23, %c0_24] : memref<5x32x128xbf16, #tpu.memory_space<vmem>>, vector<1x32x128xbf16>
    %32 = vector.shape_cast %31 : vector<1x32x128xbf16> to vector<32x128xbf16>
    %cst_25 = arith.constant dense<0.000000e+00> : vector<256x128xf32>
    %33 = tpu.matmul %30, %32, %cst_25 {dimension_numbers = #tpu.dot_dimension_numbers<[1], [0], [0], [1], [0, 0, 1, 1], [], []>} : vector<256x32xbf16>, vector<32x128xbf16>, vector<256x128xf32> -> vector<256x128xf32>
    %c0_26 = arith.constant 0 : index
    %c0_27 = arith.constant 0 : index
    %c0_28 = arith.constant 0 : index
    %34 = vector.load %arg6[%c0_26, %c0_27, %c0_28] : memref<1x256x128xf32, #tpu.memory_space<vmem>>, vector<1x256x128xf32>
    %35 = vector.shape_cast %34 : vector<1x256x128xf32> to vector<256x128xf32>
    %36 = arith.addf %35, %33 : vector<256x128xf32>
    %c0_29 = arith.constant 0 : index
    %c0_30 = arith.constant 0 : index
    %c0_31 = arith.constant 0 : index
    %37 = vector.load %arg6[%c0_29, %c0_30, %c0_31] : memref<1x256x128xf32, #tpu.memory_space<vmem>>, vector<1x256x128xf32>
    %38 = vector.shape_cast %37 : vector<1x256x128xf32> to vector<256x128xf32>
    %39 = vector.shape_cast %36 : vector<256x128xf32> to vector<1x256x128xf32>
    tpu.vector_store %arg6[%c0_29, %c0_30, %c0_31], %39 {strides = array<i32>} : memref<1x256x128xf32, #tpu.memory_space<vmem>>, vector<1x256x128xf32>,
    %c3_i32 = arith.constant 3 : i32
    %40 = arith.addi %0, %c3_i32 : i32
    %c0_32 = arith.constant 0 : index
    %41 = arith.index_cast %40 : i32 to index
    %c0_33 = arith.constant 0 : index
    %c0_34 = arith.constant 0 : index
    %42 = vector.load %arg2[%c0_32, %41, %c0_33, %c0_34] : memref<1x20x16x32xbf16, #tpu.memory_space<vmem>>, vector<1x16x16x32xbf16>
    %43 = vector.shape_cast %42 : vector<1x16x16x32xbf16> to vector<16x16x32xbf16>
    %44 = vector.shape_cast %43 : vector<16x16x32xbf16> to vector<256x32xbf16>
    %c3 = arith.constant 3 : index
    %c0_35 = arith.constant 0 : index
    %c0_36 = arith.constant 0 : index
    %45 = vector.load %arg3[%c3, %c0_35, %c0_36] : memref<5x32x128xbf16, #tpu.memory_space<vmem>>, vector<1x32x128xbf16>
    %46 = vector.shape_cast %45 : vector<1x32x128xbf16> to vector<32x128xbf16>
    %cst_37 = arith.constant dense<0.000000e+00> : vector<256x128xf32>
    %47 = tpu.matmul %44, %46, %cst_37 {dimension_numbers = #tpu.dot_dimension_numbers<[1], [0], [0], [1], [0, 0, 1, 1], [], []>} : vector<256x32xbf16>, vector<32x128xbf16>, vector<256x128xf32> -> vector<256x128xf32>
    %c0_38 = arith.constant 0 : index
    %c0_39 = arith.constant 0 : index
    %c0_40 = arith.constant 0 : index
    %48 = vector.load %arg6[%c0_38, %c0_39, %c0_40] : memref<1x256x128xf32, #tpu.memory_space<vmem>>, vector<1x256x128xf32>
    %49 = vector.shape_cast %48 : vector<1x256x128xf32> to vector<256x128xf32>
    %50 = arith.addf %49, %47 : vector<256x128xf32>
    %c0_41 = arith.constant 0 : index
    %c0_42 = arith.constant 0 : index
    %c0_43 = arith.constant 0 : index
    %51 = vector.load %arg6[%c0_41, %c0_42, %c0_43] : memref<1x256x128xf32, #tpu.memory_space<vmem>>, vector<1x256x128xf32>
    %52 = vector.shape_cast %51 : vector<1x256x128xf32> to vector<256x128xf32>
    %53 = vector.shape_cast %50 : vector<256x128xf32> to vector<1x256x128xf32>
    tpu.vector_store %arg6[%c0_41, %c0_42, %c0_43], %53 {strides = array<i32>} : memref<1x256x128xf32, #tpu.memory_space<vmem>>, vector<1x256x128xf32>,
    %c4_i32 = arith.constant 4 : i32
    %54 = arith.addi %0, %c4_i32 : i32
    %c0_44 = arith.constant 0 : index
    %55 = arith.index_cast %54 : i32 to index
    %c0_45 = arith.constant 0 : index
    %c0_46 = arith.constant 0 : index
    %56 = vector.load %arg2[%c0_44, %55, %c0_45, %c0_46] : memref<1x20x16x32xbf16, #tpu.memory_space<vmem>>, vector<1x16x16x32xbf16>
    %57 = vector.shape_cast %56 : vector<1x16x16x32xbf16> to vector<16x16x32xbf16>
    %58 = vector.shape_cast %57 : vector<16x16x32xbf16> to vector<256x32xbf16>
    %c4 = arith.constant 4 : index
    %c0_47 = arith.constant 0 : index
    %c0_48 = arith.constant 0 : index
    %59 = vector.load %arg3[%c4, %c0_47, %c0_48] : memref<5x32x128xbf16, #tpu.memory_space<vmem>>, vector<1x32x128xbf16>
    %60 = vector.shape_cast %59 : vector<1x32x128xbf16> to vector<32x128xbf16>
    %cst_49 = arith.constant dense<0.000000e+00> : vector<256x128xf32>
    %61 = tpu.matmul %58, %60, %cst_49 {dimension_numbers = #tpu.dot_dimension_numbers<[1], [0], [0], [1], [0, 0, 1, 1], [], []>} : vector<256x32xbf16>, vector<32x128xbf16>, vector<256x128xf32> -> vector<256x128xf32>
    %c0_50 = arith.constant 0 : index
    %c0_51 = arith.constant 0 : index
    %c0_52 = arith.constant 0 : index
    %62 = vector.load %arg6[%c0_50, %c0_51, %c0_52] : memref<1x256x128xf32, #tpu.memory_space<vmem>>, vector<1x256x128xf32>
    %63 = vector.shape_cast %62 : vector<1x256x128xf32> to vector<256x128xf32>
    %64 = arith.addf %63, %61 : vector<256x128xf32>
    %c0_53 = arith.constant 0 : index
    %c0_54 = arith.constant 0 : index
    %c0_55 = arith.constant 0 : index
    %65 = vector.load %arg6[%c0_53, %c0_54, %c0_55] : memref<1x256x128xf32, #tpu.memory_space<vmem>>, vector<1x256x128xf32>
    %66 = vector.shape_cast %65 : vector<1x256x128xf32> to vector<256x128xf32>
    %67 = vector.shape_cast %64 : vector<256x128xf32> to vector<1x256x128xf32>
    tpu.vector_store %arg6[%c0_53, %c0_54, %c0_55], %67 {strides = array<i32>} : memref<1x256x128xf32, #tpu.memory_space<vmem>>, vector<1x256x128xf32>,
    %c0_56 = arith.constant 0 : index
    %c0_57 = arith.constant 0 : index
    %c0_58 = arith.constant 0 : index
    %68 = vector.load %arg6[%c0_56, %c0_57, %c0_58] : memref<1x256x128xf32, #tpu.memory_space<vmem>>, vector<1x256x128xf32>
    %69 = vector.shape_cast %68 : vector<1x256x128xf32> to vector<256x128xf32>
    %c0_59 = arith.constant 0 : index
    %c0_60 = arith.constant 0 : index
    %70 = vector.load %arg4[%c0_59, %c0_60] : memref<1x128xf32, #tpu.memory_space<vmem>>, vector<1x128xf32>
    %71 = vector.broadcast %70 : vector<1x128xf32> to vector<256x128xf32>
    %72 = arith.mulf %69, %71 : vector<256x128xf32>
    %c0_61 = arith.constant 0 : index
    %c0_62 = arith.constant 0 : index
    %73 = vector.load %arg5[%c0_61, %c0_62] : memref<1x128xf32, #tpu.memory_space<vmem>>, vector<1x128xf32>
    %74 = vector.broadcast %73 : vector<1x128xf32> to vector<256x128xf32>
    %75 = arith.addf %72, %74 : vector<256x128xf32>
    %cst_63 = arith.constant 0.000000e+00 : f32
    %76 = vector.broadcast %cst_63 : f32 to vector<256x128xf32>
    %77 = arith.maximumf %75, %76 : vector<256x128xf32>
    %c0_64 = arith.constant 0 : index
    %c0_65 = arith.constant 0 : index
    %c0_66 = arith.constant 0 : index
    %78 = vector.load %arg6[%c0_64, %c0_65, %c0_66] : memref<1x256x128xf32, #tpu.memory_space<vmem>>, vector<1x256x128xf32>
    %79 = vector.shape_cast %78 : vector<1x256x128xf32> to vector<256x128xf32>
    %80 = vector.shape_cast %77 : vector<256x128xf32> to vector<1x256x128xf32>
    tpu.vector_store %arg6[%c0_64, %c0_65, %c0_66], %80 {strides = array<i32>} : memref<1x256x128xf32, #tpu.memory_space<vmem>>, vector<1x256x128xf32>,
    return
  }
  func.func @transform_0(%arg0: i32, %arg1: i32) -> (i32, i32, i32, i32) {
    %c0_i32 = arith.constant 0 : i32
    %c0_i32_0 = arith.constant 0 : i32
    %c0_i32_1 = arith.constant 0 : i32
    %c0_i32_2 = arith.constant 0 : i32
    return %arg0, %c0_i32, %c0_i32_0, %c0_i32_1 : i32, i32, i32, i32
  }
  func.func @transform_1(%arg0: i32, %arg1: i32) -> (i32, i32, i32) {
    %c0_i32 = arith.constant 0 : i32
    %c0_i32_0 = arith.constant 0 : i32
    %c0_i32_1 = arith.constant 0 : i32
    %c0_i32_2 = arith.constant 0 : i32
    return %c0_i32, %c0_i32_0, %c0_i32_1 : i32, i32, i32
  }
  func.func @transform_2(%arg0: i32, %arg1: i32) -> (i32, i32) {
    %c0_i32 = arith.constant 0 : i32
    %c0_i32_0 = arith.constant 0 : i32
    %c0_i32_1 = arith.constant 0 : i32
    return %c0_i32, %c0_i32_0 : i32, i32
  }
  func.func @transform_3(%arg0: i32, %arg1: i32) -> (i32, i32) {
    %c0_i32 = arith.constant 0 : i32
    %c0_i32_0 = arith.constant 0 : i32
    %c0_i32_1 = arith.constant 0 : i32
    return %c0_i32, %c0_i32_0 : i32, i32
  }
  func.func @transform_4(%arg0: i32, %arg1: i32) -> (i32, i32, i32) {
    %c0_i32 = arith.constant 0 : i32
    %c0_i32_0 = arith.constant 0 : i32
    return %arg0, %arg1, %c0_i32 : i32, i32, i32
  }
}

</mosaic_0001>

<bundles_post_ra>
// kernel: tpu_custom_call.1
= control target key start
LH: loop header
LB: loop body
LE: loop exit
PB: predicated region body
PF: predicated region fallthrough
CT: control target
= control target key end

     0   :  { %9 = vsyncpa [#allocation3], 0  ;;  %s4236_s0 = inlined_call_operand.hbm [shape: bf16[2,20,16,32], index: 0, kind: input, shape index: {}]   ;;  %s4237_s1 = inlined_call_operand.hbm [shape: bf16[5,32,128], index: 1, kind: input, shape index: {}]   ;;  %s4238_s2 = inlined_call_operand.vmem [shape: f32[1,128], index: 2, kind: input, shape index: {}]   ;;  %s4239_s3 = inlined_call_operand.vmem [shape: f32[1,128], index: 3, kind: input, shape index: {}]   ;;  %s4240_s4 = inlined_call_operand.hbm [shape: f32[2,256,128], index: 4, kind: output, shape index: {}]  }
   0x1   :  { %10 = vsyncpa [#allocation6], 0 }
   0x2   :  { %11 = vsyncpa [#allocation4], 0 }
   0x3   :  { %13 = vsyncpa [#allocation4 + $0x1], 0  ;;  %s3576_s15 = smov 0   ;;  %s3578_s16 = smov 0  }
   0x4   :  { %s3580_s17 = smov 0   ;;  %s3582_s18 = smov 0  }
   0x5   :  { %s3584_s19 = smov 0   ;;  %s3586_s20 = smov 0  }
   0x6 LB: > { %s2649_s21 = sadd.s32 4294967295, %s3542_s20   ;;  %s2650_s22 = sadd.s32 4294967294, %s3542_s20   ;;  %s3542_s20 = sphi %s3586_s20, %s19_s20   ;;  %s3538_s19 = sphi %s3584_s19, %s4345_s19   ;;  %s3534_s18 = sphi %s3582_s18, %s4344_s18   ;;  %s3530_s17 = sphi %s3580_s17, %s4343_s17   ;;  %s3526_s16 = sphi %s3578_s16, %s4342_s16   ;;  %s3522_s15 = sphi %s3576_s15, %s4341_s15  }
   0x7   : > { %s31_s23 = sadd.s32 1, %s3538_s19  ;;  %s38_s24 = sadd.s32 1, %s3530_s17 }
   0x8   : > { %p33_p0 = scmp.ge.s32.totalorder %s31_s23, 2  ;;  %p51_p1 = scmp.ne.s32.totalorder %s3526_s16, %s3522_s15 }
   0x9   : > { %p3612_p2 = scmp.eq.s32.totalorder %s2649_s21, 0  ;;  %p139_p3 = scmp.ne.s32.totalorder %s3530_s17, %s3526_s16 }
   0xa   : > { %s4347_s23 = smov (%p33_p0, %s31_s23), 0  ;;  %p140_p5 = scmp.eq.s32.totalorder %s2649_s21, 1 }
   0xb   : > { %s4248_s25 = scalar_select %p3612_p2, 1, 0 }
   0xc   : > { %p3622_p4 = por %p3612_p2, %p51_p1  ;;  %s35_s27 = ssub.s32 %s3538_s19, %s4347_s23 }
   0xd   : > { %p146_p6 = scmp.eq.s32.totalorder %s2650_s22, 1  ;;  %p36_p7 = scmp.eq.s32.totalorder %s35_s27, 0 }
   0xe   : > { %s4249_s26 = scalar_select %p3622_p4, 1, 0 }
   0xf   : > { %p3628_p8 = por %p140_p5, %p139_p3  ;;  %p3632_p9 = por %p146_p6, %p51_p1 }
  0x10   : > { %p2651_p10 = scmp.ge.s32.totalorder %s3542_s20, 1  ;;  %p153_p11 = scmp.lt.s32.totalorder %s3542_s20, 3 }
  0x11   : > { %s4250_s28 = scalar_select %p3628_p8, 1, 0 }
  0x12   : > { %s4251_s29 = scalar_select %p3632_p9, 1, 0 }
  0x13   : > { %s3638_s30 = scalar_select %p36_p7, %s3530_s17, %s38_s24  }
  0x14   : > { %s3237_s5 = smul.u32 2560, %s3534_s18  ;;  %p3642_p12 = pnand %p2651_p10, %p153_p11 }
  0x15   : > { %s3544_s10 = smov [#allocation2]   ;;  %s3545_s13 = smov [#allocation5]  }
  0x16   : > { %s4252_s6 = scalar_select %p3642_p12, 1, 0 }
  0x17   : > { %s3649_s9 = scalar_lea.hbm %s4236_s0, %s3237_s5  ;;  %s168_s11 = sshll.u32 %s3544_s10, 4  ;;  %s3653_s11 = int_to_ptr.vmem [resolvable:$true] %s168_s11 }
  0x18   : > { %p3246_p13 = pneg %p3642_p12  ;;  %s181_s14 = sshll.u32 %s3545_s13, 4  ;;  %s3667_s14 = int_to_ptr.vmem [resolvable:$true] %s181_s14 }
  0x19   : > { %s3404_s22 = scalar_lea.hbm %s3649_s9, 2560  ;;  %s3409_s5 = scalar_lea.hbm %s4236_s0, 5120 }
  0x1a   : > { %p3657_p0 = pnand %p3246_p13, %p3622_p4  ;;  %p3663_p1 = pnand %p3246_p13, %p3612_p2 }
  0x1b   : > { %p3405_p3 = scmp.ne.s32.totalorder %s3649_s9, %s3404_s22  ;;  %p3410_p10 = scmp.lt.s32.totalorder %s3649_s9, %s4236_s0 }
  0x1c   : > { %s4254_s21 = scalar_select %p3663_p1, 1, 0 }
  0x1d   : > { %p3406_p5 = pneg %p3657_p0  ;;  %p3411_p11 = scmp.lt.s32.totalorder %s3409_s5, %s3404_s22 }
  0x1f   : > { %p3407_p6 = pnand %p3406_p5, %p3405_p3  ;;  %p3412_p13 = por %p3411_p11, %p3410_p10 }
  0x21   : > { %p3408_p7 = pneg %p3407_p6 }
  0x23   : > { %p3413_p9 = pnand %p3412_p13, %p3408_p7 }
  0x25   : > { %3416 = shalt.err (!%p3413_p9)
}
  0x26   : > { %s3417_s10 = scalar_lea.vmem %s3653_s11, 2560  ;;  %p3425_p6 = scmp.lt.s32.totalorder %s3653_s11, %s3653_s11 }
  0x27   : > { %p3418_p8 = scmp.ne.s32.totalorder %s3653_s11, %s3417_s10  ;;  %p3426_p4 = scmp.lt.s32.totalorder %s3417_s10, %s3417_s10 }
  0x29   : > { %p3420_p2 = pnand %p3418_p8, %p3406_p5  ;;  %p3427_p12 = por %p3426_p4, %p3425_p6 }
  0x2b   : > { %p3421_p3 = pneg %p3420_p2 }
  0x2d   : > { %p3428_p1 = pnand %p3427_p12, %p3421_p3 }
  0x2f   : > { %3431 = shalt.err (!%p3428_p1)
}
  0x30   : > { %s3546_s13 = smov 64   ;;  %s3547_s22 = smov 4  }
  0x31   : > { %3249 = dma.hbm_to_vmem [thread:$0]  (!%p3657_p0), %s3649_s9, 2560, %s3653_s11, [#allocation3], %s3546_s13, %s3546_s13, %s3547_s22  }
  0x32   : > { %p4255_p9 = scmp.ne.s32.totalorder %s4254_s21, 0  ;;  %s3443_s24 = scalar_lea.vmem %s3667_s14, 1280 }
  0x33   : > { %p3444_p2 = scmp.ne.s32.totalorder %s3667_s14, %s3443_s24  ;;  %p3451_p4 = scmp.lt.s32.totalorder %s3667_s14, %s3667_s14 }
  0x34   : > { %p3434_p8 = pneg %p4255_p9  ;;  %p3452_p12 = scmp.lt.s32.totalorder %s3443_s24, %s3443_s24 }
  0x36   : > { %p3446_p5 = pnand %p3444_p2, %p3434_p8  ;;  %p3453_p1 = por %p3452_p12, %p3451_p4 }
  0x38   : > { %p3447_p7 = pneg %p3446_p5 }
  0x3a   : > { %p3454_p10 = pnand %p3453_p1, %p3447_p7 }
  0x3c   : > { %3457 = shalt.err (!%p3454_p10)
}
  0x3d   : > { %3252 = dma.hbm_to_vmem [thread:$0]  (!%p4255_p9), %s4237_s1, 1280, %s3667_s14, [#allocation6], %s3546_s13, %s3546_s13, %s3547_s22  }
  0x3e   : > { %p4256_p0 = scmp.ne.s32.totalorder %s4252_s6, 0 }
  0x40   : > { %203 = sbr.rel (%p4256_p0) target bundleno = 459 (0x1cb), region = 36 }
  0x45   : > { %p4257_p11 = scmp.ne.s32.totalorder %s4249_s26, 0 }
  0x47   : > { %3509 = dma.done.wait (%p4257_p11), [#allocation3], 2560  }
  0x48   : > { %3511 = vsyncadd (%p4257_p11), [#allocation3], 4294964736  ;;  %p4258_p13 = scmp.ne.s32.totalorder %s4248_s25, 0 }
  0x4a   : > { %3513 = dma.done.wait (%p4258_p13), [#allocation6], 1280  }
  0x4b   : > { %3515 = vsyncadd (%p4258_p13), [#allocation6], 4294966016  ;;  %v3314_v0 = vld [vmem:[#allocation5 + $0x8] sm:$0xff]   ;;  %v3315_v1 = vld [vmem:[#allocation5] sm:$0xff]   ;;  %vm362_vm0 = vcmask 261120   ;;  %s225_s25 = sand.u32 1, %s3526_s16  }
  0x4c   : > { %3233 = vmatprep.subr.bf16.mxu1 %v3314_v0  ;;  %3053 = vmatprep.subr.bf16.mxu0 %v3314_v0  ;;  %v3316_v2 = vld [vmem:[#allocation2 + $0x40] sm:$0xff]   ;;  %v3317_v3 = vld [vmem:[#allocation2 + $0x48] sm:$0xff]   ;;  %v3318_v4 = vld [vmem:[#allocation5 + $0x18] sm:$0xff]   ;;  %s2656_s12 = sshll.u32 %s225_s25, 8  ;;  %s2962_s21 = sshll.u32 %s3534_s18, 12 }
  0x4d   : > { %3235 = vmatpush3.bf16.msra.mxu1 %v3314_v0  ;;  %3054 = vmatpush3.bf16.msra.mxu0 %v3314_v0  ;;  %v3319_v5 = vld [vmem:[#allocation2] sm:$0xff]   ;;  %v3320_v6 = vld [vmem:[#allocation2 + $0x8] sm:$0xff]   ;;  %v3321_v7 = vld [vmem:[#allocation2 + $0x50] sm:$0xff]   ;;  %s4016_s14 = scalar_lea.vmem [#allocation7], %s2656_s12  ;;  %s4183_s13 = scalar_lea.hbm %s4240_s4, %s2962_s21 }
  0x4e   : > { %3234 = vmatprep.subr.bf16.mxu1 %v3315_v1  ;;  %3073 = vmatprep.mubr.msk.bf16.mxu1 %vm362_vm0, %v3316_v2  ;;  %v3323_v8 = vld [vmem:[#allocation5 + $0x28] sm:$0xff]   ;;  %v3324_v9 = vld [vmem:[#allocation2 + $0x10] sm:$0xff]   ;;  %v3322_v10 = vld [vmem:[#allocation2 + $0x58] sm:$0xff]   ;;  %s2546_s7 = sshll.u32 %s4016_s14, 4  ;;  %s4191_s18 = scalar_lea.sflag [#allocation4], %s225_s25  ;;  %s4185_s7 = int_to_ptr.vmem [resolvable:$true] %s2546_s7 }
  0x4f   : > { %3055 = vmatprep.subr.bf16.mxu0 %v3315_v1  ;;  %3057 = vmatprep.mubr.msk.bf16.mxu0 %vm362_vm0, %v3319_v5  ;;  %v3325_v11 = vld [vmem:[#allocation2 + $0x18] sm:$0xff]   ;;  %v3326_v12 = vld [vmem:[#allocation2 + $0x60] sm:$0xff]   ;;  %v3328_v13 = vld [vmem:[#allocation5 + $0x10] sm:$0xff]   ;;  %s3458_s22 = scalar_lea.vmem %s4185_s7, 4096  ;;  %p4339_p6 = scmp.ne.s32.totalorder %s4250_s28, 0 }
  0x50   : > { %v3329_v14 = vld [vmem:[#allocation2 + $0x20] sm:$0xff]   ;;  %v3327_v16 = vld [vmem:[#allocation2 + $0x68] sm:$0xff]   ;;  %v3331_v18 = vld [vmem:[#allocation2 + $0x70] sm:$0xff]   ;;  %p3459_p3 = scmp.ne.s32.totalorder %s4185_s7, %s3458_s22  ;;  %s3548_s24 = smov [#allocation7]  }
  0x51   : > { %3236 = vmatpush3.bf16.msra.mxu1 %v3315_v1  ;;  %3056 = vmatpush3.bf16.msra.mxu0 %v3315_v1  ;;  %v3333_v15 = vld [vmem:[#allocation5 + $0x20] sm:$0xff]   ;;  %v3330_v17 = vld [vmem:[#allocation2 + $0x28] sm:$0xff]   ;;  %v3334_v19 = vld [vmem:[#allocation2 + $0x30] sm:$0xff]   ;;  %s3462_s27 = sshll.u32 %s3548_s24, 4  ;;  %s3463_s27 = int_to_ptr.vmem [resolvable:$false] %s3462_s27 }
  0x52   : > { %3089 = vmatprep.subr.bf16.mxu1 %v3318_v4  ;;  %3125 = vmatprep.subr.bf16.mxu0 %v3323_v8  ;;  %v3338_v20 = vld [vmem:[#allocation5 + $0x38] sm:$0xff]   ;;  %v3343_v23 = vld [vmem:[#allocation5 + $0x48] sm:$0xff]   ;;  %v3339_v25 = vld [vmem:[#allocation2 + $0x10] sm:$0xff]   ;;  %p3460_p9 = pnand %p3459_p3, %p4339_p6  ;;  %s3464_s5 = scalar_lea.vmem %s3463_s27, 8192 }
  0x53   : > { %v3332_v21 = vld [vmem:[#allocation2 + $0x78] sm:$0xff]   ;;  %v3336_v24 = vld [vmem:[#allocation2 + $0x8] sm:$0xff]   ;;  %v3337_v26 = vld [vmem:[#allocation2 + $0x10] sm:$0xff]   ;;  %p3465_p2 = scmp.lt.s32.totalorder %s4185_s7, %s3463_s27  ;;  %p3466_p5 = scmp.lt.s32.totalorder %s3464_s5, %s3458_s22 }
  0x54   : > { %3074 = vmatmul.mubr.msk.bf16.vlgmr.msra.gmra.mxu1 %vm362_vm0, %v3317_v3  ;;  %3058 = vmatmul.mubr.msk.bf16.vlgmr.msra.gmra.mxu0 %vm362_vm0, %v3320_v6  ;;  %v3335_v22 = vld [vmem:[#allocation2 + $0x38] sm:$0xff]   ;;  %v3344_v29 = vld [vmem:[#allocation2 + $0x20] sm:$0xff]   ;;  %v3356_v30 = vld [vmem:[#allocation5 + $0x30] sm:$0xff]   ;;  %p3461_p8 = pneg %p3460_p9 }
  0x55   : > { %3090 = vmatpush3.bf16.msra.mxu1 %v3318_v4  ;;  %3077 = vmatprep.mubr.msk.bf16.mxu1 %vm362_vm0, %v3321_v7  ;;  %v3340_v27 = vld [vmem:[#allocation2 + $0x18] sm:$0xff]   ;;  %v3342_v31 = vld [vmem:[#allocation2 + $0x20] sm:$0xff]   ;;  %v3345_v32 = vld [vmem:[#allocation2 + $0x28] sm:$0xff]   ;;  %p3467_p7 = por %p3466_p5, %p3465_p2 }
  0x56   : > { %3061 = vmatprep.mubr.msk.bf16.mxu0 %vm362_vm0, %v3324_v9  ;;  %3126 = vmatpush3.bf16.msra.mxu0 %v3323_v8  ;;  %v3341_v28 = vld [vmem:[#allocation2 + $0x18] sm:$0xff]   ;;  %v3346_v33 = vld [vmem:[#allocation2 + $0x28] sm:$0xff]   ;;  %v3348_v34 = vld [vmem:[#allocation2 + $0x30] sm:$0xff]  }
  0x57   : > { %3091 = vmatprep.subr.bf16.mxu1 %v3328_v13  ;;  %3127 = vmatprep.subr.bf16.mxu0 %v3333_v15  ;;  %v3361_v35 = vld [vmem:[#allocation5 + $0x40] sm:$0xff]   ;;  %v3347_v36 = vld [vmem:[#allocation2 + $0x30] sm:$0xff]   ;;  %v3349_v37 = vld [vmem:[#allocation2 + $0x38] sm:$0xff]   ;;  %p3468_p4 = pnand %p3467_p7, %p3461_p8 }
  0x58   : > { %v3350_v38 = vld [vmem:[#allocation2 + $0x38] sm:$0xff]   ;;  %v3352_v39 = vld [vmem:[#allocation2 + $0x40] sm:$0xff]   ;;  %v3353_v41 = vld [vmem:[#allocation2 + $0x48] sm:$0xff]  }
  0x59   : > { %3092 = vmatpush3.bf16.msra.mxu1 %v3328_v13  ;;  %v3351_v40 = vld [vmem:[#allocation2 + $0x40] sm:$0xff]   ;;  %v3354_v42 = vld [vmem:[#allocation2 + $0x48] sm:$0xff]   ;;  %v3357_v43 = vld [vmem:[#allocation2 + $0x50] sm:$0xff]  }
  0x5a   : > { %3128 = vmatpush3.bf16.msra.mxu0 %v3333_v15  ;;  %3161 = vmatprep.subr.bf16.mxu1 %v3338_v20  ;;  %v3355_v44 = vld [vmem:[#allocation2 + $0x50] sm:$0xff]   ;;  %v3358_v45 = vld [vmem:[#allocation2 + $0x58] sm:$0xff]   ;;  %v3362_v47 = vld [vmem:[#allocation2 + $0x60] sm:$0xff]  }
  0x5b   : > { %3197 = vmatprep.subr.bf16.mxu0 %v3343_v23  ;;  %v3359_v46 = vld [vmem:[#allocation2 + $0x58] sm:$0xff]   ;;  %v3360_v48 = vld [vmem:[#allocation2 + $0x60] sm:$0xff]   ;;  %v3363_v49 = vld [vmem:[#allocation2 + $0x68] sm:$0xff]  }
  0x5c   : > { %3078 = vmatmul.mubr.msk.bf16.gmra.mxu1 %vm362_vm0, %v3322_v10  ;;  %3062 = vmatmul.mubr.msk.bf16.gmra.mxu0 %vm362_vm0, %v3325_v11  ;;  %v3364_v50 = vld [vmem:[#allocation2 + $0x68] sm:$0xff]   ;;  %v3366_v51 = vld [vmem:[#allocation2 + $0x70] sm:$0xff]   ;;  %v3367_v53 = vld [vmem:[#allocation2 + $0x78] sm:$0xff]  }
  0x5d   : > { %3081 = vmatprep.mubr.msk.bf16.mxu1 %vm362_vm0, %v3326_v12  ;;  %3065 = vmatprep.mubr.msk.bf16.mxu0 %vm362_vm0, %v3329_v14  ;;  %v3365_v52 = vld [vmem:[#allocation2 + $0x70] sm:$0xff]   ;;  %v3368_v54 = vld [vmem:[#allocation2 + $0x78] sm:$0xff]   ;;  %v3370_v55 = vld [vmem:[#allocation2 + $0x80] sm:$0xff]  }
  0x5e   : > { %v3369_v56 = vld [vmem:[#allocation2 + $0x80] sm:$0xff]   ;;  %v3371_v57 = vld [vmem:[#allocation2 + $0x88] sm:$0xff]   ;;  %v3372_v58 = vld [vmem:[#allocation2 + $0x18] sm:$0xff]  }
  0x5f   : > { %v3374_v59 = vld [vmem:[#allocation2 + $0x20] sm:$0xff]   ;;  %v3375_v61 = vld [vmem:[#allocation2 + $0x28] sm:$0xff]   ;;  %v3378_v63 = vld [vmem:[#allocation2 + $0x30] sm:$0xff]  }
  0x60   : > { %v3373_v60 = vld [vmem:[#allocation2 + $0x20] sm:$0xff]   ;;  %v3376_v62 = vld [vmem:[#allocation2 + $0x28] sm:$0xff]   ;;  %v3377_v0 = vld [vmem:[#allocation2 + $0x30] sm:$0xff]  }
  0x61   : > { %v3379_v1 = vld [vmem:[#allocation2 + $0x38] sm:$0xff]   ;;  %v3382_v3 = vld [vmem:[#allocation2 + $0x40] sm:$0xff]   ;;  %v3383_v5 = vld [vmem:[#allocation2 + $0x48] sm:$0xff]  }
  0x62   : > { %v3380_v2 = vld [vmem:[#allocation2 + $0x38] sm:$0xff]   ;;  %v3381_v4 = vld [vmem:[#allocation2 + $0x40] sm:$0xff]   ;;  %v3384_v6 = vld [vmem:[#allocation2 + $0x48] sm:$0xff]  }
  0x63   : > { %v3386_v7 = vld [vmem:[#allocation2 + $0x50] sm:$0xff]   ;;  %v3387_v9 = vld [vmem:[#allocation2 + $0x58] sm:$0xff]   ;;  %v3390_v11 = vld [vmem:[#allocation2 + $0x60] sm:$0xff]  }
  0x64   : > { %3082 = vmatmul.mubr.msk.bf16.gmra.mxu1 %vm362_vm0, %v3327_v16  ;;  %3066 = vmatmul.mubr.msk.bf16.gmra.mxu0 %vm362_vm0, %v3330_v17  ;;  %v3385_v8 = vld [vmem:[#allocation2 + $0x50] sm:$0xff]   ;;  %v3388_v10 = vld [vmem:[#allocation2 + $0x58] sm:$0xff]   ;;  %v3389_v12 = vld [vmem:[#allocation2 + $0x60] sm:$0xff]  }
  0x65   : > { %3085 = vmatprep.mubr.msk.bf16.mxu1 %vm362_vm0, %v3331_v18  ;;  %3069 = vmatprep.mubr.msk.bf16.mxu0 %vm362_vm0, %v3334_v19  ;;  %v3391_v13 = vld [vmem:[#allocation2 + $0x68] sm:$0xff]   ;;  %v3394_v15 = vld [vmem:[#allocation2 + $0x70] sm:$0xff]   ;;  %v3395_v17 = vld [vmem:[#allocation2 + $0x78] sm:$0xff]  }
  0x66   : > { %v3392_v14 = vld [vmem:[#allocation2 + $0x68] sm:$0xff]   ;;  %v3393_v16 = vld [vmem:[#allocation2 + $0x70] sm:$0xff]   ;;  %v3396_v18 = vld [vmem:[#allocation2 + $0x78] sm:$0xff]  }
  0x67   : > { %v3398_v19 = vld [vmem:[#allocation2 + $0x80] sm:$0xff]  }
  0x6c   : > { %3086 = vmatmul.mubr.msk.bf16.gmra.mxu1 %vm362_vm0, %v3332_v21  ;;  %3070 = vmatmul.mubr.msk.bf16.gmra.mxu0 %vm362_vm0, %v3335_v22  ;;  %v3399_v21 = vld [vmem:[#allocation2 + $0x88] sm:$0xff]  }
  0x6d   : > { %3093 = vmatprep.mubr.msk.bf16.mxu1 %vm362_vm0, %v3336_v24  ;;  %3129 = vmatprep.mubr.msk.bf16.mxu0 %vm362_vm0, %v3339_v25  ;;  %v3400_v22 = vld [vmem:[#allocation2 + $0x88] sm:$0xff]   ;;  %v3401_v24 = vld [vmem:[#allocation2 + $0x90] sm:$0xff]   ;;  %v3403_v25 = vld [vmem:[#allocation2 + $0x98] sm:$0xff]  }
  0x74   : > { %3094 = vmatmul.mubr.msk.bf16.vlgmr.msra.gmra.mxu1 %vm362_vm0, %v3337_v26  ;;  %3130 = vmatmul.mubr.msk.bf16.vlgmr.msra.gmra.mxu0 %vm362_vm0, %v3340_v27 }
  0x75   : > { %3162 = vmatpush3.bf16.msra.mxu1 %v3338_v20  ;;  %3097 = vmatprep.mubr.msk.bf16.mxu1 %vm362_vm0, %v3341_v28  ;;  %v3397_v20 = vld [vmem:[#allocation2 + $0x80] sm:$0xff]  }
  0x76   : > { %3198 = vmatpush3.bf16.msra.mxu0 %v3343_v23  ;;  %3133 = vmatprep.mubr.msk.bf16.mxu0 %vm362_vm0, %v3344_v29  ;;  %v3402_v23 = vld [vmem:[#allocation2 + $0x90] sm:$0xff]  }
  0x77   : > { %3163 = vmatprep.subr.bf16.mxu1 %v3356_v30  ;;  %3199 = vmatprep.subr.bf16.mxu0 %v3361_v35 }
  0x79   : > { %3164 = vmatpush3.bf16.msra.mxu1 %v3356_v30 }
  0x7a   : > { %3200 = vmatpush3.bf16.msra.mxu0 %v3361_v35 }
  0x7c   : > { %3098 = vmatmul.mubr.msk.bf16.gmra.mxu1 %vm362_vm0, %v3342_v31  ;;  %3134 = vmatmul.mubr.msk.bf16.gmra.mxu0 %vm362_vm0, %v3345_v32 }
  0x7d   : > { %3101 = vmatprep.mubr.msk.bf16.mxu1 %vm362_vm0, %v3346_v33  ;;  %3137 = vmatprep.mubr.msk.bf16.mxu0 %vm362_vm0, %v3348_v34 }
  0x84   : > { %3102 = vmatmul.mubr.msk.bf16.gmra.mxu1 %vm362_vm0, %v3347_v36  ;;  %3138 = vmatmul.mubr.msk.bf16.gmra.mxu0 %vm362_vm0, %v3349_v37 }
  0x85   : > { %3105 = vmatprep.mubr.msk.bf16.mxu1 %vm362_vm0, %v3350_v38  ;;  %3141 = vmatprep.mubr.msk.bf16.mxu0 %vm362_vm0, %v3352_v39 }
  0x8c   : > { %3106 = vmatmul.mubr.msk.bf16.gmra.mxu1 %vm362_vm0, %v3351_v40  ;;  %3142 = vmatmul.mubr.msk.bf16.gmra.mxu0 %vm362_vm0, %v3353_v41 }
  0x8d   : > { %3109 = vmatprep.mubr.msk.bf16.mxu1 %vm362_vm0, %v3354_v42  ;;  %3145 = vmatprep.mubr.msk.bf16.mxu0 %vm362_vm0, %v3357_v43 }
  0x94   : > { %3110 = vmatmul.mubr.msk.bf16.gmra.mxu1 %vm362_vm0, %v3355_v44  ;;  %3146 = vmatmul.mubr.msk.bf16.gmra.mxu0 %vm362_vm0, %v3358_v45 }
  0x95   : > { %3113 = vmatprep.mubr.msk.bf16.mxu1 %vm362_vm0, %v3359_v46  ;;  %3149 = vmatprep.mubr.msk.bf16.mxu0 %vm362_vm0, %v3362_v47 }
  0x9c   : > { %3114 = vmatmul.mubr.msk.bf16.gmra.mxu1 %vm362_vm0, %v3360_v48  ;;  %3150 = vmatmul.mubr.msk.bf16.gmra.mxu0 %vm362_vm0, %v3363_v49 }
  0x9d   : > { %3117 = vmatprep.mubr.msk.bf16.mxu1 %vm362_vm0, %v3364_v50  ;;  %3153 = vmatprep.mubr.msk.bf16.mxu0 %vm362_vm0, %v3366_v51 }
  0xa4   : > { %3118 = vmatmul.mubr.msk.bf16.gmra.mxu1 %vm362_vm0, %v3365_v52  ;;  %3154 = vmatmul.mubr.msk.bf16.gmra.mxu0 %vm362_vm0, %v3367_v53 }
  0xa5   : > { %3121 = vmatprep.mubr.msk.bf16.mxu1 %vm362_vm0, %v3368_v54  ;;  %3157 = vmatprep.mubr.msk.bf16.mxu0 %vm362_vm0, %v3370_v55 }
  0xac   : > { %3122 = vmatmul.mubr.msk.bf16.gmra.mxu1 %vm362_vm0, %v3369_v56  ;;  %3158 = vmatmul.mubr.msk.bf16.gmra.mxu0 %vm362_vm0, %v3371_v57 }
  0xad   : > { %3165 = vmatprep.mubr.msk.bf16.mxu1 %vm362_vm0, %v3372_v58  ;;  %3201 = vmatprep.mubr.msk.bf16.mxu0 %vm362_vm0, %v3374_v59 }
  0xb4   : > { %3166 = vmatmul.mubr.msk.bf16.vlgmr.msra.gmra.mxu1 %vm362_vm0, %v3373_v60  ;;  %3202 = vmatmul.mubr.msk.bf16.vlgmr.msra.gmra.mxu0 %vm362_vm0, %v3375_v61 }
  0xb5   : > { %3169 = vmatprep.mubr.msk.bf16.mxu1 %vm362_vm0, %v3376_v62  ;;  %3205 = vmatprep.mubr.msk.bf16.mxu0 %vm362_vm0, %v3378_v63 }
  0xbc   : > { %3170 = vmatmul.mubr.msk.bf16.gmra.mxu1 %vm362_vm0, %v3377_v0  ;;  %3206 = vmatmul.mubr.msk.bf16.gmra.mxu0 %vm362_vm0, %v3379_v1 }
  0xbd   : > { %3173 = vmatprep.mubr.msk.bf16.mxu1 %vm362_vm0, %v3380_v2  ;;  %3209 = vmatprep.mubr.msk.bf16.mxu0 %vm362_vm0, %v3382_v3 }
  0xc4   : > { %3174 = vmatmul.mubr.msk.bf16.gmra.mxu1 %vm362_vm0, %v3381_v4  ;;  %3210 = vmatmul.mubr.msk.bf16.gmra.mxu0 %vm362_vm0, %v3383_v5 }
  0xc5   : > { %3177 = vmatprep.mubr.msk.bf16.mxu1 %vm362_vm0, %v3384_v6  ;;  %3213 = vmatprep.mubr.msk.bf16.mxu0 %vm362_vm0, %v3386_v7 }
  0xcc   : > { %3178 = vmatmul.mubr.msk.bf16.gmra.mxu1 %vm362_vm0, %v3385_v8  ;;  %3214 = vmatmul.mubr.msk.bf16.gmra.mxu0 %vm362_vm0, %v3387_v9 }
  0xcd   : > { %3181 = vmatprep.mubr.msk.bf16.mxu1 %vm362_vm0, %v3388_v10  ;;  %3217 = vmatprep.mubr.msk.bf16.mxu0 %vm362_vm0, %v3390_v11 }
  0xd4   : > { %3182 = vmatmul.mubr.msk.bf16.gmra.mxu1 %vm362_vm0, %v3389_v12  ;;  %3218 = vmatmul.mubr.msk.bf16.gmra.mxu0 %vm362_vm0, %v3391_v13 }
  0xd5   : > { %3185 = vmatprep.mubr.msk.bf16.mxu1 %vm362_vm0, %v3392_v14  ;;  %3221 = vmatprep.mubr.msk.bf16.mxu0 %vm362_vm0, %v3394_v15 }
  0xdc   : > { %3186 = vmatmul.mubr.msk.bf16.gmra.mxu1 %vm362_vm0, %v3393_v16  ;;  %3222 = vmatmul.mubr.msk.bf16.gmra.mxu0 %vm362_vm0, %v3395_v17 }
  0xdd   : > { %3189 = vmatprep.mubr.msk.bf16.mxu1 %vm362_vm0, %v3396_v18  ;;  %3225 = vmatprep.mubr.msk.bf16.mxu0 %vm362_vm0, %v3398_v19 }
  0xe4   : > { %3190 = vmatmul.mubr.msk.bf16.gmra.mxu1 %vm362_vm0, %v3397_v20  ;;  %3226 = vmatmul.mubr.msk.bf16.gmra.mxu0 %vm362_vm0, %v3399_v21 }
  0xe5   : > { %3193 = vmatprep.mubr.msk.bf16.mxu1 %vm362_vm0, %v3400_v22  ;;  %3229 = vmatprep.mubr.msk.bf16.mxu0 %vm362_vm0, %v3402_v23 }
  0xec   : > { %3194 = vmatmul.mubr.msk.bf16.gmra.mxu1 %vm362_vm0, %v3401_v24  ;;  %3230 = vmatmul.mubr.msk.bf16.gmra.mxu0 %vm362_vm0, %v3403_v25 }
 0x114   : > { %v3790_v26 = vpop.f32.mrf.mxu1  ;;  %v3792_v27 = vpop.f32.mrf.mxu0 }
 0x116   : > { %v3794_v28 = vpop.f32.mrf.mxu1  ;;  %v3796_v29 = vpop.f32.mrf.mxu0 }
 0x118   : > { %v3798_v30 = vpop.f32.mrf.mxu1  ;;  %v3800_v31 = vpop.f32.mrf.mxu0 }
 0x11a   : > { %v3802_v32 = vpop.f32.mrf.mxu1  ;;  %v3804_v33 = vpop.f32.mrf.mxu0 }
 0x11b   : > { %4259 = vst [vmem:[#allocation11_spill] sm:$0xff] %v3802_v32 }
 0x11c   : > { %v3806_v34 = vpop.f32.mrf.mxu1  ;;  %v3808_v35 = vpop.f32.mrf.mxu0 }
 0x11d   : > { %4260 = vst [vmem:[#allocation12_spill] sm:$0xff] %v3806_v34 }
 0x11e   : > { %v3810_v36 = vpop.f32.mrf.mxu1  ;;  %v3812_v37 = vpop.f32.mrf.mxu0 }
 0x11f   : > { %4261 = vst [vmem:[#allocation13_spill] sm:$0xff] %v3810_v36 }
 0x120   : > { %v3814_v38 = vpop.f32.mrf.mxu1  ;;  %v3816_v39 = vpop.f32.mrf.mxu0 }
 0x121   : > { %4262 = vst [vmem:[#allocation14_spill] sm:$0xff] %v3814_v38 }
 0x122   : > { %v3818_v40 = vpop.f32.mrf.mxu1  ;;  %v3820_v41 = vpop.f32.mrf.mxu0 }
 0x123   : > { %4263 = vst [vmem:[#allocation15_spill] sm:$0xff] %v3818_v40 }
 0x124   : > { %v3822_v42 = vpop.f32.mrf.mxu1  ;;  %v3824_v43 = vpop.f32.mrf.mxu0 }
 0x125   : > { %4264 = vst [vmem:[#allocation16_spill] sm:$0xff] %v3822_v42 }
 0x126   : > { %v3826_v44 = vpop.f32.mrf.mxu1  ;;  %v3828_v45 = vpop.f32.mrf.mxu0 }
 0x127   : > { %4265 = vst [vmem:[#allocation17_spill] sm:$0xff] %v3826_v44 }
 0x128   : > { %v3830_v46 = vpop.f32.mrf.mxu1  ;;  %v3832_v47 = vpop.f32.mrf.mxu0 }
 0x129   : > { %4266 = vst [vmem:[#allocation18_spill] sm:$0xff] %v3830_v46 }
 0x12a   : > { %v3834_v48 = vpop.f32.mrf.mxu1  ;;  %v3836_v49 = vpop.f32.mrf.mxu0 }
 0x12b   : > { %4267 = vst [vmem:[#allocation19_spill] sm:$0xff] %v3834_v48 }
 0x12c   : > { %v3838_v50 = vpop.f32.mrf.mxu1  ;;  %v3840_v51 = vpop.f32.mrf.mxu0 }
 0x12d   : > { %4268 = vst [vmem:[#allocation20_spill] sm:$0xff] %v3838_v50 }
 0x12e   : > { %v3842_v52 = vpop.f32.mrf.mxu1  ;;  %v3844_v53 = vpop.f32.mrf.mxu0 }
 0x12f   : > { %4269 = vst [vmem:[#allocation21_spill] sm:$0xff] %v3842_v52 }
 0x130   : > { %v3846_v54 = vpop.f32.mrf.mxu1  ;;  %v3848_v55 = vpop.f32.mrf.mxu0 }
 0x131   : > { %4270 = vst [vmem:[#allocation22_spill] sm:$0xff] %v3846_v54 }
 0x132   : > { %v3850_v56 = vpop.f32.mrf.mxu1  ;;  %v3852_v57 = vpop.f32.mrf.mxu0 }
 0x133   : > { %4271 = vst [vmem:[#allocation23_spill] sm:$0xff] %v3850_v56 }
 0x134   : > { %v3095_v58 = vpop.f32.mrf.mxu1  ;;  %v3854_v59 = vpop.f32.mrf.mxu0 }
 0x136   : > { %v819_v60 = vpop.f32.mrf.mxu1  ;;  %v3856_v61 = vpop.f32.mrf.mxu0 }
 0x138   : > { %v3096_v62 = vpop.f32.mrf.mxu1  ;;  %v3858_v63 = vpop.f32.mrf.mxu0 }
 0x13a   : > { %v3860_v0 = vpop.f32.mrf.mxu1  ;;  %v3862_v1 = vpop.f32.mrf.mxu0 }
 0x13c   : > { %v3864_v2 = vpop.f32.mrf.mxu1  ;;  %v3866_v3 = vpop.f32.mrf.mxu0 }
 0x13e   : > { %v3868_v4 = vpop.f32.mrf.mxu1  ;;  %v3870_v5 = vpop.f32.mrf.mxu0 }
 0x140   : > { %v3872_v6 = vpop.f32.mrf.mxu1  ;;  %v3874_v7 = vpop.f32.mrf.mxu0 }
 0x142   : > { %v3876_v8 = vpop.f32.mrf.mxu1  ;;  %v3878_v9 = vpop.f32.mrf.mxu0 }
 0x144   : > { %v3880_v10 = vpop.f32.mrf.mxu1  ;;  %v3882_v11 = vpop.f32.mrf.mxu0 }
 0x146   : > { %v3884_v12 = vpop.f32.mrf.mxu1  ;;  %v3886_v13 = vpop.f32.mrf.mxu0 }
 0x148   : > { %v3888_v14 = vpop.f32.mrf.mxu1  ;;  %v3890_v15 = vpop.f32.mrf.mxu0 }
 0x14a   : > { %v3892_v16 = vpop.f32.mrf.mxu1  ;;  %v3894_v17 = vpop.f32.mrf.mxu0 }
 0x14c   : > { %v3896_v18 = vpop.f32.mrf.mxu1  ;;  %v3898_v19 = vpop.f32.mrf.mxu0 }
 0x14e   : > { %v3900_v20 = vpop.f32.mrf.mxu1  ;;  %v3902_v21 = vpop.f32.mrf.mxu0 }
 0x150   : > { %v3904_v22 = vpop.f32.mrf.mxu1  ;;  %v3906_v23 = vpop.f32.mrf.mxu0 }
 0x152   : > { %v3908_v24 = vpop.f32.mrf.mxu1  ;;  %v3910_v25 = vpop.f32.mrf.mxu0 }
 0x154   : > { %v3912_v56 = vpop.f32.mrf.mxu1  ;;  %v3914_v54 = vpop.f32.mrf.mxu0 }
 0x155   : > { %4272 = vst [vmem:[#allocation24_spill] sm:$0xff] %v3914_v54 }
 0x156   : > { %v3916_v52 = vpop.f32.mrf.mxu1  ;;  %v3918_v50 = vpop.f32.mrf.mxu0 }
 0x157   : > { %4273 = vst [vmem:[#allocation25_spill] sm:$0xff] %v3918_v50 }
 0x158   : > { %v3920_v48 = vpop.f32.mrf.mxu1  ;;  %v3922_v46 = vpop.f32.mrf.mxu0 }
 0x159   : > { %4274 = vst [vmem:[#allocation26_spill] sm:$0xff] %v3920_v48  ;;  %4275 = vst [vmem:[#allocation27_spill] sm:$0xff] %v3922_v46 }
 0x15a   : > { %v3924_v44 = vpop.f32.mrf.mxu1  ;;  %v3926_v42 = vpop.f32.mrf.mxu0 }
 0x15b   : > { %4276 = vst [vmem:[#allocation28_spill] sm:$0xff] %v3924_v44  ;;  %4277 = vst [vmem:[#allocation29_spill] sm:$0xff] %v3926_v42 }
 0x15c   : > { %v3928_v40 = vpop.f32.mrf.mxu1  ;;  %v3930_v38 = vpop.f32.mrf.mxu0 }
 0x15d   : > { %4278 = vst [vmem:[#allocation30_spill] sm:$0xff] %v3928_v40  ;;  %4279 = vst [vmem:[#allocation31_spill] sm:$0xff] %v3930_v38 }
 0x15e   : > { %v3932_v36 = vpop.f32.mrf.mxu1  ;;  %v3934_v34 = vpop.f32.mrf.mxu0 }
 0x15f   : > { %4280 = vst [vmem:[#allocation32_spill] sm:$0xff] %v3932_v36  ;;  %4281 = vst [vmem:[#allocation33_spill] sm:$0xff] %v3934_v34 }
 0x160   : > { %v3936_v32 = vpop.f32.mrf.mxu1  ;;  %v3938_v54 = vpop.f32.mrf.mxu0 }
 0x161   : > { %4282 = vst [vmem:[#allocation34_spill] sm:$0xff] %v3936_v32  ;;  %4283 = vst [vmem:[#allocation35_spill] sm:$0xff] %v3938_v54 }
 0x162   : > { %v3940_v50 = vpop.f32.mrf.mxu1  ;;  %v3942_v48 = vpop.f32.mrf.mxu0 }
 0x163   : > { %4284 = vst [vmem:[#allocation36_spill] sm:$0xff] %v3940_v50  ;;  %4285 = vst [vmem:[#allocation37_spill] sm:$0xff] %v3942_v48 }
 0x164   : > { %v3944_v46 = vpop.f32.mrf.mxu1  ;;  %v3946_v44 = vpop.f32.mrf.mxu0 }
 0x165   : > { %4286 = vst [vmem:[#allocation38_spill] sm:$0xff] %v3944_v46  ;;  %4287 = vst [vmem:[#allocation39_spill] sm:$0xff] %v3946_v44 }
 0x166   : > { %v3948_v42 = vpop.f32.mrf.mxu1  ;;  %v3950_v40 = vpop.f32.mrf.mxu0 }
 0x167   : > { %4288 = vst [vmem:[#allocation40_spill] sm:$0xff] %v3948_v42  ;;  %4289 = vst [vmem:[#allocation41_spill] sm:$0xff] %v3950_v40  ;;  %v980_v42 = vadd.f32 %v3095_v58, %v3792_v27  ;;  %v979_v27 = vadd.f32 %v3860_v0, %v3804_v33  ;;  %v982_v33 = vadd.f32 %v3868_v4, %v3812_v37 }
 0x168   : > { %v3952_v38 = vpop.f32.mrf.mxu1  ;;  %v3954_v36 = vpop.f32.mrf.mxu0 }
 0x169   : > { %4290 = vst [vmem:[#allocation42_spill] sm:$0xff] %v3952_v38  ;;  %4291 = vst [vmem:[#allocation43_spill] sm:$0xff] %v3954_v36  ;;  %v978_v36 = vadd.f32 %v819_v60, %v3796_v29  ;;  %v984_v29 = vadd.f32 %v3864_v2, %v3808_v35 }
 0x16a   : > { %v3956_v34 = vpop.f32.mrf.mxu1  ;;  %v3958_v32 = vpop.f32.mrf.mxu0 }
 0x16b   : > { %4292 = vst [vmem:[#allocation44_spill] sm:$0xff] %v3956_v34  ;;  %4293 = vst [vmem:[#allocation45_spill] sm:$0xff] %v3958_v32  ;;  %v1416_v58 = vadd.f32 %v3856_v61, %v978_v36  ;;  %v1422_v37 = vadd.f32 %v3866_v3, %v984_v29  ;;  %v988_v29 = vadd.f32 %v3880_v10, %v3824_v43 }
 0x16c   : > { %v3960_v54 = vpop.f32.mrf.mxu1  ;;  %v3962_v50 = vpop.f32.mrf.mxu0 }
 0x16d   : > { %4294 = vst [vmem:[#allocation46_spill] sm:$0xff] %v3960_v54  ;;  %4295 = vst [vmem:[#allocation47_spill] sm:$0xff] %v3962_v50  ;;  %v981_v54 = vadd.f32 %v3096_v62, %v3800_v31  ;;  %v1418_v50 = vadd.f32 %v3854_v59, %v980_v42  ;;  %v3989_v31 = vld [vmem:[%s4238_s2] ss:$0 sm:$0xff] }
 0x16e   : > { %v3964_v48 = vpop.f32.mrf.mxu1  ;;  %v3966_v44 = vpop.f32.mrf.mxu0 }
 0x16f   : > { %4296 = vst [vmem:[#allocation48_spill] sm:$0xff] %v3964_v48  ;;  %4297 = vst [vmem:[#allocation49_spill] sm:$0xff] %v3966_v44  ;;  %v1419_v59 = vadd.f32 %v3858_v63, %v981_v54 }
 0x170   : > { %v3969_v40 = vpop.f32.mrf.mxu1  ;;  %v3971_v38 = vpop.f32.mrf.mxu0 }
 0x172   : > { %v3974_v34 = vpop.f32.mrf.mxu1  ;;  %v3976_v32 = vpop.f32.mrf.mxu0 }
 0x173   : > { %4298 = vst [vmem:[#allocation50_spill] sm:$0xff] %v3976_v32 }
 0x174   : > { %v3167_v46 = vpop.f32.mrf.mxu1  ;;  %v3203_v48 = vpop.f32.mrf.mxu0 }
 0x175   : > { %v1856_v44 = vadd.f32 %v3167_v46, %v1418_v50  ;;  %v3997_v46 = vld [vmem:[%s4239_s3] ss:$0 sm:$0xff]  ;;  %v1417_v50 = vadd.f32 %v3862_v1, %v979_v27  ;;  %v983_v1 = vadd.f32 %v3876_v8, %v3820_v41  ;;  %v1420_v27 = vadd.f32 %v3870_v5, %v982_v33 }
 0x176   : > { %v1695_v60 = vpop.f32.mrf.mxu1  ;;  %v2133_v42 = vpop.f32.mrf.mxu0 }
 0x177   : > { %v1854_v62 = vadd.f32 %v1695_v60, %v1416_v58  ;;  %v2294_v32 = vadd.f32 %v3203_v48, %v1856_v44  ;;  %v985_v44 = vadd.f32 %v3872_v6, %v3816_v39  ;;  %v1421_v43 = vadd.f32 %v3878_v9, %v983_v1 }
 0x178   : > { %v3168_v36 = vpop.f32.mrf.mxu1  ;;  %v3204_v35 = vpop.f32.mrf.mxu0 }
 0x179   : > { %v1857_v61 = vadd.f32 %v3168_v36, %v1419_v59  ;;  %v2397_v0 = vmul.f32 %v3989_v31, %v2294_v32  ;;  %v2292_v54 = vadd.f32 %v2133_v42, %v1854_v62  ;;  %v1423_v62 = vadd.f32 %v3874_v7, %v985_v44 }
 0x17a   : > { %v1698_v48 = vpop.f32.mrf.mxu1  ;;  %v2136_v63 = vpop.f32.mrf.mxu0 }
 0x17b   : > { %v2436_v2 = vadd.f32 %v3997_v46, %v2397_v0  ;;  %v1855_v4 = vadd.f32 %v1698_v48, %v1417_v50  ;;  %v2395_v58 = vmul.f32 %v3989_v31, %v2292_v54  ;;  %v2295_v60 = vadd.f32 %v3204_v35, %v1857_v61 }
 0x17c   : > { %v3171_v32 = vpop.f32.mrf.mxu1  ;;  %v3207_v42 = vpop.f32.mrf.mxu0  ;;  %v986_v61 = vadd.f32 %v3884_v12, %v3828_v45 }
 0x17d   : > { %v2468_v59 = vmax.f32 %v2436_v2, 0.0  ;;  %v2434_v39 = vadd.f32 %v3997_v46, %v2395_v58  ;;  %v1860_v6 = vadd.f32 %v3171_v32, %v1422_v37  ;;  %v2398_v3 = vmul.f32 %v3989_v31, %v2295_v60 }
 0x17e   : > { %v1711_v36 = vpop.f32.mrf.mxu1  ;;  %v2293_v35 = vadd.f32 %v2136_v63, %v1855_v4  ;;  %v2149_v50 = vpop.f32.mrf.mxu0  ;;  %v989_v63 = vadd.f32 %v3888_v14, %v3832_v47  ;;  %v1426_v2 = vadd.f32 %v3882_v11, %v988_v29  ;;  %v1424_v47 = vadd.f32 %v3886_v13, %v986_v61 }
 0x17f   : > { %2500 = vst [vmem:[%s4016_s14 + $0x10] sm:$0xff] %v2468_v59  ;;  %v2466_v41 = vmax.f32 %v2434_v39, 0.0  ;;  %v2437_v5 = vadd.f32 %v3997_v46, %v2398_v3  ;;  %v1858_v8 = vadd.f32 %v1711_v36, %v1420_v27  ;;  %v2298_v33 = vadd.f32 %v3207_v42, %v1860_v6 }
 0x180   : > { %v2396_v7 = vmul.f32 %v3989_v31, %v2293_v35  ;;  %v3172_v10 = vpop.f32.mrf.mxu1  ;;  %v3208_v0 = vpop.f32.mrf.mxu0  ;;  %v987_v27 = vadd.f32 %v3892_v16, %v3836_v49  ;;  %v992_v3 = vadd.f32 %v3896_v18, %v3840_v51  ;;  %v1427_v29 = vadd.f32 %v3890_v15, %v989_v63 }
 0x181   : > { %2498 = vst [vmem:[%s4016_s14] sm:$0xff] %v2466_v41  ;;  %v2469_v54 = vmax.f32 %v2437_v5, 0.0  ;;  %v1861_v44 = vadd.f32 %v3172_v10, %v1423_v62  ;;  %v2401_v37 = vmul.f32 %v3989_v31, %v2298_v33  ;;  %v2296_v48 = vadd.f32 %v2149_v50, %v1858_v8 }
 0x182   : > { %v2435_v4 = vadd.f32 %v3997_v46, %v2396_v7  ;;  %v1714_v45 = vpop.f32.mrf.mxu1  ;;  %v2152_v12 = vpop.f32.mrf.mxu0  ;;  %v990_v41 = vadd.f32 %v3900_v20, %v3844_v53  ;;  %v1425_v5 = vadd.f32 %v3894_v17, %v987_v27  ;;  %v993_v7 = vadd.f32 %v3904_v22, %v3848_v55 }
 0x183   : > { %2501 = vst [vmem:[%s4016_s14 + $0x18] sm:$0xff] %v2469_v54  ;;  %v2440_v9 = vadd.f32 %v3997_v46, %v2401_v37  ;;  %v1859_v58 = vadd.f32 %v1714_v45, %v1421_v43  ;;  %v2399_v60 = vmul.f32 %v3989_v31, %v2296_v48  ;;  %v2299_v1 = vadd.f32 %v3208_v0, %v1861_v44 }
 0x184   : > { %v2467_v14 = vmax.f32 %v2435_v4, 0.0  ;;  %v3175_v11 = vpop.f32.mrf.mxu1  ;;  %v3211_v32 = vpop.f32.mrf.mxu0  ;;  %v1430_v10 = vadd.f32 %v3898_v19, %v992_v3  ;;  %v991_v48 = vadd.f32 %v3908_v24, %v3852_v57  ;;  %v1428_v55 = vadd.f32 %v3902_v21, %v990_v41 }
 0x185   : > { %v2472_v42 = vmax.f32 %v2440_v9, 0.0  ;;  %v2438_v59 = vadd.f32 %v3997_v46, %v2399_v60  ;;  %v1864_v39 = vadd.f32 %v3175_v11, %v1426_v2  ;;  %v2402_v6 = vmul.f32 %v3989_v31, %v2299_v1 }
 0x186   : > { %2499 = vst [vmem:[%s4016_s14 + $0x8] sm:$0xff] %v2467_v14  ;;  %v1727_v62 = vpop.f32.mrf.mxu1  ;;  %v2297_v49 = vadd.f32 %v2152_v12, %v1859_v58  ;;  %v2165_v16 = vpop.f32.mrf.mxu0  ;;  %v996_v9 = vadd.f32 %v3912_v56, %v3790_v26  ;;  %v1431_v58 = vadd.f32 %v3906_v23, %v993_v7  ;;  %v994_v14 = vadd.f32 %v3916_v52, %v3794_v28  ;;  %v4304_v7 = vld [vmem:[#allocation12_spill] sm:$0xff] }
 0x187   : > { %2504 = vst [vmem:[%s4016_s14 + $0x30] sm:$0xff] %v2472_v42  ;;  %v2470_v13 = vmax.f32 %v2438_v59, 0.0  ;;  %v2441_v36 = vadd.f32 %v3997_v46, %v2402_v6  ;;  %v1862_v35 = vadd.f32 %v1727_v62, %v1424_v47  ;;  %v2302_v50 = vadd.f32 %v3211_v32, %v1864_v39  ;;  %v4299_v6 = vld [vmem:[#allocation26_spill] sm:$0xff] }
 0x188   : > { %v2400_v51 = vmul.f32 %v3989_v31, %v2297_v49  ;;  %v3176_v18 = vpop.f32.mrf.mxu1  ;;  %v3212_v15 = vpop.f32.mrf.mxu0  ;;  %v1429_v11 = vadd.f32 %v3910_v25, %v991_v48  ;;  %v997_v3 = vadd.f32 %v4299_v6, %v3798_v30  ;;  %v4313_v6 = vld [vmem:[#allocation15_spill] sm:$0xff] }
 0x189   : > { %2502 = vst [vmem:[%s4016_s14 + $0x20] sm:$0xff] %v2470_v13  ;;  %v2473_v8 = vmax.f32 %v2441_v36, 0.0  ;;  %v1865_v33 = vadd.f32 %v3176_v18, %v1427_v29  ;;  %v2405_v61 = vmul.f32 %v3989_v31, %v2302_v50  ;;  %v2300_v43 = vadd.f32 %v2165_v16, %v1862_v35  ;;  %v4300_v29 = vld [vmem:[#allocation24_spill] sm:$0xff]  ;;  %v4301_v35 = vld [vmem:[#allocation11_spill] sm:$0xff] }
 0x18a   : > { %v2439_v0 = vadd.f32 %v3997_v46, %v2400_v51  ;;  %v1730_v53 = vpop.f32.mrf.mxu1  ;;  %v2168_v20 = vpop.f32.mrf.mxu0  ;;  %v1434_v62 = vadd.f32 %v4300_v29, %v996_v9  ;;  %v4302_v50 = vld [vmem:[#allocation28_spill] sm:$0xff] }
 0x18b   : > { %2505 = vst [vmem:[%s4016_s14 + $0x38] sm:$0xff] %v2473_v8  ;;  %v2444_v17 = vadd.f32 %v3997_v46, %v2405_v61  ;;  %v1863_v54 = vadd.f32 %v1730_v53, %v1425_v5  ;;  %v2403_v44 = vmul.f32 %v3989_v31, %v2300_v43  ;;  %v2303_v37 = vadd.f32 %v3212_v15, %v1865_v33  ;;  %v4303_v5 = vld [vmem:[#allocation25_spill] sm:$0xff]  ;;  %v4306_v53 = vld [vmem:[#allocation27_spill] sm:$0xff] }
 0x18c   : > { %v2471_v22 = vmax.f32 %v2439_v0, 0.0  ;;  %v3179_v19 = vpop.f32.mrf.mxu1  ;;  %v3215_v63 = vpop.f32.mrf.mxu0  ;;  %v995_v41 = vadd.f32 %v4302_v50, %v4301_v35  ;;  %v1432_v30 = vadd.f32 %v4303_v5, %v994_v14  ;;  %v4312_v14 = vld [vmem:[#allocation31_spill] sm:$0xff]  ;;  %v4316_v50 = vld [vmem:[#allocation16_spill] sm:$0xff] }
 0x18d   : > { %v2476_v2 = vmax.f32 %v2444_v17, 0.0  ;;  %v2442_v4 = vadd.f32 %v3997_v46, %v2403_v44  ;;  %v1868_v45 = vadd.f32 %v3179_v19, %v1430_v10  ;;  %v2406_v12 = vmul.f32 %v3989_v31, %v2303_v37  ;;  %v4305_v10 = vld [vmem:[#allocation30_spill] sm:$0xff]  ;;  %v4307_v19 = vld [vmem:[#allocation13_spill] sm:$0xff] }
 0x18e   : > { %2503 = vst [vmem:[%s4016_s14 + $0x28] sm:$0xff] %v2471_v22  ;;  %v1743_v60 = vpop.f32.mrf.mxu1  ;;  %v2301_v57 = vadd.f32 %v2168_v20, %v1863_v54  ;;  %v2181_v24 = vpop.f32.mrf.mxu0  ;;  %v1000_v0 = vadd.f32 %v4305_v10, %v4304_v7  ;;  %v1435_v20 = vadd.f32 %v4306_v53, %v997_v3  ;;  %v4314_v3 = vld [vmem:[#allocation36_spill] sm:$0xff]  ;;  %v4319_v10 = vld [vmem:[#allocation17_spill] sm:$0xff] }
 0x18f   : > { %2508 = vst [vmem:[%s4016_s14 + $0x50] sm:$0xff] %v2476_v2  ;;  %v2474_v21 = vmax.f32 %v2442_v4, 0.0  ;;  %v2445_v1 = vadd.f32 %v3997_v46, %v2406_v12  ;;  %v1866_v27 = vadd.f32 %v1743_v60, %v1428_v55  ;;  %v2306_v47 = vadd.f32 %v3215_v63, %v1868_v45  ;;  %v4308_v63 = vld [vmem:[#allocation32_spill] sm:$0xff]  ;;  %v4309_v4 = vld [vmem:[#allocation29_spill] sm:$0xff] }
 0x190   : > { %v2404_v26 = vmul.f32 %v3989_v31, %v2301_v57  ;;  %v3180_v56 = vpop.f32.mrf.mxu1  ;;  %v3216_v23 = vpop.f32.mrf.mxu0  ;;  %v998_v2 = vadd.f32 %v4308_v63, %v4307_v19  ;;  %v1433_v45 = vadd.f32 %v4309_v4, %v995_v41  ;;  %v999_v29 = vadd.f32 %v4314_v3, %v4313_v6  ;;  %v4317_v41 = vld [vmem:[#allocation38_spill] sm:$0xff]  ;;  %v4328_v3 = vld [vmem:[#allocation20_spill] sm:$0xff] }
 0x191   : > { %2506 = vst [vmem:[%s4016_s14 + $0x40] sm:$0xff] %v2474_v21  ;;  %v2477_v32 = vmax.f32 %v2445_v1, 0.0  ;;  %v1869_v42 = vadd.f32 %v3180_v56, %v1431_v58  ;;  %v2409_v59 = vmul.f32 %v3989_v31, %v2306_v47  ;;  %v2304_v39 = vadd.f32 %v2181_v24, %v1866_v27  ;;  %v4310_v1 = vld [vmem:[#allocation14_spill] sm:$0xff] }
 0x192   : > { %v2443_v49 = vadd.f32 %v3997_v46, %v2404_v26  ;;  %v1746_v28 = vpop.f32.mrf.mxu1  ;;  %v2184_v52 = vpop.f32.mrf.mxu0  ;;  %v4311_v27 = vld [vmem:[#allocation34_spill] sm:$0xff]  ;;  %v1004_v5 = vadd.f32 %v4317_v41, %v4316_v50  ;;  %v4331_v41 = vld [vmem:[#allocation21_spill] sm:$0xff] }
 0x193   : > { %2509 = vst [vmem:[%s4016_s14 + $0x58] sm:$0xff] %v2477_v32  ;;  %v2448_v25 = vadd.f32 %v3997_v46, %v2409_v59  ;;  %v1867_v16 = vadd.f32 %v1746_v28, %v1429_v11  ;;  %v2407_v13 = vmul.f32 %v3989_v31, %v2304_v39  ;;  %v2307_v36 = vadd.f32 %v3216_v23, %v1869_v42  ;;  %v4322_v63 = vld [vmem:[#allocation18_spill] sm:$0xff] }
 0x194   : > { %v2475_v51 = vmax.f32 %v2443_v49, 0.0  ;;  %v3183_v18 = vpop.f32.mrf.mxu1  ;;  %v3219_v15 = vpop.f32.mrf.mxu0  ;;  %v1001_v47 = vadd.f32 %v4311_v27, %v4310_v1  ;;  %v1438_v11 = vadd.f32 %v4312_v14, %v1000_v0  ;;  %v4320_v0 = vld [vmem:[#allocation40_spill] sm:$0xff]  ;;  %v4325_v27 = vld [vmem:[#allocation19_spill] sm:$0xff] }
 0x195   : > { %v2480_v8 = vmax.f32 %v2448_v25, 0.0  ;;  %v2446_v33 = vadd.f32 %v3997_v46, %v2407_v13  ;;  %v1872_v61 = vadd.f32 %v3183_v18, %v1434_v62  ;;  %v2410_v43 = vmul.f32 %v3989_v31, %v2307_v36  ;;  %v4315_v62 = vld [vmem:[#allocation33_spill] sm:$0xff] }
 0x196   : > { %2507 = vst [vmem:[%s4016_s14 + $0x48] sm:$0xff] %v2475_v51  ;;  %v1759_v17 = vpop.f32.mrf.mxu1  ;;  %v2305_v54 = vadd.f32 %v2184_v52, %v1867_v16  ;;  %v2197_v44 = vpop.f32.mrf.mxu0  ;;  %v1436_v49 = vadd.f32 %v4315_v62, %v998_v2  ;;  %v1002_v53 = vadd.f32 %v4320_v0, %v4319_v10  ;;  %v4323_v2 = vld [vmem:[#allocation42_spill] sm:$0xff] }
 0x197   : > { %2512 = vst [vmem:[%s4016_s14 + $0x70] sm:$0xff] %v2480_v8  ;;  %v2478_v37 = vmax.f32 %v2446_v33, 0.0  ;;  %v2449_v48 = vadd.f32 %v3997_v46, %v2410_v43  ;;  %v1870_v55 = vadd.f32 %v1759_v17, %v1432_v30  ;;  %v2310_v22 = vadd.f32 %v3219_v15, %v1872_v61  ;;  %v4318_v30 = vld [vmem:[#allocation35_spill] sm:$0xff]  ;;  %v4334_v0 = vld [vmem:[#allocation22_spill] sm:$0xff] }
 0x198   : > { %v2408_v12 = vmul.f32 %v3989_v31, %v2305_v54  ;;  %v3184_v9 = vpop.f32.mrf.mxu1  ;;  %v3220_v58 = vpop.f32.mrf.mxu0  ;;  %v1439_v51 = vadd.f32 %v4318_v30, %v1001_v47  ;;  %v1005_v4 = vadd.f32 %v4323_v2, %v4322_v63  ;;  %v4326_v47 = vld [vmem:[#allocation44_spill] sm:$0xff]  ;;  %v4336_v63 = vld [vmem:[#allocation23_spill] sm:$0xff] }
 0x199   : > { %2510 = vst [vmem:[%s4016_s14 + $0x60] sm:$0xff] %v2478_v37  ;;  %v2481_v60 = vmax.f32 %v2449_v48, 0.0  ;;  %v1873_v57 = vadd.f32 %v3184_v9, %v1435_v20  ;;  %v2413_v24 = vmul.f32 %v3989_v31, %v2310_v22  ;;  %v2308_v21 = vadd.f32 %v2197_v44, %v1870_v55  ;;  %v4321_v20 = vld [vmem:[#allocation37_spill] sm:$0xff] }
 0x19a   : > { %v2447_v26 = vadd.f32 %v3997_v46, %v2408_v12  ;;  %v1762_v56 = vpop.f32.mrf.mxu1  ;;  %v2200_v23 = vpop.f32.mrf.mxu0  ;;  %v1437_v17 = vadd.f32 %v4321_v20, %v999_v29  ;;  %v1003_v14 = vadd.f32 %v4326_v47, %v4325_v27  ;;  %v4329_v29 = vld [vmem:[#allocation46_spill] sm:$0xff]  ;;  %v4335_v20 = vld [vmem:[#allocation47_spill] sm:$0xff]  ;;  %v1007_v2 = vadd.f32 %v3974_v34, %v4336_v63 }
 0x19b   : > { %2513 = vst [vmem:[%s4016_s14 + $0x78] sm:$0xff] %v2481_v60  ;;  %v2452_v32 = vadd.f32 %v3997_v46, %v2413_v24  ;;  %v1871_v42 = vadd.f32 %v1762_v56, %v1433_v45  ;;  %v2411_v59 = vmul.f32 %v3989_v31, %v2308_v21  ;;  %v2311_v39 = vadd.f32 %v3220_v58, %v1873_v57  ;;  %v4324_v45 = vld [vmem:[#allocation39_spill] sm:$0xff] }
 0x19c   : > { %v2479_v28 = vmax.f32 %v2447_v26, 0.0  ;;  %v3187_v52 = vpop.f32.mrf.mxu1  ;;  %v3223_v25 = vpop.f32.mrf.mxu0  ;;  %v1442_v12 = vadd.f32 %v4324_v45, %v1004_v5  ;;  %v1008_v62 = vadd.f32 %v4329_v29, %v4328_v3  ;;  %v4332_v5 = vld [vmem:[#allocation48_spill] sm:$0xff] }
 0x19d   : > { %v2484_v16 = vmax.f32 %v2452_v32, 0.0  ;;  %v2450_v13 = vadd.f32 %v3997_v46, %v2411_v59  ;;  %v1876_v36 = vadd.f32 %v3187_v52, %v1438_v11  ;;  %v2414_v35 = vmul.f32 %v3989_v31, %v2311_v39  ;;  %v4327_v11 = vld [vmem:[#allocation41_spill] sm:$0xff] }
 0x19e   : > { %2511 = vst [vmem:[%s4016_s14 + $0x68] sm:$0xff] %v2479_v28  ;;  %v1775_v18 = vpop.f32.mrf.mxu1  ;;  %v2309_v15 = vadd.f32 %v2200_v23, %v1871_v42  ;;  %v2213_v8 = vpop.f32.mrf.mxu0  ;;  %v1440_v26 = vadd.f32 %v4327_v11, %v1002_v53  ;;  %v1006_v30 = vadd.f32 %v4332_v5, %v4331_v41  ;;  %v1009_v53 = vadd.f32 %v3969_v40, %v4334_v0 }
 0x19f   : > { %2516 = vst [vmem:[%s4016_s14 + $0x90] sm:$0xff] %v2484_v16  ;;  %v2482_v33 = vmax.f32 %v2450_v13, 0.0  ;;  %v2453_v61 = vadd.f32 %v3997_v46, %v2414_v35  ;;  %v1874_v43 = vadd.f32 %v1775_v18, %v1436_v49  ;;  %v2314_v7 = vadd.f32 %v3223_v25, %v1876_v36  ;;  %v4330_v49 = vld [vmem:[#allocation43_spill] sm:$0xff] }
 0x1a0   : > { %v2412_v54 = vmul.f32 %v3989_v31, %v2309_v15  ;;  %v3188_v44 = vpop.f32.mrf.mxu1  ;;  %v3224_v37 = vpop.f32.mrf.mxu0  ;;  %v1443_v28 = vadd.f32 %v4330_v49, %v1005_v4  ;;  %v4337_v4 = vld [vmem:[#allocation49_spill] sm:$0xff] }
 0x1a1   : > { %2514 = vst [vmem:[%s4016_s14 + $0x80] sm:$0xff] %v2482_v33  ;;  %v2485_v48 = vmax.f32 %v2453_v61, 0.0  ;;  %v1877_v55 = vadd.f32 %v3188_v44, %v1439_v51  ;;  %v2417_v22 = vmul.f32 %v3989_v31, %v2314_v7  ;;  %v2312_v19 = vadd.f32 %v2213_v8, %v1874_v43  ;;  %v4333_v51 = vld [vmem:[#allocation45_spill] sm:$0xff] }
 0x1a2   : > { %v2451_v9 = vadd.f32 %v3997_v46, %v2412_v54  ;;  %v1778_v58 = vpop.f32.mrf.mxu1  ;;  %v2216_v60 = vpop.f32.mrf.mxu0  ;;  %v1441_v18 = vadd.f32 %v4333_v51, %v1003_v14  ;;  %v1444_v40 = vadd.f32 %v4337_v4, %v1006_v30 }
 0x1a3   : > { %2517 = vst [vmem:[%s4016_s14 + $0x98] sm:$0xff] %v2485_v48  ;;  %v2456_v57 = vadd.f32 %v3997_v46, %v2417_v22  ;;  %v1875_v24 = vadd.f32 %v1778_v58, %v1437_v17  ;;  %v2415_v21 = vmul.f32 %v3989_v31, %v2312_v19  ;;  %v2315_v1 = vadd.f32 %v3224_v37, %v1877_v55 }
 0x1a4   : > { %v2483_v56 = vmax.f32 %v2451_v9, 0.0  ;;  %v3191_v23 = vpop.f32.mrf.mxu1  ;;  %v3227_v32 = vpop.f32.mrf.mxu0  ;;  %v1446_v17 = vadd.f32 %v4335_v20, %v1008_v62 }
 0x1a5   : > { %v2488_v42 = vmax.f32 %v2456_v57, 0.0  ;;  %v2454_v59 = vadd.f32 %v3997_v46, %v2415_v21  ;;  %v1880_v39 = vadd.f32 %v3191_v23, %v1442_v12  ;;  %v2418_v6 = vmul.f32 %v3989_v31, %v2315_v1 }
 0x1a6   : > { %2515 = vst [vmem:[%s4016_s14 + $0x88] sm:$0xff] %v2483_v56  ;;  %v1791_v52 = vpop.f32.mrf.mxu1  ;;  %v2313_v25 = vadd.f32 %v2216_v60, %v1875_v24  ;;  %v2229_v16 = vpop.f32.mrf.mxu0  ;;  %v1447_v21 = vadd.f32 %v3971_v38, %v1009_v53  ;;  %v4338_v56 = vld [vmem:[#allocation50_spill] sm:$0xff] }
 0x1a7   : > { %2520 = vst [vmem:[%s4016_s14 + $0xb0] sm:$0xff] %v2488_v42  ;;  %v2486_v13 = vmax.f32 %v2454_v59, 0.0  ;;  %v2457_v36 = vadd.f32 %v3997_v46, %v2418_v6  ;;  %v1878_v35 = vadd.f32 %v1791_v52, %v1440_v26  ;;  %v2318_v50 = vadd.f32 %v3227_v32, %v1880_v39 }
 0x1a8   : > { %v2416_v15 = vmul.f32 %v3989_v31, %v2313_v25  ;;  %v3192_v8 = vpop.f32.mrf.mxu1  ;;  %v3228_v33 = vpop.f32.mrf.mxu0  ;;  %v1445_v23 = vadd.f32 %v4338_v56, %v1007_v2 }
 0x1a9   : > { %2518 = vst [vmem:[%s4016_s14 + $0xa0] sm:$0xff] %v2486_v13  ;;  %v2489_v61 = vmax.f32 %v2457_v36, 0.0  ;;  %v1881_v43 = vadd.f32 %v3192_v8, %v1443_v28  ;;  %v2421_v7 = vmul.f32 %v3989_v31, %v2318_v50  ;;  %v2316_v10 = vadd.f32 %v2229_v16, %v1878_v35 }
 0x1aa   : > { %v2455_v54 = vadd.f32 %v3997_v46, %v2416_v15  ;;  %v1794_v44 = vpop.f32.mrf.mxu1  ;;  %v2232_v37 = vpop.f32.mrf.mxu0 }
 0x1ab   : > { %2521 = vst [vmem:[%s4016_s14 + $0xb8] sm:$0xff] %v2489_v61  ;;  %v2460_v48 = vadd.f32 %v3997_v46, %v2421_v7  ;;  %v1879_v55 = vadd.f32 %v1794_v44, %v1441_v18  ;;  %v2419_v22 = vmul.f32 %v3989_v31, %v2316_v10  ;;  %v2319_v19 = vadd.f32 %v3228_v33, %v1881_v43 }
 0x1ac   : > { %v2487_v45 = vmax.f32 %v2455_v54, 0.0  ;;  %v3195_v12 = vpop.f32.mrf.mxu1  ;;  %v3231_v9 = vpop.f32.mrf.mxu0 }
 0x1ad   : > { %v2492_v58 = vmax.f32 %v2460_v48, 0.0  ;;  %v2458_v60 = vadd.f32 %v3997_v46, %v2419_v22  ;;  %v1884_v57 = vadd.f32 %v3195_v12, %v1446_v17  ;;  %v2422_v24 = vmul.f32 %v3989_v31, %v2319_v19 }
 0x1ae   : > { %2519 = vst [vmem:[%s4016_s14 + $0xa8] sm:$0xff] %v2487_v45  ;;  %v1807_v1 = vpop.f32.mrf.mxu1  ;;  %v2317_v27 = vadd.f32 %v2232_v37, %v1879_v55  ;;  %v2245_v47 = vpop.f32.mrf.mxu0 }
 0x1af   : > { %2524 = vst [vmem:[%s4016_s14 + $0xd0] sm:$0xff] %v2492_v58  ;;  %v2490_v34 = vmax.f32 %v2458_v60, 0.0  ;;  %v2461_v14 = vadd.f32 %v3997_v46, %v2422_v24  ;;  %v1882_v11 = vadd.f32 %v1807_v1, %v1444_v40  ;;  %v2322_v26 = vadd.f32 %v3231_v9, %v1884_v57 }
 0x1b0   : > { %v2420_v32 = vmul.f32 %v3989_v31, %v2317_v27  ;;  %v3196_v42 = vpop.f32.mrf.mxu1  ;;  %v3232_v59 = vpop.f32.mrf.mxu0 }
 0x1b1   : > { %2522 = vst [vmem:[%s4016_s14 + $0xc0] sm:$0xff] %v2490_v34  ;;  %v2493_v39 = vmax.f32 %v2461_v14, 0.0  ;;  %v1885_v38 = vadd.f32 %v3196_v42, %v1447_v21  ;;  %v2425_v6 = vmul.f32 %v3989_v31, %v2322_v26  ;;  %v2320_v3 = vadd.f32 %v2245_v47, %v1882_v11 }
 0x1b2   : > { %v2459_v29 = vadd.f32 %v3997_v46, %v2420_v32  ;;  %v1810_v62 = vpop.f32.mrf.mxu1  ;;  %v2248_v13 = vpop.f32.mrf.mxu0 }
 0x1b3   : > { %2525 = vst [vmem:[%s4016_s14 + $0xd8] sm:$0xff] %v2493_v39  ;;  %v2464_v49 = vadd.f32 %v3997_v46, %v2425_v6  ;;  %v1883_v28 = vadd.f32 %v1810_v62, %v1445_v23  ;;  %v2423_v52 = vmul.f32 %v3989_v31, %v2320_v3  ;;  %v2323_v25 = vadd.f32 %v3232_v59, %v1885_v38 }
 0x1b4   : > { %v2491_v16 = vmax.f32 %v2459_v29, 0.0 }
 0x1b5   : > { %v2496_v36 = vmax.f32 %v2464_v49, 0.0  ;;  %v2462_v35 = vadd.f32 %v3997_v46, %v2423_v52  ;;  %v2426_v50 = vmul.f32 %v3989_v31, %v2323_v25  ;;  %v2321_v41 = vadd.f32 %v2248_v13, %v1883_v28 }
 0x1b6   : > { %2523 = vst [vmem:[%s4016_s14 + $0xc8] sm:$0xff] %v2491_v16 }
 0x1b7   : > { %2528 = vst [vmem:[%s4016_s14 + $0xf0] sm:$0xff] %v2496_v36  ;;  %v2494_v5 = vmax.f32 %v2462_v35, 0.0  ;;  %v2465_v30 = vadd.f32 %v3997_v46, %v2426_v50  ;;  %v2424_v51 = vmul.f32 %v3989_v31, %v2321_v41 }
 0x1b9   : > { %2526 = vst [vmem:[%s4016_s14 + $0xe0] sm:$0xff] %v2494_v5  ;;  %v2497_v18 = vmax.f32 %v2465_v30, 0.0  ;;  %v2463_v15 = vadd.f32 %v3997_v46, %v2424_v51 }
 0x1bb   : > { %2529 = vst [vmem:[%s4016_s14 + $0xf8] sm:$0xff] %v2497_v18  ;;  %v2495_v8 = vmax.f32 %v2463_v15, 0.0 }
 0x1bd   : > { %2527 = vst [vmem:[%s4016_s14 + $0xe8] sm:$0xff] %v2495_v8 }
 0x1be   : > { %3471 = shalt.err (!%p3468_p4)
}
 0x1bf   : > { %s3472_s25 = scalar_lea.hbm %s4183_s13, 4096  ;;  %s3476_s9 = scalar_lea.hbm %s4240_s4, 8192 }
 0x1c0   : > { %p3473_p12 = scmp.ne.s32.totalorder %s4183_s13, %s3472_s25  ;;  %p3477_p0 = scmp.lt.s32.totalorder %s4183_s13, %s4240_s4 }
 0x1c1   : > { %p3478_p11 = scmp.lt.s32.totalorder %s3476_s9, %s3472_s25 }
 0x1c2   : > { %p3474_p1 = pnand %p3473_p12, %p4339_p6 }
 0x1c3   : > { %p3479_p13 = por %p3478_p11, %p3477_p0 }
 0x1c4   : > { %p3475_p10 = pneg %p3474_p1 }
 0x1c6   : > { %p3480_p3 = pnand %p3479_p13, %p3475_p10 }
 0x1c8   : > { %3483 = shalt.err (!%p3480_p3)
}
 0x1c9   : > { %s3549_s14 = smov 128   ;;  %s3550_s21 = smov 8  }
 0x1ca   : > { %3244 = dma.vmem_to_hbm [thread:$0]  (%p4339_p6), %s4185_s7, 4096, %s4183_s13, %s4191_s18, %s3549_s14, %s3549_s14, %s3550_s21  }
 0x1cb PF: > { %p3259_p9 = scmp.ge.s32.totalorder %s3542_s20, 2  ;;  %s2561_s8 = sand.u32 1, %s3522_s15  }
 0x1cc   : > { %p4340_p8 = scmp.ne.s32.totalorder %s4251_s29, 0  ;;  %s2562_s10 = scalar_lea.sflag [#allocation4], %s2561_s8 }
 0x1ce   : > { %p3254_p2 = pnand %p3259_p9, %p4340_p8 }
 0x1d0   : > { %p3255_p5 = pneg %p3254_p2 }
 0x1d2   : > { %3517 = dma.done.wait (%p3255_p5), %s2562_s10, 4096  }
 0x1d3   : > { %3519 = vsyncadd (%p3255_p5), %s2562_s10, 4294963200  ;;  %s19_s20 = sadd.s32 1, %s3542_s20   ;;  %s4341_s15 = smov %s3526_s16 }
 0x1d4   : > { %p16_p7 = scmp.ge.s32.totalorder %s19_s20, 4   ;;  %s4342_s16 = smov %s3530_s17 }
 0x1d5   : > { %s4343_s17 = smov %s3638_s30  ;;  %s4344_s18 = smov %s3538_s19 }
 0x1d6   : > { %s4345_s19 = smov %s4347_s23  ;;  %18 = sbr.rel (!%p16_p7) target bundleno = 6 (0x6), region = 87 }
 0x1db   :  { %2567 = vsyncpa [#allocation3], 1 }
 0x1dc   :  { %2569 = vsyncpa [#allocation3 + $0x1], 1 }
 0x1dd   :  { %2570 = vsyncpa [#allocation6], 1 }
 0x1de   :  { %2571 = vsyncpa [#allocation4], 1 }
 0x1df   :  { %2573 = vsyncpa [#allocation4 + $0x1], 1 }

// kernel: tpu_custom_call.1
= control target key start
LH: loop header
LB: loop body
LE: loop exit
PB: predicated region body
PF: predicated region fallthrough
CT: control target
= control target key end

     0   :  { %9 = vsyncpa [#allocation3], 0  ;;  %s4338_s0 = inlined_call_operand.hbm [shape: bf16[2,20,16,32], index: 0, kind: input, shape index: {}]   ;;  %s4339_s1 = inlined_call_operand.hbm [shape: bf16[5,32,128], index: 1, kind: input, shape index: {}]   ;;  %s4340_s2 = inlined_call_operand.vmem [shape: f32[1,128], index: 2, kind: input, shape index: {}]   ;;  %s4341_s3 = inlined_call_operand.vmem [shape: f32[1,128], index: 3, kind: input, shape index: {}]   ;;  %s4342_s4 = inlined_call_operand.hbm [shape: f32[2,256,128], index: 4, kind: output, shape index: {}]  }
   0x1   :  { %11 = vsyncpa [#allocation3 + $0x1], 0 }
   0x2   :  { %12 = vsyncpa [#allocation6], 0 }
   0x3   :  { %13 = vsyncpa [#allocation4], 0 }
   0x4   :  { %15 = vsyncpa [#allocation4 + $0x1], 0  ;;  %s3606_s15 = smov 0   ;;  %s3608_s16 = smov 0  }
   0x5   :  { %s3610_s17 = smov 0   ;;  %s3612_s18 = smov 0  }
   0x6   :  { %s3614_s19 = smov 0   ;;  %s3616_s20 = smov 0  }
   0x7 LB: > { %s2675_s21 = sadd.s32 4294967295, %s3572_s20   ;;  %s2676_s22 = sadd.s32 4294967294, %s3572_s20   ;;  %s3572_s20 = sphi %s3616_s20, %s21_s20   ;;  %s3568_s19 = sphi %s3614_s19, %s4440_s19   ;;  %s3564_s18 = sphi %s3612_s18, %s4439_s18   ;;  %s3560_s17 = sphi %s3610_s17, %s4438_s17   ;;  %s3556_s16 = sphi %s3608_s16, %s4437_s16   ;;  %s3552_s15 = sphi %s3606_s15, %s4436_s15  }
   0x8   : > { %p53_p0 = scmp.ne.s32.totalorder %s3556_s16, %s3552_s15  ;;  %p3640_p1 = scmp.eq.s32.totalorder %s2675_s21, 0 }
   0x9   : > { %p3644_p2 = scmp.eq.s32.totalorder %s2675_s21, 1  ;;  %p148_p3 = scmp.eq.s32.totalorder %s2676_s22, 1 }
   0xa   : > { %p3650_p4 = por %p3640_p1, %p53_p0  ;;  %p2677_p5 = scmp.ge.s32.totalorder %s3572_s20, 1 }
   0xb   : > { %p3655_p6 = por %p148_p3, %p53_p0  ;;  %p155_p7 = scmp.lt.s32.totalorder %s3572_s20, 3 }
   0xc   : > { %s4347_s25 = scalar_select %p3650_p4, 1, 0 }
   0xd   : > { %s4348_s26 = scalar_select %p3655_p6, 1, 0 }
   0xe   : > { %p3660_p8 = pnand %p2677_p5, %p155_p7  ;;  %s3574_s28 = smov [#allocation5]  }
   0xf   : > { %s167_s29 = sshll.u32 %s3574_s28, 4  ;;  %p2679_p10 = scmp.ge.s32.totalorder %s3572_s20, 2  ;;  %s168_s29 = int_to_ptr.vmem [resolvable:$true] %s167_s29 }
  0x10   : > { %p3275_p9 = pneg %p3660_p8  ;;  %s33_s5 = sadd.s32 1, %s3568_s19 }
  0x11   : > { %s3445_s6 = scalar_lea.vmem %s168_s29, 1280  ;;  %p3453_p5 = scmp.lt.s32.totalorder %s168_s29, %s168_s29 }
  0x12   : > { %p3669_p11 = pnand %p3275_p9, %p3640_p1  ;;  %p3446_p13 = scmp.ne.s32.totalorder %s168_s29, %s3445_s6 }
  0x13   : > { %p3454_p7 = scmp.lt.s32.totalorder %s3445_s6, %s3445_s6 }
  0x14   : > { %p3436_p12 = pneg %p3669_p11 }
  0x15   : > { %p3455_p6 = por %p3454_p7, %p3453_p5 }
  0x16   : > { %p3448_p0 = pnand %p3446_p13, %p3436_p12 }
  0x18   : > { %p3449_p3 = pneg %p3448_p0 }
  0x1a   : > { %p3456_p4 = pnand %p3455_p6, %p3449_p3 }
  0x1c   : > { %3459 = shalt.err (!%p3456_p4)
}
  0x1d   : > { %s4344_s7 = smov 64   ;;  %s3576_s8 = smov 4  }
  0x1e   : > { %3278 = dma.hbm_to_vmem [thread:$0]  (!%p3669_p11), %s4339_s1, 1280, %s168_s29, [#allocation6], %s4344_s7, %s4344_s7, %s3576_s8  }
  0x1f   : > { %p35_p4 = scmp.ge.s32.totalorder %s33_s5, 2  ;;  %s40_s11 = sadd.s32 1, %s3560_s17 }
  0x20   : > { %p47_p6 = scmp.ne.s32.totalorder %s3560_s17, %s3556_s16  ;;  %p48_p9 = scmp.eq.s32.totalorder %s3572_s20, 0 }
  0x21   : > { %s4442_s5 = smov (%p35_p4, %s33_s5), 0  ;;  %p3288_p0 = scmp.lt.s32.totalorder %s3572_s20, 2 }
  0x22   : > { %p49_p12 = por %p48_p9, %p47_p6  ;;  %p3692_p13 = por %p3644_p2, %p47_p6 }
  0x23   : > { %s37_s13 = ssub.s32 %s3568_s19, %s4442_s5  ;;  %s187_s14 = sand.u32 1, %s3560_s17  }
  0x24   : > { %p38_p3 = scmp.eq.s32.totalorder %s37_s13, 0  ;;  %s3264_s21 = smul.u32 160, %s187_s14 }
  0x25   : > { %s3265_s28 = smul.u32 2560, %s3568_s19  ;;  %p3704_p11 = pnand %p3288_p0, %p49_p12 }
  0x26   : > { %s3701_s22 = scalar_select %p38_p3, %s3560_s17, %s40_s11  }
  0x27   : > { %s191_s29 = scalar_lea.vmem [#allocation2], %s3264_s21  ;;  %s197_s10 = scalar_lea.hbm %s4338_s0, %s3265_s28 }
  0x28   : > { %s198_s30 = sshll.u32 %s191_s29, 4  ;;  %s188_s7 = scalar_lea.sflag [#allocation3], %s187_s14  ;;  %s199_s30 = int_to_ptr.vmem [resolvable:$true] %s198_s30 }
  0x29   : > { %p3462_p2 = pneg %p3704_p11  ;;  %s3473_s13 = scalar_lea.vmem %s199_s30, 2560 }
  0x2a   : > { %p3474_p5 = scmp.ne.s32.totalorder %s199_s30, %s3473_s13  ;;  %s3577_s11 = smov [#allocation2]  }
  0x2b   : > { %s3478_s21 = sshll.u32 %s3577_s11, 4  ;;  %s3479_s21 = int_to_ptr.vmem [resolvable:$false] %s3478_s21 }
  0x2c   : > { %p3476_p7 = pnand %p3474_p5, %p3462_p2  ;;  %s3480_s29 = scalar_lea.vmem %s3479_s21, 5120 }
  0x2d   : > { %p3481_p6 = scmp.lt.s32.totalorder %s199_s30, %s3479_s21  ;;  %p3482_p9 = scmp.lt.s32.totalorder %s3480_s29, %s3473_s13 }
  0x2e   : > { %p3477_p4 = pneg %p3476_p7 }
  0x2f   : > { %p3483_p12 = por %p3482_p9, %p3481_p6 }
  0x31   : > { %p3484_p0 = pnand %p3483_p12, %p3477_p4 }
  0x33   : > { %3487 = shalt.err (!%p3484_p0)
}
  0x34   : > { %s4353_s28 = smov 64   ;;  %210 = sbr.rel (%p3660_p8) target bundleno = 448 (0x1c0), region = 36 }
  0x35   : > { %3282 = dma.hbm_to_vmem [thread:$0]  (!%p3704_p11), %s197_s10, 2560, %s199_s30, %s188_s7, %s4353_s28, %s4353_s28, %s3576_s8  }
  0x39   : > { %s3721_s14 = sand.u32 1, %s3556_s16   ;;  %p4354_p3 = scmp.ne.s32.totalorder %s4347_s25, 0 }
  0x3a   : > { %s3266_s9 = smul.u32 160, %s3721_s14  ;;  %s213_s24 = scalar_lea.sflag [#allocation3], %s3721_s14 }
  0x3c   : > { %s3725_s13 = scalar_lea.vmem [#allocation2], %s3266_s9 }
  0x3d   : > { %3539 = dma.done.wait (%p4354_p3), %s213_s24, 2560  }
  0x3e   : > { %3541 = vsyncadd (%p4354_p3), %s213_s24, 4294964736 }
  0x3f   : > { %3543 = dma.done.wait (%p3640_p1), [#allocation6], 1280  }
  0x40   : > { %3545 = vsyncadd (%p3640_p1), [#allocation6], 4294966016  ;;  %v3344_v0 = vld [vmem:[#allocation5 + $0x8] sm:$0xff]   ;;  %v3345_v1 = vld [vmem:[#allocation5] sm:$0xff]   ;;  %vm379_vm0 = vcmask 261120   ;;  %s2683_s8 = sshll.u32 %s3721_s14, 8 }
  0x41   : > { %3260 = vmatprep.subr.bf16.mxu1 %v3344_v0  ;;  %3080 = vmatprep.subr.bf16.mxu0 %v3344_v0  ;;  %v3346_v2 = vld [vmem:[%s3725_s13 + $0x40] sm:$0xff]   ;;  %v3347_v3 = vld [vmem:[%s3725_s13 + $0x48] sm:$0xff]   ;;  %v3348_v4 = vld [vmem:[#allocation5 + $0x18] sm:$0xff]   ;;  %s4119_s30 = scalar_lea.vmem [#allocation7], %s2683_s8  ;;  %s2989_s6 = sshll.u32 %s3564_s18, 12 }
  0x42   : > { %3262 = vmatpush3.bf16.msra.mxu1 %v3344_v0  ;;  %3081 = vmatpush3.bf16.msra.mxu0 %v3344_v0  ;;  %v3349_v5 = vld [vmem:[%s3725_s13] sm:$0xff]   ;;  %v3350_v6 = vld [vmem:[%s3725_s13 + $0x8] sm:$0xff]   ;;  %v3351_v7 = vld [vmem:[%s3725_s13 + $0x50] sm:$0xff]   ;;  %s2563_s10 = sshll.u32 %s4119_s30, 4  ;;  %s4286_s29 = scalar_lea.hbm %s4342_s4, %s2989_s6  ;;  %s4288_s10 = int_to_ptr.vmem [resolvable:$true] %s2563_s10 }
  0x43   : > { %3261 = vmatprep.subr.bf16.mxu1 %v3345_v1  ;;  %3100 = vmatprep.mubr.msk.bf16.mxu1 %vm379_vm0, %v3346_v2  ;;  %v3353_v8 = vld [vmem:[#allocation5 + $0x28] sm:$0xff]   ;;  %v3354_v9 = vld [vmem:[%s3725_s13 + $0x10] sm:$0xff]   ;;  %v3352_v10 = vld [vmem:[%s3725_s13 + $0x58] sm:$0xff]   ;;  %s2548_s28 = scalar_lea.sflag [#allocation4], %s3721_s14  ;;  %s3488_s18 = scalar_lea.vmem %s4288_s10, 4096 }
  0x44   : > { %3082 = vmatprep.subr.bf16.mxu0 %v3345_v1  ;;  %3084 = vmatprep.mubr.msk.bf16.mxu0 %vm379_vm0, %v3349_v5  ;;  %v3355_v11 = vld [vmem:[%s3725_s13 + $0x18] sm:$0xff]   ;;  %v3356_v12 = vld [vmem:[%s3725_s13 + $0x60] sm:$0xff]   ;;  %v3358_v13 = vld [vmem:[#allocation5 + $0x10] sm:$0xff]   ;;  %p3489_p1 = scmp.ne.s32.totalorder %s4288_s10, %s3488_s18  ;;  %s3578_s9 = smov [#allocation7]  }
  0x45   : > { %v3359_v14 = vld [vmem:[%s3725_s13 + $0x20] sm:$0xff]   ;;  %v3357_v16 = vld [vmem:[%s3725_s13 + $0x68] sm:$0xff]   ;;  %v3361_v18 = vld [vmem:[%s3725_s13 + $0x70] sm:$0xff]   ;;  %s3492_s24 = sshll.u32 %s3578_s9, 4  ;;  %s3493_s24 = int_to_ptr.vmem [resolvable:$false] %s3492_s24 }
  0x46   : > { %3263 = vmatpush3.bf16.msra.mxu1 %v3345_v1  ;;  %3083 = vmatpush3.bf16.msra.mxu0 %v3345_v1  ;;  %v3363_v15 = vld [vmem:[#allocation5 + $0x20] sm:$0xff]   ;;  %v3360_v17 = vld [vmem:[%s3725_s13 + $0x28] sm:$0xff]   ;;  %v3364_v19 = vld [vmem:[%s3725_s13 + $0x30] sm:$0xff]   ;;  %p3490_p8 = pnand %p3489_p1, %p3692_p13  ;;  %p3495_p2 = scmp.lt.s32.totalorder %s4288_s10, %s3493_s24 }
  0x47   : > { %3116 = vmatprep.subr.bf16.mxu1 %v3348_v4  ;;  %3152 = vmatprep.subr.bf16.mxu0 %v3353_v8  ;;  %v3368_v20 = vld [vmem:[#allocation5 + $0x38] sm:$0xff]   ;;  %v3373_v23 = vld [vmem:[#allocation5 + $0x48] sm:$0xff]   ;;  %v3369_v25 = vld [vmem:[%s3725_s13 + $0x10] sm:$0xff]  }
  0x48   : > { %v3362_v21 = vld [vmem:[%s3725_s13 + $0x78] sm:$0xff]   ;;  %v3366_v24 = vld [vmem:[%s3725_s13 + $0x8] sm:$0xff]   ;;  %v3367_v26 = vld [vmem:[%s3725_s13 + $0x10] sm:$0xff]   ;;  %p3491_p11 = pneg %p3490_p8 }
  0x49   : > { %3101 = vmatmul.mubr.msk.bf16.vlgmr.msra.gmra.mxu1 %vm379_vm0, %v3347_v3  ;;  %3085 = vmatmul.mubr.msk.bf16.vlgmr.msra.gmra.mxu0 %vm379_vm0, %v3350_v6  ;;  %v3365_v22 = vld [vmem:[%s3725_s13 + $0x38] sm:$0xff]   ;;  %v3374_v29 = vld [vmem:[%s3725_s13 + $0x20] sm:$0xff]   ;;  %v3386_v30 = vld [vmem:[#allocation5 + $0x30] sm:$0xff]  }
  0x4a   : > { %3117 = vmatpush3.bf16.msra.mxu1 %v3348_v4  ;;  %3104 = vmatprep.mubr.msk.bf16.mxu1 %vm379_vm0, %v3351_v7  ;;  %v3370_v27 = vld [vmem:[%s3725_s13 + $0x18] sm:$0xff]   ;;  %v3372_v31 = vld [vmem:[%s3725_s13 + $0x20] sm:$0xff]   ;;  %v3375_v32 = vld [vmem:[%s3725_s13 + $0x28] sm:$0xff]  }
  0x4b   : > { %3088 = vmatprep.mubr.msk.bf16.mxu0 %vm379_vm0, %v3354_v9  ;;  %3153 = vmatpush3.bf16.msra.mxu0 %v3353_v8  ;;  %v3371_v28 = vld [vmem:[%s3725_s13 + $0x18] sm:$0xff]   ;;  %v3376_v33 = vld [vmem:[%s3725_s13 + $0x28] sm:$0xff]   ;;  %v3378_v34 = vld [vmem:[%s3725_s13 + $0x30] sm:$0xff]  }
  0x4c   : > { %3118 = vmatprep.subr.bf16.mxu1 %v3358_v13  ;;  %3154 = vmatprep.subr.bf16.mxu0 %v3363_v15  ;;  %v3391_v35 = vld [vmem:[#allocation5 + $0x40] sm:$0xff]   ;;  %v3377_v36 = vld [vmem:[%s3725_s13 + $0x30] sm:$0xff]   ;;  %v3379_v37 = vld [vmem:[%s3725_s13 + $0x38] sm:$0xff]  }
  0x4d   : > { %v3380_v38 = vld [vmem:[%s3725_s13 + $0x38] sm:$0xff]   ;;  %v3382_v39 = vld [vmem:[%s3725_s13 + $0x40] sm:$0xff]   ;;  %v3383_v41 = vld [vmem:[%s3725_s13 + $0x48] sm:$0xff]  }
  0x4e   : > { %3119 = vmatpush3.bf16.msra.mxu1 %v3358_v13  ;;  %v3381_v40 = vld [vmem:[%s3725_s13 + $0x40] sm:$0xff]   ;;  %v3384_v42 = vld [vmem:[%s3725_s13 + $0x48] sm:$0xff]   ;;  %v3387_v43 = vld [vmem:[%s3725_s13 + $0x50] sm:$0xff]  }
  0x4f   : > { %3155 = vmatpush3.bf16.msra.mxu0 %v3363_v15  ;;  %3188 = vmatprep.subr.bf16.mxu1 %v3368_v20  ;;  %v3385_v44 = vld [vmem:[%s3725_s13 + $0x50] sm:$0xff]   ;;  %v3388_v45 = vld [vmem:[%s3725_s13 + $0x58] sm:$0xff]   ;;  %v3392_v47 = vld [vmem:[%s3725_s13 + $0x60] sm:$0xff]  }
  0x50   : > { %3224 = vmatprep.subr.bf16.mxu0 %v3373_v23  ;;  %v3389_v46 = vld [vmem:[%s3725_s13 + $0x58] sm:$0xff]   ;;  %v3390_v48 = vld [vmem:[%s3725_s13 + $0x60] sm:$0xff]   ;;  %v3393_v49 = vld [vmem:[%s3725_s13 + $0x68] sm:$0xff]  }
  0x51   : > { %3105 = vmatmul.mubr.msk.bf16.gmra.mxu1 %vm379_vm0, %v3352_v10  ;;  %3089 = vmatmul.mubr.msk.bf16.gmra.mxu0 %vm379_vm0, %v3355_v11  ;;  %v3394_v50 = vld [vmem:[%s3725_s13 + $0x68] sm:$0xff]   ;;  %v3396_v51 = vld [vmem:[%s3725_s13 + $0x70] sm:$0xff]   ;;  %v3397_v53 = vld [vmem:[%s3725_s13 + $0x78] sm:$0xff]  }
  0x52   : > { %3108 = vmatprep.mubr.msk.bf16.mxu1 %vm379_vm0, %v3356_v12  ;;  %3092 = vmatprep.mubr.msk.bf16.mxu0 %vm379_vm0, %v3359_v14  ;;  %v3395_v52 = vld [vmem:[%s3725_s13 + $0x70] sm:$0xff]   ;;  %v3398_v54 = vld [vmem:[%s3725_s13 + $0x78] sm:$0xff]   ;;  %v3400_v55 = vld [vmem:[%s3725_s13 + $0x80] sm:$0xff]  }
  0x53   : > { %v3399_v56 = vld [vmem:[%s3725_s13 + $0x80] sm:$0xff]   ;;  %v3401_v57 = vld [vmem:[%s3725_s13 + $0x88] sm:$0xff]   ;;  %v3402_v58 = vld [vmem:[%s3725_s13 + $0x18] sm:$0xff]  }
  0x54   : > { %v3404_v59 = vld [vmem:[%s3725_s13 + $0x20] sm:$0xff]   ;;  %v3405_v61 = vld [vmem:[%s3725_s13 + $0x28] sm:$0xff]   ;;  %v3408_v63 = vld [vmem:[%s3725_s13 + $0x30] sm:$0xff]  }
  0x55   : > { %v3403_v60 = vld [vmem:[%s3725_s13 + $0x20] sm:$0xff]   ;;  %v3406_v62 = vld [vmem:[%s3725_s13 + $0x28] sm:$0xff]   ;;  %v3407_v0 = vld [vmem:[%s3725_s13 + $0x30] sm:$0xff]  }
  0x56   : > { %v3409_v1 = vld [vmem:[%s3725_s13 + $0x38] sm:$0xff]   ;;  %v3412_v3 = vld [vmem:[%s3725_s13 + $0x40] sm:$0xff]   ;;  %v3413_v5 = vld [vmem:[%s3725_s13 + $0x48] sm:$0xff]  }
  0x57   : > { %v3410_v2 = vld [vmem:[%s3725_s13 + $0x38] sm:$0xff]   ;;  %v3411_v4 = vld [vmem:[%s3725_s13 + $0x40] sm:$0xff]   ;;  %v3414_v6 = vld [vmem:[%s3725_s13 + $0x48] sm:$0xff]  }
  0x58   : > { %v3416_v7 = vld [vmem:[%s3725_s13 + $0x50] sm:$0xff]   ;;  %v3417_v9 = vld [vmem:[%s3725_s13 + $0x58] sm:$0xff]   ;;  %v3420_v11 = vld [vmem:[%s3725_s13 + $0x60] sm:$0xff]  }
  0x59   : > { %3109 = vmatmul.mubr.msk.bf16.gmra.mxu1 %vm379_vm0, %v3357_v16  ;;  %3093 = vmatmul.mubr.msk.bf16.gmra.mxu0 %vm379_vm0, %v3360_v17  ;;  %v3415_v8 = vld [vmem:[%s3725_s13 + $0x50] sm:$0xff]   ;;  %v3418_v10 = vld [vmem:[%s3725_s13 + $0x58] sm:$0xff]   ;;  %v3419_v12 = vld [vmem:[%s3725_s13 + $0x60] sm:$0xff]  }
  0x5a   : > { %3112 = vmatprep.mubr.msk.bf16.mxu1 %vm379_vm0, %v3361_v18  ;;  %3096 = vmatprep.mubr.msk.bf16.mxu0 %vm379_vm0, %v3364_v19  ;;  %v3421_v13 = vld [vmem:[%s3725_s13 + $0x68] sm:$0xff]   ;;  %v3424_v15 = vld [vmem:[%s3725_s13 + $0x70] sm:$0xff]   ;;  %v3425_v17 = vld [vmem:[%s3725_s13 + $0x78] sm:$0xff]  }
  0x5b   : > { %v3422_v14 = vld [vmem:[%s3725_s13 + $0x68] sm:$0xff]   ;;  %v3423_v16 = vld [vmem:[%s3725_s13 + $0x70] sm:$0xff]   ;;  %v3426_v18 = vld [vmem:[%s3725_s13 + $0x78] sm:$0xff]  }
  0x5c   : > { %v3428_v19 = vld [vmem:[%s3725_s13 + $0x80] sm:$0xff]  }
  0x61   : > { %3113 = vmatmul.mubr.msk.bf16.gmra.mxu1 %vm379_vm0, %v3362_v21  ;;  %3097 = vmatmul.mubr.msk.bf16.gmra.mxu0 %vm379_vm0, %v3365_v22  ;;  %v3429_v21 = vld [vmem:[%s3725_s13 + $0x88] sm:$0xff]  }
  0x62   : > { %3120 = vmatprep.mubr.msk.bf16.mxu1 %vm379_vm0, %v3366_v24  ;;  %3156 = vmatprep.mubr.msk.bf16.mxu0 %vm379_vm0, %v3369_v25  ;;  %v3430_v22 = vld [vmem:[%s3725_s13 + $0x88] sm:$0xff]   ;;  %v3431_v24 = vld [vmem:[%s3725_s13 + $0x90] sm:$0xff]   ;;  %v3433_v25 = vld [vmem:[%s3725_s13 + $0x98] sm:$0xff]  }
  0x69   : > { %3121 = vmatmul.mubr.msk.bf16.vlgmr.msra.gmra.mxu1 %vm379_vm0, %v3367_v26  ;;  %3157 = vmatmul.mubr.msk.bf16.vlgmr.msra.gmra.mxu0 %vm379_vm0, %v3370_v27 }
  0x6a   : > { %3189 = vmatpush3.bf16.msra.mxu1 %v3368_v20  ;;  %3124 = vmatprep.mubr.msk.bf16.mxu1 %vm379_vm0, %v3371_v28  ;;  %v3427_v20 = vld [vmem:[%s3725_s13 + $0x80] sm:$0xff]  }
  0x6b   : > { %3225 = vmatpush3.bf16.msra.mxu0 %v3373_v23  ;;  %3160 = vmatprep.mubr.msk.bf16.mxu0 %vm379_vm0, %v3374_v29  ;;  %v3432_v23 = vld [vmem:[%s3725_s13 + $0x90] sm:$0xff]   ;;  %s3494_s13 = scalar_lea.vmem %s3493_s24, 8192 }
  0x6c   : > { %3190 = vmatprep.subr.bf16.mxu1 %v3386_v30  ;;  %3226 = vmatprep.subr.bf16.mxu0 %v3391_v35  ;;  %p3496_p5 = scmp.lt.s32.totalorder %s3494_s13, %s3488_s18 }
  0x6e   : > { %3191 = vmatpush3.bf16.msra.mxu1 %v3386_v30  ;;  %p3497_p7 = por %p3496_p5, %p3495_p2 }
  0x6f   : > { %3227 = vmatpush3.bf16.msra.mxu0 %v3391_v35 }
  0x70   : > { %p3498_p4 = pnand %p3497_p7, %p3491_p11 }
  0x71   : > { %3125 = vmatmul.mubr.msk.bf16.gmra.mxu1 %vm379_vm0, %v3372_v31  ;;  %3161 = vmatmul.mubr.msk.bf16.gmra.mxu0 %vm379_vm0, %v3375_v32 }
  0x72   : > { %3128 = vmatprep.mubr.msk.bf16.mxu1 %vm379_vm0, %v3376_v33  ;;  %3164 = vmatprep.mubr.msk.bf16.mxu0 %vm379_vm0, %v3378_v34 }
  0x79   : > { %3129 = vmatmul.mubr.msk.bf16.gmra.mxu1 %vm379_vm0, %v3377_v36  ;;  %3165 = vmatmul.mubr.msk.bf16.gmra.mxu0 %vm379_vm0, %v3379_v37 }
  0x7a   : > { %3132 = vmatprep.mubr.msk.bf16.mxu1 %vm379_vm0, %v3380_v38  ;;  %3168 = vmatprep.mubr.msk.bf16.mxu0 %vm379_vm0, %v3382_v39 }
  0x81   : > { %3133 = vmatmul.mubr.msk.bf16.gmra.mxu1 %vm379_vm0, %v3381_v40  ;;  %3169 = vmatmul.mubr.msk.bf16.gmra.mxu0 %vm379_vm0, %v3383_v41 }
  0x82   : > { %3136 = vmatprep.mubr.msk.bf16.mxu1 %vm379_vm0, %v3384_v42  ;;  %3172 = vmatprep.mubr.msk.bf16.mxu0 %vm379_vm0, %v3387_v43 }
  0x89   : > { %3137 = vmatmul.mubr.msk.bf16.gmra.mxu1 %vm379_vm0, %v3385_v44  ;;  %3173 = vmatmul.mubr.msk.bf16.gmra.mxu0 %vm379_vm0, %v3388_v45 }
  0x8a   : > { %3140 = vmatprep.mubr.msk.bf16.mxu1 %vm379_vm0, %v3389_v46  ;;  %3176 = vmatprep.mubr.msk.bf16.mxu0 %vm379_vm0, %v3392_v47 }
  0x91   : > { %3141 = vmatmul.mubr.msk.bf16.gmra.mxu1 %vm379_vm0, %v3390_v48  ;;  %3177 = vmatmul.mubr.msk.bf16.gmra.mxu0 %vm379_vm0, %v3393_v49 }
  0x92   : > { %3144 = vmatprep.mubr.msk.bf16.mxu1 %vm379_vm0, %v3394_v50  ;;  %3180 = vmatprep.mubr.msk.bf16.mxu0 %vm379_vm0, %v3396_v51 }
  0x99   : > { %3145 = vmatmul.mubr.msk.bf16.gmra.mxu1 %vm379_vm0, %v3395_v52  ;;  %3181 = vmatmul.mubr.msk.bf16.gmra.mxu0 %vm379_vm0, %v3397_v53 }
  0x9a   : > { %3148 = vmatprep.mubr.msk.bf16.mxu1 %vm379_vm0, %v3398_v54  ;;  %3184 = vmatprep.mubr.msk.bf16.mxu0 %vm379_vm0, %v3400_v55 }
  0xa1   : > { %3149 = vmatmul.mubr.msk.bf16.gmra.mxu1 %vm379_vm0, %v3399_v56  ;;  %3185 = vmatmul.mubr.msk.bf16.gmra.mxu0 %vm379_vm0, %v3401_v57 }
  0xa2   : > { %3192 = vmatprep.mubr.msk.bf16.mxu1 %vm379_vm0, %v3402_v58  ;;  %3228 = vmatprep.mubr.msk.bf16.mxu0 %vm379_vm0, %v3404_v59 }
  0xa9   : > { %3193 = vmatmul.mubr.msk.bf16.vlgmr.msra.gmra.mxu1 %vm379_vm0, %v3403_v60  ;;  %3229 = vmatmul.mubr.msk.bf16.vlgmr.msra.gmra.mxu0 %vm379_vm0, %v3405_v61 }
  0xaa   : > { %3196 = vmatprep.mubr.msk.bf16.mxu1 %vm379_vm0, %v3406_v62  ;;  %3232 = vmatprep.mubr.msk.bf16.mxu0 %vm379_vm0, %v3408_v63 }
  0xb1   : > { %3197 = vmatmul.mubr.msk.bf16.gmra.mxu1 %vm379_vm0, %v3407_v0  ;;  %3233 = vmatmul.mubr.msk.bf16.gmra.mxu0 %vm379_vm0, %v3409_v1 }
  0xb2   : > { %3200 = vmatprep.mubr.msk.bf16.mxu1 %vm379_vm0, %v3410_v2  ;;  %3236 = vmatprep.mubr.msk.bf16.mxu0 %vm379_vm0, %v3412_v3 }
  0xb9   : > { %3201 = vmatmul.mubr.msk.bf16.gmra.mxu1 %vm379_vm0, %v3411_v4  ;;  %3237 = vmatmul.mubr.msk.bf16.gmra.mxu0 %vm379_vm0, %v3413_v5 }
  0xba   : > { %3204 = vmatprep.mubr.msk.bf16.mxu1 %vm379_vm0, %v3414_v6  ;;  %3240 = vmatprep.mubr.msk.bf16.mxu0 %vm379_vm0, %v3416_v7 }
  0xc1   : > { %3205 = vmatmul.mubr.msk.bf16.gmra.mxu1 %vm379_vm0, %v3415_v8  ;;  %3241 = vmatmul.mubr.msk.bf16.gmra.mxu0 %vm379_vm0, %v3417_v9 }
  0xc2   : > { %3208 = vmatprep.mubr.msk.bf16.mxu1 %vm379_vm0, %v3418_v10  ;;  %3244 = vmatprep.mubr.msk.bf16.mxu0 %vm379_vm0, %v3420_v11 }
  0xc9   : > { %3209 = vmatmul.mubr.msk.bf16.gmra.mxu1 %vm379_vm0, %v3419_v12  ;;  %3245 = vmatmul.mubr.msk.bf16.gmra.mxu0 %vm379_vm0, %v3421_v13 }
  0xca   : > { %3212 = vmatprep.mubr.msk.bf16.mxu1 %vm379_vm0, %v3422_v14  ;;  %3248 = vmatprep.mubr.msk.bf16.mxu0 %vm379_vm0, %v3424_v15 }
  0xd1   : > { %3213 = vmatmul.mubr.msk.bf16.gmra.mxu1 %vm379_vm0, %v3423_v16  ;;  %3249 = vmatmul.mubr.msk.bf16.gmra.mxu0 %vm379_vm0, %v3425_v17 }
  0xd2   : > { %3216 = vmatprep.mubr.msk.bf16.mxu1 %vm379_vm0, %v3426_v18  ;;  %3252 = vmatprep.mubr.msk.bf16.mxu0 %vm379_vm0, %v3428_v19 }
  0xd9   : > { %3217 = vmatmul.mubr.msk.bf16.gmra.mxu1 %vm379_vm0, %v3427_v20  ;;  %3253 = vmatmul.mubr.msk.bf16.gmra.mxu0 %vm379_vm0, %v3429_v21 }
  0xda   : > { %3220 = vmatprep.mubr.msk.bf16.mxu1 %vm379_vm0, %v3430_v22  ;;  %3256 = vmatprep.mubr.msk.bf16.mxu0 %vm379_vm0, %v3432_v23 }
  0xe1   : > { %3221 = vmatmul.mubr.msk.bf16.gmra.mxu1 %vm379_vm0, %v3431_v24  ;;  %3257 = vmatmul.mubr.msk.bf16.gmra.mxu0 %vm379_vm0, %v3433_v25 }
 0x109   : > { %v3895_v26 = vpop.f32.mrf.mxu1  ;;  %v3897_v27 = vpop.f32.mrf.mxu0 }
 0x10b   : > { %v3899_v28 = vpop.f32.mrf.mxu1  ;;  %v3901_v29 = vpop.f32.mrf.mxu0 }
 0x10d   : > { %v3903_v30 = vpop.f32.mrf.mxu1  ;;  %v3905_v31 = vpop.f32.mrf.mxu0 }
 0x10f   : > { %v3907_v32 = vpop.f32.mrf.mxu1  ;;  %v3909_v33 = vpop.f32.mrf.mxu0 }
 0x110   : > { %4355 = vst [vmem:[#allocation11_spill] sm:$0xff] %v3907_v32 }
 0x111   : > { %v3911_v34 = vpop.f32.mrf.mxu1  ;;  %v3913_v35 = vpop.f32.mrf.mxu0 }
 0x112   : > { %4356 = vst [vmem:[#allocation12_spill] sm:$0xff] %v3911_v34 }
 0x113   : > { %v3915_v36 = vpop.f32.mrf.mxu1  ;;  %v3917_v37 = vpop.f32.mrf.mxu0 }
 0x114   : > { %4357 = vst [vmem:[#allocation13_spill] sm:$0xff] %v3915_v36 }
 0x115   : > { %v3919_v38 = vpop.f32.mrf.mxu1  ;;  %v3921_v39 = vpop.f32.mrf.mxu0 }
 0x116   : > { %4358 = vst [vmem:[#allocation14_spill] sm:$0xff] %v3919_v38 }
 0x117   : > { %v3923_v40 = vpop.f32.mrf.mxu1  ;;  %v3925_v41 = vpop.f32.mrf.mxu0 }
 0x118   : > { %4359 = vst [vmem:[#allocation15_spill] sm:$0xff] %v3923_v40 }
 0x119   : > { %v3927_v42 = vpop.f32.mrf.mxu1  ;;  %v3929_v43 = vpop.f32.mrf.mxu0 }
 0x11a   : > { %4360 = vst [vmem:[#allocation16_spill] sm:$0xff] %v3927_v42 }
 0x11b   : > { %v3931_v44 = vpop.f32.mrf.mxu1  ;;  %v3933_v45 = vpop.f32.mrf.mxu0 }
 0x11c   : > { %4361 = vst [vmem:[#allocation17_spill] sm:$0xff] %v3931_v44 }
 0x11d   : > { %v3935_v46 = vpop.f32.mrf.mxu1  ;;  %v3937_v47 = vpop.f32.mrf.mxu0 }
 0x11e   : > { %4362 = vst [vmem:[#allocation18_spill] sm:$0xff] %v3935_v46 }
 0x11f   : > { %v3939_v48 = vpop.f32.mrf.mxu1  ;;  %v3941_v49 = vpop.f32.mrf.mxu0 }
 0x120   : > { %4363 = vst [vmem:[#allocation19_spill] sm:$0xff] %v3939_v48 }
 0x121   : > { %v3943_v50 = vpop.f32.mrf.mxu1  ;;  %v3945_v51 = vpop.f32.mrf.mxu0 }
 0x122   : > { %4364 = vst [vmem:[#allocation20_spill] sm:$0xff] %v3943_v50 }
 0x123   : > { %v3947_v52 = vpop.f32.mrf.mxu1  ;;  %v3949_v53 = vpop.f32.mrf.mxu0 }
 0x124   : > { %4365 = vst [vmem:[#allocation21_spill] sm:$0xff] %v3947_v52 }
 0x125   : > { %v3951_v54 = vpop.f32.mrf.mxu1  ;;  %v3953_v55 = vpop.f32.mrf.mxu0 }
 0x126   : > { %4366 = vst [vmem:[#allocation22_spill] sm:$0xff] %v3951_v54 }
 0x127   : > { %v3955_v56 = vpop.f32.mrf.mxu1  ;;  %v3957_v57 = vpop.f32.mrf.mxu0 }
 0x128   : > { %4367 = vst [vmem:[#allocation23_spill] sm:$0xff] %v3955_v56 }
 0x129   : > { %v3122_v58 = vpop.f32.mrf.mxu1  ;;  %v3959_v59 = vpop.f32.mrf.mxu0 }
 0x12b   : > { %v836_v60 = vpop.f32.mrf.mxu1  ;;  %v3961_v61 = vpop.f32.mrf.mxu0 }
 0x12d   : > { %v3123_v62 = vpop.f32.mrf.mxu1  ;;  %v3963_v63 = vpop.f32.mrf.mxu0 }
 0x12f   : > { %v3965_v0 = vpop.f32.mrf.mxu1  ;;  %v3967_v1 = vpop.f32.mrf.mxu0 }
 0x131   : > { %v3969_v2 = vpop.f32.mrf.mxu1  ;;  %v3971_v3 = vpop.f32.mrf.mxu0 }
 0x133   : > { %v3973_v4 = vpop.f32.mrf.mxu1  ;;  %v3975_v5 = vpop.f32.mrf.mxu0 }
 0x135   : > { %v3977_v6 = vpop.f32.mrf.mxu1  ;;  %v3979_v7 = vpop.f32.mrf.mxu0 }
 0x137   : > { %v3981_v8 = vpop.f32.mrf.mxu1  ;;  %v3983_v9 = vpop.f32.mrf.mxu0 }
 0x139   : > { %v3985_v10 = vpop.f32.mrf.mxu1  ;;  %v3987_v11 = vpop.f32.mrf.mxu0 }
 0x13b   : > { %v3989_v12 = vpop.f32.mrf.mxu1  ;;  %v3991_v13 = vpop.f32.mrf.mxu0 }
 0x13d   : > { %v3993_v14 = vpop.f32.mrf.mxu1  ;;  %v3995_v15 = vpop.f32.mrf.mxu0 }
 0x13f   : > { %v3997_v16 = vpop.f32.mrf.mxu1  ;;  %v3999_v17 = vpop.f32.mrf.mxu0 }
 0x141   : > { %v4001_v18 = vpop.f32.mrf.mxu1  ;;  %v4003_v19 = vpop.f32.mrf.mxu0 }
 0x143   : > { %v4005_v20 = vpop.f32.mrf.mxu1  ;;  %v4007_v21 = vpop.f32.mrf.mxu0 }
 0x145   : > { %v4009_v22 = vpop.f32.mrf.mxu1  ;;  %v4011_v23 = vpop.f32.mrf.mxu0 }
 0x147   : > { %v4013_v24 = vpop.f32.mrf.mxu1  ;;  %v4015_v25 = vpop.f32.mrf.mxu0 }
 0x149   : > { %v4017_v56 = vpop.f32.mrf.mxu1  ;;  %v4019_v54 = vpop.f32.mrf.mxu0 }
 0x14a   : > { %4368 = vst [vmem:[#allocation24_spill] sm:$0xff] %v4019_v54 }
 0x14b   : > { %v4021_v52 = vpop.f32.mrf.mxu1  ;;  %v4023_v50 = vpop.f32.mrf.mxu0 }
 0x14c   : > { %4369 = vst [vmem:[#allocation25_spill] sm:$0xff] %v4023_v50 }
 0x14d   : > { %v4025_v48 = vpop.f32.mrf.mxu1  ;;  %v4027_v46 = vpop.f32.mrf.mxu0 }
 0x14e   : > { %4370 = vst [vmem:[#allocation26_spill] sm:$0xff] %v4025_v48  ;;  %4371 = vst [vmem:[#allocation27_spill] sm:$0xff] %v4027_v46 }
 0x14f   : > { %v4029_v44 = vpop.f32.mrf.mxu1  ;;  %v4031_v42 = vpop.f32.mrf.mxu0 }
 0x150   : > { %4372 = vst [vmem:[#allocation28_spill] sm:$0xff] %v4029_v44  ;;  %4373 = vst [vmem:[#allocation29_spill] sm:$0xff] %v4031_v42 }
 0x151   : > { %v4033_v40 = vpop.f32.mrf.mxu1  ;;  %v4035_v38 = vpop.f32.mrf.mxu0 }
 0x152   : > { %4374 = vst [vmem:[#allocation30_spill] sm:$0xff] %v4033_v40  ;;  %4375 = vst [vmem:[#allocation31_spill] sm:$0xff] %v4035_v38 }
 0x153   : > { %v4037_v36 = vpop.f32.mrf.mxu1  ;;  %v4039_v34 = vpop.f32.mrf.mxu0 }
 0x154   : > { %4376 = vst [vmem:[#allocation32_spill] sm:$0xff] %v4037_v36  ;;  %4377 = vst [vmem:[#allocation33_spill] sm:$0xff] %v4039_v34 }
 0x155   : > { %v4041_v32 = vpop.f32.mrf.mxu1  ;;  %v4043_v54 = vpop.f32.mrf.mxu0 }
 0x156   : > { %4378 = vst [vmem:[#allocation34_spill] sm:$0xff] %v4041_v32  ;;  %4379 = vst [vmem:[#allocation35_spill] sm:$0xff] %v4043_v54 }
 0x157   : > { %v4045_v50 = vpop.f32.mrf.mxu1  ;;  %v4047_v48 = vpop.f32.mrf.mxu0 }
 0x158   : > { %4380 = vst [vmem:[#allocation36_spill] sm:$0xff] %v4045_v50  ;;  %4381 = vst [vmem:[#allocation37_spill] sm:$0xff] %v4047_v48 }
 0x159   : > { %v4049_v46 = vpop.f32.mrf.mxu1  ;;  %v4051_v44 = vpop.f32.mrf.mxu0 }
 0x15a   : > { %4382 = vst [vmem:[#allocation38_spill] sm:$0xff] %v4049_v46  ;;  %4383 = vst [vmem:[#allocation39_spill] sm:$0xff] %v4051_v44  ;;  %v997_v44 = vadd.f32 %v3122_v58, %v3897_v27  ;;  %v996_v27 = vadd.f32 %v3965_v0, %v3909_v33  ;;  %v999_v33 = vadd.f32 %v3973_v4, %v3917_v37 }
 0x15b   : > { %v4053_v42 = vpop.f32.mrf.mxu1  ;;  %v4055_v40 = vpop.f32.mrf.mxu0 }
 0x15c   : > { %4384 = vst [vmem:[#allocation40_spill] sm:$0xff] %v4053_v42  ;;  %4385 = vst [vmem:[#allocation41_spill] sm:$0xff] %v4055_v40 }
 0x15d   : > { %v4057_v38 = vpop.f32.mrf.mxu1  ;;  %v4059_v36 = vpop.f32.mrf.mxu0 }
 0x15e   : > { %4386 = vst [vmem:[#allocation42_spill] sm:$0xff] %v4057_v38  ;;  %4387 = vst [vmem:[#allocation43_spill] sm:$0xff] %v4059_v36  ;;  %v995_v36 = vadd.f32 %v836_v60, %v3901_v29  ;;  %v1001_v29 = vadd.f32 %v3969_v2, %v3913_v35 }
 0x15f   : > { %v4061_v34 = vpop.f32.mrf.mxu1  ;;  %v4063_v32 = vpop.f32.mrf.mxu0 }
 0x160   : > { %4388 = vst [vmem:[#allocation44_spill] sm:$0xff] %v4061_v34  ;;  %4389 = vst [vmem:[#allocation45_spill] sm:$0xff] %v4063_v32  ;;  %v998_v32 = vadd.f32 %v3123_v62, %v3905_v31  ;;  %v1433_v58 = vadd.f32 %v3961_v61, %v995_v36  ;;  %v4101_v36 = vld [vmem:[%s4341_s3] ss:$0 sm:$0xff] }
 0x161   : > { %v4065_v54 = vpop.f32.mrf.mxu1  ;;  %v4067_v50 = vpop.f32.mrf.mxu0 }
 0x162   : > { %4390 = vst [vmem:[#allocation46_spill] sm:$0xff] %v4065_v54  ;;  %4391 = vst [vmem:[#allocation47_spill] sm:$0xff] %v4067_v50  ;;  %v1435_v50 = vadd.f32 %v3959_v59, %v997_v44  ;;  %v1436_v44 = vadd.f32 %v3963_v63, %v998_v32  ;;  %v1002_v32 = vadd.f32 %v3977_v6, %v3921_v39 }
 0x163   : > { %v4069_v48 = vpop.f32.mrf.mxu1  ;;  %v4071_v46 = vpop.f32.mrf.mxu0 }
 0x164   : > { %4392 = vst [vmem:[#allocation48_spill] sm:$0xff] %v4069_v48  ;;  %4393 = vst [vmem:[#allocation49_spill] sm:$0xff] %v4071_v46 }
 0x165   : > { %v4074_v42 = vpop.f32.mrf.mxu1  ;;  %v4076_v40 = vpop.f32.mrf.mxu0 }
 0x167   : > { %v4079_v38 = vpop.f32.mrf.mxu1  ;;  %v4081_v34 = vpop.f32.mrf.mxu0 }
 0x168   : > { %4394 = vst [vmem:[#allocation50_spill] sm:$0xff] %v4081_v34  ;;  %v4093_v34 = vld [vmem:[%s4340_s2] ss:$0 sm:$0xff] }
 0x169   : > { %v3194_v54 = vpop.f32.mrf.mxu1  ;;  %v3230_v48 = vpop.f32.mrf.mxu0 }
 0x16a   : > { %v1873_v46 = vadd.f32 %v3194_v54, %v1435_v50  ;;  %v1434_v50 = vadd.f32 %v3967_v1, %v996_v27  ;;  %v1000_v1 = vadd.f32 %v3981_v8, %v3925_v41  ;;  %v1437_v27 = vadd.f32 %v3975_v5, %v999_v33 }
 0x16b   : > { %v1712_v60 = vpop.f32.mrf.mxu1  ;;  %v2150_v31 = vpop.f32.mrf.mxu0 }
 0x16c   : > { %v1871_v59 = vadd.f32 %v1712_v60, %v1433_v58  ;;  %v2311_v62 = vadd.f32 %v3230_v48, %v1873_v46  ;;  %v1439_v46 = vadd.f32 %v3971_v3, %v1001_v29  ;;  %v1005_v29 = vadd.f32 %v3985_v10, %v3929_v43 }
 0x16d   : > { %v3195_v0 = vpop.f32.mrf.mxu1  ;;  %v3231_v35 = vpop.f32.mrf.mxu0  ;;  %v1438_v43 = vadd.f32 %v3983_v9, %v1000_v1 }
 0x16e   : > { %v1874_v54 = vadd.f32 %v3195_v0, %v1436_v44  ;;  %v2414_v61 = vmul.f32 %v4093_v34, %v2311_v62  ;;  %v2309_v2 = vadd.f32 %v2150_v31, %v1871_v59  ;;  %v1440_v62 = vadd.f32 %v3979_v7, %v1002_v32 }
 0x16f   : > { %v1715_v37 = vpop.f32.mrf.mxu1  ;;  %v2153_v48 = vpop.f32.mrf.mxu0 }
 0x170   : > { %v2453_v63 = vadd.f32 %v4101_v36, %v2414_v61  ;;  %v1872_v4 = vadd.f32 %v1715_v37, %v1434_v50  ;;  %v2412_v58 = vmul.f32 %v4093_v34, %v2309_v2  ;;  %v2312_v60 = vadd.f32 %v3231_v35, %v1874_v54 }
 0x171   : > { %v3198_v44 = vpop.f32.mrf.mxu1  ;;  %v3234_v31 = vpop.f32.mrf.mxu0  ;;  %v1003_v54 = vadd.f32 %v3989_v12, %v3933_v45 }
 0x172   : > { %v2485_v59 = vmax.f32 %v2453_v63, 0.0  ;;  %v2451_v39 = vadd.f32 %v4101_v36, %v2412_v58  ;;  %v1877_v6 = vadd.f32 %v3198_v44, %v1439_v46  ;;  %v2415_v3 = vmul.f32 %v4093_v34, %v2312_v60 }
 0x173   : > { %v1728_v0 = vpop.f32.mrf.mxu1  ;;  %v2310_v35 = vadd.f32 %v2153_v48, %v1872_v4  ;;  %v2166_v50 = vpop.f32.mrf.mxu0  ;;  %v1006_v48 = vadd.f32 %v3993_v14, %v3937_v47  ;;  %v1443_v63 = vadd.f32 %v3987_v11, %v1005_v29  ;;  %v1441_v47 = vadd.f32 %v3991_v13, %v1003_v54 }
 0x174   : > { %2517 = vst [vmem:[%s4119_s30 + $0x10] sm:$0xff] %v2485_v59  ;;  %v2483_v41 = vmax.f32 %v2451_v39, 0.0  ;;  %v2454_v5 = vadd.f32 %v4101_v36, %v2415_v3  ;;  %v1875_v8 = vadd.f32 %v1728_v0, %v1437_v27  ;;  %v2315_v33 = vadd.f32 %v3234_v31, %v1877_v6 }
 0x175   : > { %v2413_v7 = vmul.f32 %v4093_v34, %v2310_v35  ;;  %v3199_v10 = vpop.f32.mrf.mxu1  ;;  %v3235_v61 = vpop.f32.mrf.mxu0  ;;  %v1004_v27 = vadd.f32 %v3997_v16, %v3941_v49  ;;  %v1009_v3 = vadd.f32 %v4001_v18, %v3945_v51  ;;  %v1444_v29 = vadd.f32 %v3995_v15, %v1006_v48 }
 0x176   : > { %2515 = vst [vmem:[%s4119_s30] sm:$0xff] %v2483_v41  ;;  %v2486_v2 = vmax.f32 %v2454_v5, 0.0  ;;  %v1878_v32 = vadd.f32 %v3199_v10, %v1440_v62  ;;  %v2418_v46 = vmul.f32 %v4093_v34, %v2315_v33  ;;  %v2313_v37 = vadd.f32 %v2166_v50, %v1875_v8 }
 0x177   : > { %v2452_v4 = vadd.f32 %v4101_v36, %v2413_v7  ;;  %v1731_v45 = vpop.f32.mrf.mxu1  ;;  %v2169_v12 = vpop.f32.mrf.mxu0  ;;  %v1007_v41 = vadd.f32 %v4005_v20, %v3949_v53  ;;  %v1442_v5 = vadd.f32 %v3999_v17, %v1004_v27  ;;  %v1010_v7 = vadd.f32 %v4009_v22, %v3953_v55 }
 0x178   : > { %2518 = vst [vmem:[%s4119_s30 + $0x18] sm:$0xff] %v2486_v2  ;;  %v2457_v9 = vadd.f32 %v4101_v36, %v2418_v46  ;;  %v1876_v58 = vadd.f32 %v1731_v45, %v1438_v43  ;;  %v2416_v60 = vmul.f32 %v4093_v34, %v2313_v37  ;;  %v2316_v1 = vadd.f32 %v3235_v61, %v1878_v32 }
 0x179   : > { %v2484_v14 = vmax.f32 %v2452_v4, 0.0  ;;  %v3202_v11 = vpop.f32.mrf.mxu1  ;;  %v3238_v44 = vpop.f32.mrf.mxu0  ;;  %v1447_v10 = vadd.f32 %v4003_v19, %v1009_v3  ;;  %v1008_v37 = vadd.f32 %v4013_v24, %v3957_v57  ;;  %v1445_v55 = vadd.f32 %v4007_v21, %v1007_v41 }
 0x17a   : > { %v2489_v31 = vmax.f32 %v2457_v9, 0.0  ;;  %v2455_v59 = vadd.f32 %v4101_v36, %v2416_v60  ;;  %v1881_v39 = vadd.f32 %v3202_v11, %v1443_v63  ;;  %v2419_v6 = vmul.f32 %v4093_v34, %v2316_v1 }
 0x17b   : > { %2516 = vst [vmem:[%s4119_s30 + $0x8] sm:$0xff] %v2484_v14  ;;  %v1744_v62 = vpop.f32.mrf.mxu1  ;;  %v2314_v49 = vadd.f32 %v2169_v12, %v1876_v58  ;;  %v2182_v16 = vpop.f32.mrf.mxu0  ;;  %v1013_v9 = vadd.f32 %v4017_v56, %v3895_v26  ;;  %v1448_v58 = vadd.f32 %v4011_v23, %v1010_v7  ;;  %v1011_v14 = vadd.f32 %v4021_v52, %v3899_v28  ;;  %v4400_v7 = vld [vmem:[#allocation12_spill] sm:$0xff] }
 0x17c   : > { %2521 = vst [vmem:[%s4119_s30 + $0x30] sm:$0xff] %v2489_v31  ;;  %v2487_v13 = vmax.f32 %v2455_v59, 0.0  ;;  %v2458_v0 = vadd.f32 %v4101_v36, %v2419_v6  ;;  %v1879_v35 = vadd.f32 %v1744_v62, %v1441_v47  ;;  %v2319_v50 = vadd.f32 %v3238_v44, %v1881_v39  ;;  %v4395_v6 = vld [vmem:[#allocation26_spill] sm:$0xff] }
 0x17d   : > { %v2417_v51 = vmul.f32 %v4093_v34, %v2314_v49  ;;  %v3203_v18 = vpop.f32.mrf.mxu1  ;;  %v3239_v15 = vpop.f32.mrf.mxu0  ;;  %v1446_v11 = vadd.f32 %v4015_v25, %v1008_v37  ;;  %v1014_v3 = vadd.f32 %v4395_v6, %v3903_v30  ;;  %v4409_v6 = vld [vmem:[#allocation15_spill] sm:$0xff] }
 0x17e   : > { %2519 = vst [vmem:[%s4119_s30 + $0x20] sm:$0xff] %v2487_v13  ;;  %v2490_v8 = vmax.f32 %v2458_v0, 0.0  ;;  %v1882_v33 = vadd.f32 %v3203_v18, %v1444_v29  ;;  %v2422_v54 = vmul.f32 %v4093_v34, %v2319_v50  ;;  %v2317_v43 = vadd.f32 %v2182_v16, %v1879_v35  ;;  %v4396_v29 = vld [vmem:[#allocation24_spill] sm:$0xff]  ;;  %v4397_v35 = vld [vmem:[#allocation11_spill] sm:$0xff] }
 0x17f   : > { %v2456_v61 = vadd.f32 %v4101_v36, %v2417_v51  ;;  %v1747_v53 = vpop.f32.mrf.mxu1  ;;  %v2185_v20 = vpop.f32.mrf.mxu0  ;;  %v1451_v62 = vadd.f32 %v4396_v29, %v1013_v9  ;;  %v4398_v50 = vld [vmem:[#allocation28_spill] sm:$0xff] }
 0x180   : > { %2522 = vst [vmem:[%s4119_s30 + $0x38] sm:$0xff] %v2490_v8  ;;  %v2461_v17 = vadd.f32 %v4101_v36, %v2422_v54  ;;  %v1880_v2 = vadd.f32 %v1747_v53, %v1442_v5  ;;  %v2420_v32 = vmul.f32 %v4093_v34, %v2317_v43  ;;  %v2320_v46 = vadd.f32 %v3239_v15, %v1882_v33  ;;  %v4399_v5 = vld [vmem:[#allocation25_spill] sm:$0xff]  ;;  %v4402_v53 = vld [vmem:[#allocation27_spill] sm:$0xff] }
 0x181   : > { %v2488_v22 = vmax.f32 %v2456_v61, 0.0  ;;  %v3206_v19 = vpop.f32.mrf.mxu1  ;;  %v3242_v48 = vpop.f32.mrf.mxu0  ;;  %v1012_v41 = vadd.f32 %v4398_v50, %v4397_v35  ;;  %v1449_v30 = vadd.f32 %v4399_v5, %v1011_v14  ;;  %v4408_v14 = vld [vmem:[#allocation31_spill] sm:$0xff]  ;;  %v4412_v50 = vld [vmem:[#allocation16_spill] sm:$0xff] }
 0x182   : > { %v2493_v63 = vmax.f32 %v2461_v17, 0.0  ;;  %v2459_v4 = vadd.f32 %v4101_v36, %v2420_v32  ;;  %v1885_v45 = vadd.f32 %v3206_v19, %v1447_v10  ;;  %v2423_v12 = vmul.f32 %v4093_v34, %v2320_v46  ;;  %v4401_v10 = vld [vmem:[#allocation30_spill] sm:$0xff]  ;;  %v4403_v19 = vld [vmem:[#allocation13_spill] sm:$0xff] }
 0x183   : > { %2520 = vst [vmem:[%s4119_s30 + $0x28] sm:$0xff] %v2488_v22  ;;  %v1760_v60 = vpop.f32.mrf.mxu1  ;;  %v2318_v57 = vadd.f32 %v2185_v20, %v1880_v2  ;;  %v2198_v24 = vpop.f32.mrf.mxu0  ;;  %v1017_v61 = vadd.f32 %v4401_v10, %v4400_v7  ;;  %v1452_v20 = vadd.f32 %v4402_v53, %v1014_v3  ;;  %v4410_v3 = vld [vmem:[#allocation36_spill] sm:$0xff]  ;;  %v4415_v10 = vld [vmem:[#allocation17_spill] sm:$0xff] }
 0x184   : > { %2525 = vst [vmem:[%s4119_s30 + $0x50] sm:$0xff] %v2493_v63  ;;  %v2491_v21 = vmax.f32 %v2459_v4, 0.0  ;;  %v2462_v1 = vadd.f32 %v4101_v36, %v2423_v12  ;;  %v1883_v27 = vadd.f32 %v1760_v60, %v1445_v55  ;;  %v2323_v47 = vadd.f32 %v3242_v48, %v1885_v45  ;;  %v4404_v48 = vld [vmem:[#allocation32_spill] sm:$0xff]  ;;  %v4405_v4 = vld [vmem:[#allocation29_spill] sm:$0xff] }
 0x185   : > { %v2421_v26 = vmul.f32 %v4093_v34, %v2318_v57  ;;  %v3207_v56 = vpop.f32.mrf.mxu1  ;;  %v3243_v23 = vpop.f32.mrf.mxu0  ;;  %v1015_v63 = vadd.f32 %v4404_v48, %v4403_v19  ;;  %v1450_v45 = vadd.f32 %v4405_v4, %v1012_v41  ;;  %v1016_v29 = vadd.f32 %v4410_v3, %v4409_v6  ;;  %v4413_v41 = vld [vmem:[#allocation38_spill] sm:$0xff]  ;;  %v4424_v3 = vld [vmem:[#allocation20_spill] sm:$0xff] }
 0x186   : > { %2523 = vst [vmem:[%s4119_s30 + $0x40] sm:$0xff] %v2491_v21  ;;  %v2494_v44 = vmax.f32 %v2462_v1, 0.0  ;;  %v1886_v31 = vadd.f32 %v3207_v56, %v1448_v58  ;;  %v2426_v59 = vmul.f32 %v4093_v34, %v2323_v47  ;;  %v2321_v39 = vadd.f32 %v2198_v24, %v1883_v27  ;;  %v4406_v1 = vld [vmem:[#allocation14_spill] sm:$0xff] }
 0x187   : > { %v2460_v49 = vadd.f32 %v4101_v36, %v2421_v26  ;;  %v1763_v28 = vpop.f32.mrf.mxu1  ;;  %v2201_v52 = vpop.f32.mrf.mxu0  ;;  %v4407_v27 = vld [vmem:[#allocation34_spill] sm:$0xff]  ;;  %v1021_v5 = vadd.f32 %v4413_v41, %v4412_v50  ;;  %v4427_v41 = vld [vmem:[#allocation21_spill] sm:$0xff] }
 0x188   : > { %2526 = vst [vmem:[%s4119_s30 + $0x58] sm:$0xff] %v2494_v44  ;;  %v2465_v25 = vadd.f32 %v4101_v36, %v2426_v59  ;;  %v1884_v16 = vadd.f32 %v1763_v28, %v1446_v11  ;;  %v2424_v13 = vmul.f32 %v4093_v34, %v2321_v39  ;;  %v2324_v0 = vadd.f32 %v3243_v23, %v1886_v31  ;;  %v4418_v48 = vld [vmem:[#allocation18_spill] sm:$0xff] }
 0x189   : > { %v2492_v51 = vmax.f32 %v2460_v49, 0.0  ;;  %v3210_v18 = vpop.f32.mrf.mxu1  ;;  %v3246_v15 = vpop.f32.mrf.mxu0  ;;  %v1018_v47 = vadd.f32 %v4407_v27, %v4406_v1  ;;  %v1455_v11 = vadd.f32 %v4408_v14, %v1017_v61  ;;  %v4416_v61 = vld [vmem:[#allocation40_spill] sm:$0xff]  ;;  %v4421_v27 = vld [vmem:[#allocation19_spill] sm:$0xff] }
 0x18a   : > { %v2497_v8 = vmax.f32 %v2465_v25, 0.0  ;;  %v2463_v33 = vadd.f32 %v4101_v36, %v2424_v13  ;;  %v1889_v54 = vadd.f32 %v3210_v18, %v1451_v62  ;;  %v2427_v43 = vmul.f32 %v4093_v34, %v2324_v0  ;;  %v4411_v62 = vld [vmem:[#allocation33_spill] sm:$0xff] }
 0x18b   : > { %2524 = vst [vmem:[%s4119_s30 + $0x48] sm:$0xff] %v2492_v51  ;;  %v1776_v17 = vpop.f32.mrf.mxu1  ;;  %v2322_v2 = vadd.f32 %v2201_v52, %v1884_v16  ;;  %v2214_v32 = vpop.f32.mrf.mxu0  ;;  %v1453_v49 = vadd.f32 %v4411_v62, %v1015_v63  ;;  %v1019_v53 = vadd.f32 %v4416_v61, %v4415_v10  ;;  %v4419_v63 = vld [vmem:[#allocation42_spill] sm:$0xff] }
 0x18c   : > { %2529 = vst [vmem:[%s4119_s30 + $0x70] sm:$0xff] %v2497_v8  ;;  %v2495_v46 = vmax.f32 %v2463_v33, 0.0  ;;  %v2466_v37 = vadd.f32 %v4101_v36, %v2427_v43  ;;  %v1887_v55 = vadd.f32 %v1776_v17, %v1449_v30  ;;  %v2327_v22 = vadd.f32 %v3246_v15, %v1889_v54  ;;  %v4414_v30 = vld [vmem:[#allocation35_spill] sm:$0xff]  ;;  %v4430_v61 = vld [vmem:[#allocation22_spill] sm:$0xff] }
 0x18d   : > { %v2425_v12 = vmul.f32 %v4093_v34, %v2322_v2  ;;  %v3211_v9 = vpop.f32.mrf.mxu1  ;;  %v3247_v58 = vpop.f32.mrf.mxu0  ;;  %v1456_v51 = vadd.f32 %v4414_v30, %v1018_v47  ;;  %v1022_v4 = vadd.f32 %v4419_v63, %v4418_v48  ;;  %v4422_v47 = vld [vmem:[#allocation44_spill] sm:$0xff]  ;;  %v4432_v48 = vld [vmem:[#allocation23_spill] sm:$0xff] }
 0x18e   : > { %2527 = vst [vmem:[%s4119_s30 + $0x60] sm:$0xff] %v2495_v46  ;;  %v2498_v60 = vmax.f32 %v2466_v37, 0.0  ;;  %v1890_v57 = vadd.f32 %v3211_v9, %v1452_v20  ;;  %v2430_v24 = vmul.f32 %v4093_v34, %v2327_v22  ;;  %v2325_v21 = vadd.f32 %v2214_v32, %v1887_v55  ;;  %v4417_v20 = vld [vmem:[#allocation37_spill] sm:$0xff] }
 0x18f   : > { %v2464_v26 = vadd.f32 %v4101_v36, %v2425_v12  ;;  %v1779_v56 = vpop.f32.mrf.mxu1  ;;  %v2217_v23 = vpop.f32.mrf.mxu0  ;;  %v1454_v17 = vadd.f32 %v4417_v20, %v1016_v29  ;;  %v1020_v14 = vadd.f32 %v4422_v47, %v4421_v27  ;;  %v4425_v29 = vld [vmem:[#allocation46_spill] sm:$0xff]  ;;  %v4431_v20 = vld [vmem:[#allocation47_spill] sm:$0xff]  ;;  %v1024_v63 = vadd.f32 %v4079_v38, %v4432_v48 }
 0x190   : > { %2530 = vst [vmem:[%s4119_s30 + $0x78] sm:$0xff] %v2498_v60  ;;  %v2469_v44 = vadd.f32 %v4101_v36, %v2430_v24  ;;  %v1888_v31 = vadd.f32 %v1779_v56, %v1450_v45  ;;  %v2428_v59 = vmul.f32 %v4093_v34, %v2325_v21  ;;  %v2328_v39 = vadd.f32 %v3247_v58, %v1890_v57  ;;  %v4420_v45 = vld [vmem:[#allocation39_spill] sm:$0xff] }
 0x191   : > { %v2496_v28 = vmax.f32 %v2464_v26, 0.0  ;;  %v3214_v52 = vpop.f32.mrf.mxu1  ;;  %v3250_v25 = vpop.f32.mrf.mxu0  ;;  %v1459_v12 = vadd.f32 %v4420_v45, %v1021_v5  ;;  %v1025_v62 = vadd.f32 %v4425_v29, %v4424_v3  ;;  %v4428_v5 = vld [vmem:[#allocation48_spill] sm:$0xff] }
 0x192   : > { %v2501_v16 = vmax.f32 %v2469_v44, 0.0  ;;  %v2467_v13 = vadd.f32 %v4101_v36, %v2428_v59  ;;  %v1893_v0 = vadd.f32 %v3214_v52, %v1455_v11  ;;  %v2431_v35 = vmul.f32 %v4093_v34, %v2328_v39  ;;  %v4423_v11 = vld [vmem:[#allocation41_spill] sm:$0xff] }
 0x193   : > { %2528 = vst [vmem:[%s4119_s30 + $0x68] sm:$0xff] %v2496_v28  ;;  %v1792_v18 = vpop.f32.mrf.mxu1  ;;  %v2326_v15 = vadd.f32 %v2217_v23, %v1888_v31  ;;  %v2230_v8 = vpop.f32.mrf.mxu0  ;;  %v1457_v26 = vadd.f32 %v4423_v11, %v1019_v53  ;;  %v1023_v30 = vadd.f32 %v4428_v5, %v4427_v41  ;;  %v1026_v53 = vadd.f32 %v4074_v42, %v4430_v61 }
 0x194   : > { %2533 = vst [vmem:[%s4119_s30 + $0x90] sm:$0xff] %v2501_v16  ;;  %v2499_v33 = vmax.f32 %v2467_v13, 0.0  ;;  %v2470_v54 = vadd.f32 %v4101_v36, %v2431_v35  ;;  %v1891_v43 = vadd.f32 %v1792_v18, %v1453_v49  ;;  %v2331_v7 = vadd.f32 %v3250_v25, %v1893_v0  ;;  %v4426_v49 = vld [vmem:[#allocation43_spill] sm:$0xff] }
 0x195   : > { %v2429_v2 = vmul.f32 %v4093_v34, %v2326_v15  ;;  %v3215_v32 = vpop.f32.mrf.mxu1  ;;  %v3251_v46 = vpop.f32.mrf.mxu0  ;;  %v1460_v28 = vadd.f32 %v4426_v49, %v1022_v4  ;;  %v4433_v4 = vld [vmem:[#allocation49_spill] sm:$0xff] }
 0x196   : > { %2531 = vst [vmem:[%s4119_s30 + $0x80] sm:$0xff] %v2499_v33  ;;  %v2502_v37 = vmax.f32 %v2470_v54, 0.0  ;;  %v1894_v55 = vadd.f32 %v3215_v32, %v1456_v51  ;;  %v2434_v22 = vmul.f32 %v4093_v34, %v2331_v7  ;;  %v2329_v19 = vadd.f32 %v2230_v8, %v1891_v43  ;;  %v4429_v51 = vld [vmem:[#allocation45_spill] sm:$0xff] }
 0x197   : > { %v2468_v9 = vadd.f32 %v4101_v36, %v2429_v2  ;;  %v1795_v58 = vpop.f32.mrf.mxu1  ;;  %v2233_v60 = vpop.f32.mrf.mxu0  ;;  %v1458_v18 = vadd.f32 %v4429_v51, %v1020_v14  ;;  %v1461_v42 = vadd.f32 %v4433_v4, %v1023_v30 }
 0x198   : > { %2534 = vst [vmem:[%s4119_s30 + $0x98] sm:$0xff] %v2502_v37  ;;  %v2473_v57 = vadd.f32 %v4101_v36, %v2434_v22  ;;  %v1892_v24 = vadd.f32 %v1795_v58, %v1454_v17  ;;  %v2432_v21 = vmul.f32 %v4093_v34, %v2329_v19  ;;  %v2332_v1 = vadd.f32 %v3251_v46, %v1894_v55 }
 0x199   : > { %v2500_v56 = vmax.f32 %v2468_v9, 0.0  ;;  %v3218_v23 = vpop.f32.mrf.mxu1  ;;  %v3254_v44 = vpop.f32.mrf.mxu0  ;;  %v1463_v17 = vadd.f32 %v4431_v20, %v1025_v62 }
 0x19a   : > { %v2505_v31 = vmax.f32 %v2473_v57, 0.0  ;;  %v2471_v59 = vadd.f32 %v4101_v36, %v2432_v21  ;;  %v1897_v39 = vadd.f32 %v3218_v23, %v1459_v12  ;;  %v2435_v6 = vmul.f32 %v4093_v34, %v2332_v1 }
 0x19b   : > { %2532 = vst [vmem:[%s4119_s30 + $0x88] sm:$0xff] %v2500_v56  ;;  %v1808_v52 = vpop.f32.mrf.mxu1  ;;  %v2330_v25 = vadd.f32 %v2233_v60, %v1892_v24  ;;  %v2246_v16 = vpop.f32.mrf.mxu0  ;;  %v1464_v21 = vadd.f32 %v4076_v40, %v1026_v53  ;;  %v4434_v56 = vld [vmem:[#allocation50_spill] sm:$0xff] }
 0x19c   : > { %2537 = vst [vmem:[%s4119_s30 + $0xb0] sm:$0xff] %v2505_v31  ;;  %v2503_v13 = vmax.f32 %v2471_v59, 0.0  ;;  %v2474_v0 = vadd.f32 %v4101_v36, %v2435_v6  ;;  %v1895_v35 = vadd.f32 %v1808_v52, %v1457_v26  ;;  %v2335_v50 = vadd.f32 %v3254_v44, %v1897_v39 }
 0x19d   : > { %v2433_v15 = vmul.f32 %v4093_v34, %v2330_v25  ;;  %v3219_v8 = vpop.f32.mrf.mxu1  ;;  %v3255_v33 = vpop.f32.mrf.mxu0  ;;  %v1462_v23 = vadd.f32 %v4434_v56, %v1024_v63 }
 0x19e   : > { %2535 = vst [vmem:[%s4119_s30 + $0xa0] sm:$0xff] %v2503_v13  ;;  %v2506_v54 = vmax.f32 %v2474_v0, 0.0  ;;  %v1898_v43 = vadd.f32 %v3219_v8, %v1460_v28  ;;  %v2438_v7 = vmul.f32 %v4093_v34, %v2335_v50  ;;  %v2333_v10 = vadd.f32 %v2246_v16, %v1895_v35 }
 0x19f   : > { %v2472_v2 = vadd.f32 %v4101_v36, %v2433_v15  ;;  %v1811_v32 = vpop.f32.mrf.mxu1  ;;  %v2249_v46 = vpop.f32.mrf.mxu0 }
 0x1a0   : > { %2538 = vst [vmem:[%s4119_s30 + $0xb8] sm:$0xff] %v2506_v54  ;;  %v2477_v37 = vadd.f32 %v4101_v36, %v2438_v7  ;;  %v1896_v55 = vadd.f32 %v1811_v32, %v1458_v18  ;;  %v2436_v22 = vmul.f32 %v4093_v34, %v2333_v10  ;;  %v2336_v19 = vadd.f32 %v3255_v33, %v1898_v43 }
 0x1a1   : > { %v2504_v45 = vmax.f32 %v2472_v2, 0.0  ;;  %v3222_v12 = vpop.f32.mrf.mxu1  ;;  %v3258_v9 = vpop.f32.mrf.mxu0 }
 0x1a2   : > { %v2509_v58 = vmax.f32 %v2477_v37, 0.0  ;;  %v2475_v60 = vadd.f32 %v4101_v36, %v2436_v22  ;;  %v1901_v57 = vadd.f32 %v3222_v12, %v1463_v17  ;;  %v2439_v24 = vmul.f32 %v4093_v34, %v2336_v19 }
 0x1a3   : > { %2536 = vst [vmem:[%s4119_s30 + $0xa8] sm:$0xff] %v2504_v45  ;;  %v1824_v1 = vpop.f32.mrf.mxu1  ;;  %v2334_v27 = vadd.f32 %v2249_v46, %v1896_v55  ;;  %v2262_v47 = vpop.f32.mrf.mxu0 }
 0x1a4   : > { %2541 = vst [vmem:[%s4119_s30 + $0xd0] sm:$0xff] %v2509_v58  ;;  %v2507_v38 = vmax.f32 %v2475_v60, 0.0  ;;  %v2478_v14 = vadd.f32 %v4101_v36, %v2439_v24  ;;  %v1899_v11 = vadd.f32 %v1824_v1, %v1461_v42  ;;  %v2339_v26 = vadd.f32 %v3258_v9, %v1901_v57 }
 0x1a5   : > { %v2437_v44 = vmul.f32 %v4093_v34, %v2334_v27  ;;  %v3223_v31 = vpop.f32.mrf.mxu1  ;;  %v3259_v59 = vpop.f32.mrf.mxu0 }
 0x1a6   : > { %2539 = vst [vmem:[%s4119_s30 + $0xc0] sm:$0xff] %v2507_v38  ;;  %v2510_v39 = vmax.f32 %v2478_v14, 0.0  ;;  %v1902_v40 = vadd.f32 %v3223_v31, %v1464_v21  ;;  %v2442_v6 = vmul.f32 %v4093_v34, %v2339_v26  ;;  %v2337_v3 = vadd.f32 %v2262_v47, %v1899_v11 }
 0x1a7   : > { %v2476_v29 = vadd.f32 %v4101_v36, %v2437_v44  ;;  %v1827_v62 = vpop.f32.mrf.mxu1  ;;  %v2265_v13 = vpop.f32.mrf.mxu0 }
 0x1a8   : > { %2542 = vst [vmem:[%s4119_s30 + $0xd8] sm:$0xff] %v2510_v39  ;;  %v2481_v49 = vadd.f32 %v4101_v36, %v2442_v6  ;;  %v1900_v28 = vadd.f32 %v1827_v62, %v1462_v23  ;;  %v2440_v52 = vmul.f32 %v4093_v34, %v2337_v3  ;;  %v2340_v25 = vadd.f32 %v3259_v59, %v1902_v40 }
 0x1a9   : > { %v2508_v16 = vmax.f32 %v2476_v29, 0.0 }
 0x1aa   : > { %v2513_v0 = vmax.f32 %v2481_v49, 0.0  ;;  %v2479_v35 = vadd.f32 %v4101_v36, %v2440_v52  ;;  %v2443_v50 = vmul.f32 %v4093_v34, %v2340_v25  ;;  %v2338_v41 = vadd.f32 %v2265_v13, %v1900_v28 }
 0x1ab   : > { %2540 = vst [vmem:[%s4119_s30 + $0xc8] sm:$0xff] %v2508_v16 }
 0x1ac   : > { %2545 = vst [vmem:[%s4119_s30 + $0xf0] sm:$0xff] %v2513_v0  ;;  %v2511_v5 = vmax.f32 %v2479_v35, 0.0  ;;  %v2482_v30 = vadd.f32 %v4101_v36, %v2443_v50  ;;  %v2441_v51 = vmul.f32 %v4093_v34, %v2338_v41 }
 0x1ae   : > { %2543 = vst [vmem:[%s4119_s30 + $0xe0] sm:$0xff] %v2511_v5  ;;  %v2514_v18 = vmax.f32 %v2482_v30, 0.0  ;;  %v2480_v15 = vadd.f32 %v4101_v36, %v2441_v51 }
 0x1b0   : > { %2546 = vst [vmem:[%s4119_s30 + $0xf8] sm:$0xff] %v2514_v18  ;;  %v2512_v8 = vmax.f32 %v2480_v15, 0.0 }
 0x1b2   : > { %2544 = vst [vmem:[%s4119_s30 + $0xe8] sm:$0xff] %v2512_v8 }
 0x1b3   : > { %3501 = shalt.err (!%p3498_p4)
}
 0x1b4   : > { %s3502_s23 = scalar_lea.hbm %s4286_s29, 4096  ;;  %s3506_s7 = scalar_lea.hbm %s4342_s4, 8192 }
 0x1b5   : > { %p3503_p6 = scmp.ne.s32.totalorder %s4286_s29, %s3502_s23  ;;  %p3507_p0 = scmp.lt.s32.totalorder %s4286_s29, %s4342_s4 }
 0x1b6   : > { %p3508_p3 = scmp.lt.s32.totalorder %s3506_s7, %s3502_s23 }
 0x1b7   : > { %p3504_p9 = pnand %p3503_p6, %p3692_p13 }
 0x1b8   : > { %p3509_p1 = por %p3508_p3, %p3507_p0 }
 0x1b9   : > { %p3505_p12 = pneg %p3504_p9 }
 0x1bb   : > { %p3510_p8 = pnand %p3509_p1, %p3505_p12 }
 0x1bd   : > { %3513 = shalt.err (!%p3510_p8)
}
 0x1be   : > { %s3579_s6 = smov 128   ;;  %s3580_s11 = smov 8  }
 0x1bf   : > { %3273 = dma.vmem_to_hbm [thread:$0]  (%p3692_p13), %s4288_s10, 4096, %s4286_s29, %s2548_s28, %s3579_s6, %s3579_s6, %s3580_s11  }
 0x1c0 PF: > { %s2578_s21 = sand.u32 1, %s3552_s15   ;;  %p4435_p11 = scmp.ne.s32.totalorder %s4348_s26, 0 }
 0x1c1   : > { %s2579_s18 = scalar_lea.sflag [#allocation4], %s2578_s21 }
 0x1c2   : > { %p3284_p2 = pnand %p2679_p10, %p4435_p11 }
 0x1c4   : > { %p3285_p5 = pneg %p3284_p2 }
 0x1c6   : > { %3547 = dma.done.wait (%p3285_p5), %s2579_s18, 4096  }
 0x1c7   : > { %3549 = vsyncadd (%p3285_p5), %s2579_s18, 4294963200  ;;  %s21_s20 = sadd.s32 1, %s3572_s20   ;;  %s4436_s15 = smov %s3556_s16 }
 0x1c8   : > { %p18_p7 = scmp.ge.s32.totalorder %s21_s20, 4   ;;  %s4437_s16 = smov %s3560_s17 }
 0x1c9   : > { %s4438_s17 = smov %s3701_s22  ;;  %s4439_s18 = smov %s3568_s19 }
 0x1ca   : > { %s4440_s19 = smov %s4442_s5  ;;  %20 = sbr.rel (!%p18_p7) target bundleno = 7 (0x7), region = 94 }
 0x1cf   :  { %2584 = vsyncpa [#allocation3], 1 }
 0x1d0   :  { %2586 = vsyncpa [#allocation3 + $0x1], 1 }
 0x1d1   :  { %2587 = vsyncpa [#allocation6], 1 }
 0x1d2   :  { %2588 = vsyncpa [#allocation4], 1 }
 0x1d3   :  { %2590 = vsyncpa [#allocation4 + $0x1], 1 }

</bundles_post_ra>
